<compile_context>
chip_gen: v5e
topology: v5e:2x2
jax: 0.10.0
libtpu: 0.0.40
codegen_flags: <defaults>
</compile_context>

<pallas_src>
import numpy as np
import jax
import jax.numpy as jnp
from jax.experimental import pallas as pl
from jax.experimental.pallas import tpu as pltpu

Z_SIZE = 32      # z_size (ctor default 128; shrunk for a small demo)
IMG = 16         # input spatial size
K5 = 5           # all conv kernels are 5x5


# -----------------------------------------------------------------------------
# Raw parameter init (matches VAEGAN.init_parameters: uniform weights, zero bias)
# -----------------------------------------------------------------------------
def _uinit(key, shape):
    scale = 1.0 / np.sqrt(np.prod(shape[1:])) / np.sqrt(3.0)
    return jax.random.uniform(key, shape, jnp.float32, -scale, scale)


def init_raw_params(key):
    shapes = {
        # Encoder: 3x16x16 -> conv -> conv -> fc -> (mu, logvar)
        "enc_c1_w": (8, 3, 5, 5), "enc_c2_w": (16, 8, 5, 5),
        "enc_fc_w": (64, 256), "enc_mu_w": (Z_SIZE, 64), "enc_var_w": (Z_SIZE, 64),
        # Decoder: z -> fc -> convT -> convT (tanh)
        "dec_fc_w": (256, Z_SIZE),
        "dec_t1_w": (16, 8, 5, 5), "dec_t2_w": (8, 3, 5, 5),
        # Discriminator: 3 convs (recon_level=3), fc, real/fake head, aux head
        "dis_c1_w": (8, 3, 5, 5), "dis_c2_w": (16, 8, 5, 5), "dis_c3_w": (32, 16, 5, 5),
        "dis_fc_w": (64, 128), "dis_out_w": (1, 64), "dis_aux_w": (10, 64),
    }
    params = {}
    keys = jax.random.split(key, len(shapes))
    for k_rng, (name, shp) in zip(keys, sorted(shapes.items())):
        params[name] = _uinit(k_rng, shp)
    bias_dims = {
        "enc_c1_b": 8, "enc_c2_b": 16, "enc_fc_b": 64, "enc_mu_b": Z_SIZE,
        "enc_var_b": Z_SIZE, "dec_fc_b": 256, "dec_t1_b": 8, "dec_t2_b": 3,
        "dis_c1_b": 8, "dis_c2_b": 16, "dis_c3_b": 32, "dis_fc_b": 64,
        "dis_out_b": 1, "dis_aux_b": 10,
    }
    for name, d in bias_dims.items():
        params[name] = jnp.zeros((d,), jnp.float32)
    return params


# -----------------------------------------------------------------------------
# Init-time constant builders: (G_i, M_i) factor pairs per conv / convT layer
#   activation layout: rows = sample*H + h,  lanes = w*C + c
#   conv(x)  =  sum_i  G_i @ (x @ M_i)  + bias_row
# -----------------------------------------------------------------------------
def _conv_gm(w, H, W, stride, pad, batch):
    w = np.asarray(w, np.float32)                    # (Cout, Cin, k, k)
    Cout, Cin, k, _ = w.shape
    Ho = (H + 2 * pad - k) // stride + 1
    Wo = (W + 2 * pad - k) // stride + 1
    G = np.zeros((k, batch * Ho, batch * H), np.float32)
    M = np.zeros((k, W * Cin, Wo * Cout), np.float32)
    for i in range(k):
        for b in range(batch):
            for ho in range(Ho):
                h = stride * ho + i - pad
                if 0 <= h < H:
                    G[i, b * Ho + ho, b * H + h] = 1.0
        for wo in range(Wo):
            for j in range(k):
                wi = stride * wo + j - pad
                if 0 <= wi < W:
                    M[i, wi * Cin:(wi + 1) * Cin, wo * Cout:(wo + 1) * Cout] = w[:, :, i, j].T
    return G, M, Ho, Wo


def _convT_gm(w, H, W, stride, pad, out_pad, batch):
    w = np.asarray(w, np.float32)                    # (Cin, Cout, k, k)
    Cin, Cout, k, _ = w.shape
    Ho = (H - 1) * stride - 2 * pad + k + out_pad
    Wo = (W - 1) * stride - 2 * pad + k + out_pad
    G = np.zeros((k, batch * Ho, batch * H), np.float32)
    M = np.zeros((k, W * Cin, Wo * Cout), np.float32)
    for i in range(k):
        for b in range(batch):
            for ho in range(Ho):
                num = ho + pad - i
                if num % stride == 0:
                    h = num // stride
                    if 0 <= h < H:
                        G[i, b * Ho + ho, b * H + h] = 1.0
        for wo in range(Wo):
            for wi in range(W):
                j = wo + pad - stride * wi
                if 0 <= j < k:
                    M[i, wi * Cin:(wi + 1) * Cin, wo * Cout:(wo + 1) * Cout] = w[:, :, i, j]
    return G, M, Ho, Wo


def _row_select(total_batch, Hrows, sample_ids, phases):
    # S[h, q, sid*Hrows + h] = 1  : picks spatial row h of sample sid
    S = np.zeros((phases, len(sample_ids), total_batch * Hrows), np.float32)
    for h in range(phases):
        for q, sid in enumerate(sample_ids):
            S[h, q, sid * Hrows + h] = 1.0
    return S


def _row_place(nb, Hrows):
    # P[h, b*Hrows + h, b] = 1  : scatters per-sample rows into the spatial layout
    P = np.zeros((Hrows, nb * Hrows, nb), np.float32)
    for h in range(Hrows):
        for b in range(nb):
            P[h, b * Hrows + h, b] = 1.0
    return P


W_ORDER = [
    "ec1_G", "ec1_M", "ec1_b", "ec2_G", "ec2_M", "ec2_b",
    "sel_enc", "efc_W", "efc_b", "ehead_W", "ehead_b",
    "dfc_W", "dfc_b", "place_dec",
    "dt1_G", "dt1_M", "dt1_b", "dt2_G", "dt2_M", "dt2_b",
    "dc1_G", "dc1_M", "dc1_b", "dc2_G", "dc2_M", "dc2_b",
    "dc3_G", "dc3_M", "dc3_b",
    "selL", "selG", "sfc_W", "sfc_b", "shead_W", "shead_b",
]
IN_ORDER = ["x0", "eps1", "eps2"] + W_ORDER


def prepare_constants(raw, B):
    """Done ONCE at init: Toeplitz factors, merged heads, selection matrices."""
    bf = lambda a: jnp.asarray(np.asarray(a, np.float32), jnp.bfloat16)
    f32row = lambda a: jnp.asarray(np.asarray(a, np.float32)[None, :], jnp.float32)

    def brow(b, Wo):
        return jnp.asarray(np.tile(np.asarray(b, np.float32), Wo)[None, :], jnp.float32)

    c = {}
    # ---- encoder ----
    G, M, _, Wo = _conv_gm(raw["enc_c1_w"], IMG, IMG, 2, 2, B)
    c["ec1_G"], c["ec1_M"], c["ec1_b"] = bf(G), bf(M), brow(raw["enc_c1_b"], Wo)
    G, M, _, Wo = _conv_gm(raw["enc_c2_w"], 8, 8, 2, 2, B)
    c["ec2_G"], c["ec2_M"], c["ec2_b"] = bf(G), bf(M), brow(raw["enc_c2_b"], Wo)
    c["sel_enc"] = bf(_row_select(B, 4, list(range(B)), 4))
    c["efc_W"], c["efc_b"] = bf(np.asarray(raw["enc_fc_w"]).T), f32row(raw["enc_fc_b"])
    ehw = np.concatenate([np.asarray(raw["enc_mu_w"]), np.asarray(raw["enc_var_w"])], 0).T
    ehb = np.concatenate([np.asarray(raw["enc_mu_b"]), np.asarray(raw["enc_var_b"])], 0)
    c["ehead_W"], c["ehead_b"] = bf(ehw), f32row(ehb)
    # ---- decoder (batched over 2B rows: [z ; eps]) ----
    c["dfc_W"], c["dfc_b"] = bf(np.asarray(raw["dec_fc_w"]).T), f32row(raw["dec_fc_b"])
    c["place_dec"] = bf(_row_place(2 * B, 4))
    G, M, _, Wo = _convT_gm(raw["dec_t1_w"], 4, 4, 2, 2, 1, 2 * B)
    c["dt1_G"], c["dt1_M"], c["dt1_b"] = bf(G), bf(M), brow(raw["dec_t1_b"], Wo)
    G, M, _, Wo = _convT_gm(raw["dec_t2_w"], 8, 8, 2, 2, 1, 2 * B)
    c["dt2_G"], c["dt2_M"], c["dt2_b"] = bf(G), bf(M), brow(raw["dec_t2_b"], Wo)
    # ---- discriminator (batched over 3B samples: [x_rec ; x_orig ; x_gen]) ----
    G, M, _, Wo = _conv_gm(raw["dis_c1_w"], IMG, IMG, 2, 2, 3 * B)
    c["dc1_G"], c["dc1_M"], c["dc1_b"] = bf(G), bf(M), brow(raw["dis_c1_b"], Wo)
    G, M, _, Wo = _conv_gm(raw["dis_c2_w"], 8, 8, 2, 2, 3 * B)
    c["dc2_G"], c["dc2_M"], c["dc2_b"] = bf(G), bf(M), brow(raw["dis_c2_b"], Wo)
    G, M, _, Wo = _conv_gm(raw["dis_c3_w"], 4, 4, 2, 2, 3 * B)
    c["dc3_G"], c["dc3_M"], c["dc3_b"] = bf(G), bf(M), brow(raw["dis_c3_b"], Wo)
    c["selL"] = bf(_row_select(3 * B, 2, list(range(2 * B)), 2))          # (x_rec, x_orig)
    c["selG"] = bf(_row_select(3 * B, 2, list(range(B, 3 * B)), 2))       # (x_orig, x_gen)
    c["sfc_W"], c["sfc_b"] = bf(np.asarray(raw["dis_fc_w"]).T), f32row(raw["dis_fc_b"])
    shw = np.concatenate([np.asarray(raw["dis_out_w"]), np.asarray(raw["dis_aux_w"])], 0).T
    shb = np.concatenate([np.asarray(raw["dis_out_b"]), np.asarray(raw["dis_aux_b"])], 0)
    c["shead_W"], c["shead_b"] = bf(shw), f32row(shb)
    return c


# -----------------------------------------------------------------------------
# The single fused Pallas kernel + its wrapper
# -----------------------------------------------------------------------------
def build_pallas_forward(prep, B):
    n_in = len(IN_ORDER)

    def kernel(*refs):
        r = dict(zip(IN_ORDER, refs[:n_in]))
        gen_o, rf_o, layer_o, mu_o, lv_o, aux_o = refs[n_in:n_in + 6]
        zcat_scr, xd_scr = refs[n_in + 6:]

        def conv(x, tag, act):
            g, m, bias = r[tag + "_G"], r[tag + "_M"], r[tag + "_b"]
            xb = x.astype(jnp.bfloat16)
            acc = None
            for i in range(K5):
                p = jnp.dot(xb, m[i], preferred_element_type=jnp.float32)
                t = jnp.dot(g[i], p.astype(jnp.bfloat16),
                            preferred_element_type=jnp.float32)
                acc = t if acc is None else acc + t
            y = acc + bias[...]
            return jnp.maximum(y, 0.0) if act == "relu" else jnp.tanh(y)

        def chunk_fc(x, sel, w, bias, nchunk, chunk):
            # flatten (NHWC order) folded into row-selection + weight-chunk dots
            xb = x.astype(jnp.bfloat16)
            acc = None
            for h in range(nchunk):
                rows = jnp.dot(sel[h], xb, preferred_element_type=jnp.float32)
                t = jnp.dot(rows.astype(jnp.bfloat16), w[h * chunk:(h + 1) * chunk, :],
                            preferred_element_type=jnp.float32)
                acc = t if acc is None else acc + t
            return acc + bias[...]

        def bdot(a, b):
            return jnp.dot(a.astype(jnp.bfloat16), b.astype(jnp.bfloat16),
                           preferred_element_type=jnp.float32)

        # ---------------- encoder ----------------
        x0 = r["x0"][...]                                       # (B*16, 48) bf16
        y = conv(x0, "ec1", "relu")                             # (B*8 , 64)
        y = conv(y, "ec2", "relu")                              # (B*4 , 64)
        hfc = jnp.maximum(chunk_fc(y, r["sel_enc"], r["efc_W"], r["efc_b"], 4, 64), 0.0)
        heads = bdot(hfc, r["ehead_W"][...]) + r["ehead_b"][...]   # (B, 2Z) merged heads
        mu = heads[:, :Z_SIZE]
        logvar = heads[:, Z_SIZE:2 * Z_SIZE]
        mu_o[...] = mu
        lv_o[...] = logvar

        # ------ reparameterize; batch both decoder passes along rows ------
        z = r["eps1"][...] * jnp.exp(0.5 * logvar) + mu         # (B, Z)
        zcat_scr[0:B, :] = z
        zcat_scr[B:2 * B, :] = r["eps2"][...]
        zc = zcat_scr[...]                                      # (2B, Z)

        # ---------------- decoder ([x_rec rows ; x_gen rows]) ----------------
        hdec = jnp.maximum(bdot(zc, r["dfc_W"][...]) + r["dfc_b"][...], 0.0)  # (2B,256)
        xdec = None
        for h in range(4):                                      # unflatten -> (2B*4, 64)
            t = bdot(r["place_dec"][h], hdec[:, h * 64:(h + 1) * 64])
            xdec = t if xdec is None else xdec + t
        y = conv(xdec, "dt1", "relu")                           # (2B*8 , 64)
        yimg = conv(y, "dt2", "tanh")                           # (2B*16, 48)
        gen_o[...] = yimg[B * IMG:2 * B * IMG, :]               # generated image rows

        # ---------- discriminator over [x_rec, x_orig, x_gen] ----------
        xd_scr[0:B * IMG, :] = yimg[0:B * IMG, :].astype(jnp.bfloat16)
        xd_scr[B * IMG:2 * B * IMG, :] = x0
        xd_scr[2 * B * IMG:3 * B * IMG, :] = yimg[B * IMG:2 * B * IMG, :].astype(jnp.bfloat16)
        f = xd_scr[...]                                         # (3B*16, 48)
        f = conv(f, "dc1", "relu")
        f = conv(f, "dc2", "relu")
        f = conv(f, "dc3", "relu")                              # (3B*2, 64), recon_level=3

        # 'REC' intermediate layer for (x_rec, x_orig), NHWC-flattened
        layer_o[:, 0:64] = bdot(r["selL"][0], f)
        layer_o[:, 64:128] = bdot(r["selL"][1], f)

        # 'GAN' head path over (x_orig, x_gen)
        hg = jnp.maximum(chunk_fc(f, r["selG"], r["sfc_W"], r["sfc_b"], 2, 64), 0.0)
        hd = bdot(hg, r["shead_W"][...]) + r["shead_b"][...]    # (2B, 1+10) merged heads
        rf_o[...] = 1.0 / (1.0 + jnp.exp(-hd[:, 0:1]))          # sigmoid
        a = hd[:, 1:11]
        mx = jnp.max(a, axis=-1, keepdims=True)                 # log_softmax
        aux_o[...] = a - mx - jnp.log(jnp.sum(jnp.exp(a - mx), axis=-1, keepdims=True))

    out_shape = (
        jax.ShapeDtypeStruct((B * IMG, IMG * 3), jnp.float32),  # generated image rows
        jax.ShapeDtypeStruct((2 * B, 1), jnp.float32),          # ten_real_fake
        jax.ShapeDtypeStruct((2 * B, 128), jnp.float32),        # ten_layer
        jax.ShapeDtypeStruct((B, Z_SIZE), jnp.float32),         # mu
        jax.ShapeDtypeStruct((B, Z_SIZE), jnp.float32),         # log_variances
        jax.ShapeDtypeStruct((2 * B, 10), jnp.float32),         # ten_aux (log-probs)
    )
    out_specs = tuple(
        pl.BlockSpec(s.shape, lambda i, nd=len(s.shape): (0,) * nd) for s in out_shape)
    scratch_shapes = [
        pltpu.VMEM((2 * B, Z_SIZE), jnp.float32),               # [z ; eps2]
        pltpu.VMEM((3 * B * IMG, IMG * 3), jnp.bfloat16),       # [x_rec ; x_orig ; x_gen]
    ]
    weights = [prep[n] for n in W_ORDER]

    @jax.jit
    def forward(x_nchw, eps1, eps2):
        # NCHW -> row layout (rows = b*H + h, lanes = w*C + c); done once at the edge.
        xr = jnp.transpose(x_nchw, (0, 2, 3, 1)).reshape(B * IMG, IMG * 3)
        ins = [xr.astype(jnp.bfloat16),
               eps1.astype(jnp.float32), eps2.astype(jnp.float32)] + weights
        in_specs = [pl.BlockSpec(a.shape, lambda i, nd=a.ndim: (0,) * nd) for a in ins]
        outs = pl.pallas_call(
            kernel,
            out_shape=out_shape,
            grid=(1,),
            in_specs=in_specs,
            out_specs=out_specs,
            scratch_shapes=scratch_shapes,
            compiler_params=pltpu.CompilerParams(
                dimension_semantics=("arbitrary",),
                vmem_limit_bytes=32 * 1024 * 1024),
        )(*ins)
        gen_rows, rf, layer, mu, lv, aux = outs
        ten = jnp.transpose(gen_rows.reshape(B, IMG, IMG, 3), (0, 3, 1, 2))
        return ten, rf, layer, mu, lv, aux

    return forward


# -----------------------------------------------------------------------------
# Pure-JAX f32 reference (same architecture / semantics) for a runtime check
# -----------------------------------------------------------------------------
def _act(y, act):
    if act == "relu":
        return jnp.maximum(y, 0.0)
    if act == "tanh":
        return jnp.tanh(y)
    return y


def _im2col(x, k, stride, pad):
    N, H, W, C = x.shape
    xp = jnp.pad(x, ((0, 0), (pad, pad), (pad, pad), (0, 0)))
    Ho = (H + 2 * pad - k) // stride + 1
    Wo = (W + 2 * pad - k) // stride + 1
    patches = []
    for i in range(k):
        for j in range(k):
            patches.append(xp[:, i:i + stride * (Ho - 1) + 1:stride,
                              j:j + stride * (Wo - 1) + 1:stride, :])
    cols = jnp.stack(patches, axis=3)
    return cols.reshape(N * Ho * Wo, k * k * C), Ho, Wo


def _conv_ref(x, w, b, stride, pad, act):
    Cout, Cin, k, _ = w.shape
    cols, Ho, Wo = _im2col(x, k, stride, pad)
    wm = jnp.transpose(w, (2, 3, 1, 0)).reshape(k * k * Cin, Cout)
    y = _act(cols @ wm + b, act)
    return y.reshape(x.shape[0], Ho, Wo, Cout)


def _convT_ref(x, w, b, stride, pad, out_pad, act):
    Cin, Cout, k, _ = w.shape
    N, H, W, C = x.shape
    Hd, Wd = (H - 1) * stride + 1, (W - 1) * stride + 1
    xd = jnp.zeros((N, Hd, Wd, C), x.dtype).at[:, ::stride, ::stride, :].set(x)
    ph = k - 1 - pad
    xd = jnp.pad(xd, ((0, 0), (ph, ph + out_pad), (ph, ph + out_pad), (0, 0)))
    wm = jnp.transpose(jnp.flip(w, (2, 3)), (2, 3, 0, 1)).reshape(k * k * Cin, Cout)
    cols, Ho, Wo = _im2col(xd, k, 1, 0)
    y = _act(cols @ wm + b, act)
    return y.reshape(N, Ho, Wo, Cout)


@jax.jit
def reference_forward(raw, x_nchw, eps1, eps2):
    B = x_nchw.shape[0]
    x = jnp.transpose(x_nchw, (0, 2, 3, 1))
    h = _conv_ref(x, raw["enc_c1_w"], raw["enc_c1_b"], 2, 2, "relu")
    h = _conv_ref(h, raw["enc_c2_w"], raw["enc_c2_b"], 2, 2, "relu")
    h = jnp.maximum(h.reshape(B, -1) @ raw["enc_fc_w"].T + raw["enc_fc_b"], 0.0)
    mu = h @ raw["enc_mu_w"].T + raw["enc_mu_b"]
    lv = h @ raw["enc_var_w"].T + raw["enc_var_b"]
    z = eps1 * jnp.exp(0.5 * lv) + mu
    zc = jnp.concatenate([z, eps2], axis=0)
    d = jnp.maximum(zc @ raw["dec_fc_w"].T + raw["dec_fc_b"], 0.0).reshape(2 * B, 4, 4, 16)
    d = _convT_ref(d, raw["dec_t1_w"], raw["dec_t1_b"], 2, 2, 1, "relu")
    d = _convT_ref(d, raw["dec_t2_w"], raw["dec_t2_b"], 2, 2, 1, "tanh")
    x_rec, x_gen = d[:B], d[B:]
    xs = jnp.concatenate([x_rec, x, x_gen], axis=0)
    f = _conv_ref(xs, raw["dis_c1_w"], raw["dis_c1_b"], 2, 2, "relu")
    f = _conv_ref(f, raw["dis_c2_w"], raw["dis_c2_b"], 2, 2, "relu")
    f = _conv_ref(f, raw["dis_c3_w"], raw["dis_c3_b"], 2, 2, "relu")
    feats = f.reshape(3 * B, -1)
    layer = feats[:2 * B]
    hg = jnp.maximum(feats[B:] @ raw["dis_fc_w"].T + raw["dis_fc_b"], 0.0)
    rf = jax.nn.sigmoid(hg @ raw["dis_out_w"].T + raw["dis_out_b"])
    aux = jax.nn.log_softmax(hg @ raw["dis_aux_w"].T + raw["dis_aux_b"], axis=-1)
    ten = jnp.transpose(x_gen, (0, 3, 1, 2))
    return ten, rf, layer, mu, lv, aux


# -----------------------------------------------------------------------------
if __name__ == "__main__":
    B = 2
    root = jax.random.PRNGKey(0)
    kp, kx, ke1, ke2 = jax.random.split(root, 4)

    raw = init_raw_params(kp)
    prep = prepare_constants(raw, B)                 # all weight prep done ONCE here

    x = jax.random.normal(kx, (B, 3, IMG, IMG), jnp.float32)
    eps1 = jax.random.normal(ke1, (B, Z_SIZE), jnp.float32)
    eps2 = jax.random.normal(ke2, (B, Z_SIZE), jnp.float32)

    fwd = build_pallas_forward(prep, B)
    outs = jax.block_until_ready(fwd(x, eps1, eps2))
    ten, rf, layer, mu, lv, aux = outs

    assert ten.shape == (B, 3, IMG, IMG)
    assert rf.shape == (2 * B, 1)
    assert layer.shape == (2 * B, 128)
    assert mu.shape == (B, Z_SIZE) and lv.shape == (B, Z_SIZE)
    assert aux.shape == (2 * B, 10)
    for o in outs:
        assert bool(jnp.all(jnp.isfinite(o)))

    # numeric check vs. pure-JAX f32 reference (bf16 MXU operands -> loose tol)
    refs = jax.block_until_ready(reference_forward(raw, x, eps1, eps2))
    names = ["ten", "real_fake", "layer", "mu", "log_var", "aux"]
    for name, o, rr in zip(names, outs, refs):
        o = np.asarray(o, np.float32)
        rr = np.asarray(rr, np.float32)
        rel = np.linalg.norm(o - rr) / (np.linalg.norm(rr) + 1e-6)
        assert rel < 5e-2, f"{name}: rel_err={rel}"

    print("KERNEL_OK")
</pallas_src>

<mosaic_0001>
module attributes {stable_mosaic.version = 11 : i64} {
  func.func @kernel(%arg0: i32, %arg1: memref<32x48xbf16, #tpu.memory_space<vmem>>, %arg2: memref<2x32xf32, #tpu.memory_space<vmem>>, %arg3: memref<2x32xf32, #tpu.memory_space<vmem>>, %arg4: memref<5x16x32xbf16, #tpu.memory_space<vmem>>, %arg5: memref<5x48x64xbf16, #tpu.memory_space<vmem>>, %arg6: memref<1x64xf32, #tpu.memory_space<vmem>>, %arg7: memref<5x8x16xbf16, #tpu.memory_space<vmem>>, %arg8: memref<5x64x64xbf16, #tpu.memory_space<vmem>>, %arg9: memref<1x64xf32, #tpu.memory_space<vmem>>, %arg10: memref<4x2x8xbf16, #tpu.memory_space<vmem>>, %arg11: memref<256x64xbf16, #tpu.memory_space<vmem>>, %arg12: memref<1x64xf32, #tpu.memory_space<vmem>>, %arg13: memref<64x64xbf16, #tpu.memory_space<vmem>>, %arg14: memref<1x64xf32, #tpu.memory_space<vmem>>, %arg15: memref<32x256xbf16, #tpu.memory_space<vmem>>, %arg16: memref<1x256xf32, #tpu.memory_space<vmem>>, %arg17: memref<4x16x4xbf16, #tpu.memory_space<vmem>>, %arg18: memref<5x32x16xbf16, #tpu.memory_space<vmem>>, %arg19: memref<5x64x64xbf16, #tpu.memory_space<vmem>>, %arg20: memref<1x64xf32, #tpu.memory_space<vmem>>, %arg21: memref<5x64x32xbf16, #tpu.memory_space<vmem>>, %arg22: memref<5x64x48xbf16, #tpu.memory_space<vmem>>, %arg23: memref<1x48xf32, #tpu.memory_space<vmem>>, %arg24: memref<5x48x96xbf16, #tpu.memory_space<vmem>>, %arg25: memref<5x48x64xbf16, #tpu.memory_space<vmem>>, %arg26: memref<1x64xf32, #tpu.memory_space<vmem>>, %arg27: memref<5x24x48xbf16, #tpu.memory_space<vmem>>, %arg28: memref<5x64x64xbf16, #tpu.memory_space<vmem>>, %arg29: memref<1x64xf32, #tpu.memory_space<vmem>>, %arg30: memref<5x12x24xbf16, #tpu.memory_space<vmem>>, %arg31: memref<5x64x64xbf16, #tpu.memory_space<vmem>>, %arg32: memref<1x64xf32, #tpu.memory_space<vmem>>, %arg33: memref<2x4x12xbf16, #tpu.memory_space<vmem>>, %arg34: memref<2x4x12xbf16, #tpu.memory_space<vmem>>, %arg35: memref<128x64xbf16, #tpu.memory_space<vmem>>, %arg36: memref<1x64xf32, #tpu.memory_space<vmem>>, %arg37: memref<64x11xbf16, #tpu.memory_space<vmem>>, %arg38: memref<1x11xf32, #tpu.memory_space<vmem>>, %arg39: memref<32x48xf32, #tpu.memory_space<vmem>>, %arg40: memref<4x1xf32, #tpu.memory_space<vmem>>, %arg41: memref<4x128xf32, #tpu.memory_space<vmem>>, %arg42: memref<2x32xf32, #tpu.memory_space<vmem>>, %arg43: memref<2x32xf32, #tpu.memory_space<vmem>>, %arg44: memref<4x10xf32, #tpu.memory_space<vmem>>, %arg45: memref<4x32xf32, #tpu.memory_space<vmem>>, %arg46: memref<96x48xbf16, #tpu.memory_space<vmem>>) attributes {dimension_semantics = [#tpu.dimension_semantics<arbitrary>], iteration_bounds = array<i64: 1>, scalar_prefetch = 0 : i64, scratch_operands = 2 : i64, tpu.core_type = #tpu.core_type<tc>, window_params = [{pipeline_mode = #tpu.pipeline_mode<synchronous>, transform_indices = @transform_0, window_bounds = array<i64: 32, 48>}, {pipeline_mode = #tpu.pipeline_mode<synchronous>, transform_indices = @transform_1, window_bounds = array<i64: 2, 32>}, {pipeline_mode = #tpu.pipeline_mode<synchronous>, transform_indices = @transform_2, window_bounds = array<i64: 2, 32>}, {pipeline_mode = #tpu.pipeline_mode<synchronous>, transform_indices = @transform_3, window_bounds = array<i64: 5, 16, 32>}, {pipeline_mode = #tpu.pipeline_mode<synchronous>, transform_indices = @transform_4, window_bounds = array<i64: 5, 48, 64>}, {pipeline_mode = #tpu.pipeline_mode<synchronous>, transform_indices = @transform_5, window_bounds = array<i64: 1, 64>}, {pipeline_mode = #tpu.pipeline_mode<synchronous>, transform_indices = @transform_6, window_bounds = array<i64: 5, 8, 16>}, {pipeline_mode = #tpu.pipeline_mode<synchronous>, transform_indices = @transform_7, window_bounds = array<i64: 5, 64, 64>}, {pipeline_mode = #tpu.pipeline_mode<synchronous>, transform_indices = @transform_8, window_bounds = array<i64: 1, 64>}, {pipeline_mode = #tpu.pipeline_mode<synchronous>, transform_indices = @transform_9, window_bounds = array<i64: 4, 2, 8>}, {pipeline_mode = #tpu.pipeline_mode<synchronous>, transform_indices = @transform_10, window_bounds = array<i64: 256, 64>}, {pipeline_mode = #tpu.pipeline_mode<synchronous>, transform_indices = @transform_11, window_bounds = array<i64: 1, 64>}, {pipeline_mode = #tpu.pipeline_mode<synchronous>, transform_indices = @transform_12, window_bounds = array<i64: 64, 64>}, {pipeline_mode = #tpu.pipeline_mode<synchronous>, transform_indices = @transform_13, window_bounds = array<i64: 1, 64>}, {pipeline_mode = #tpu.pipeline_mode<synchronous>, transform_indices = @transform_14, window_bounds = array<i64: 32, 256>}, {pipeline_mode = #tpu.pipeline_mode<synchronous>, transform_indices = @transform_15, window_bounds = array<i64: 1, 256>}, {pipeline_mode = #tpu.pipeline_mode<synchronous>, transform_indices = @transform_16, window_bounds = array<i64: 4, 16, 4>}, {pipeline_mode = #tpu.pipeline_mode<synchronous>, transform_indices = @transform_17, window_bounds = array<i64: 5, 32, 16>}, {pipeline_mode = #tpu.pipeline_mode<synchronous>, transform_indices = @transform_18, window_bounds = array<i64: 5, 64, 64>}, {pipeline_mode = #tpu.pipeline_mode<synchronous>, transform_indices = @transform_19, window_bounds = array<i64: 1, 64>}, {pipeline_mode = #tpu.pipeline_mode<synchronous>, transform_indices = @transform_20, window_bounds = array<i64: 5, 64, 32>}, {pipeline_mode = #tpu.pipeline_mode<synchronous>, transform_indices = @transform_21, window_bounds = array<i64: 5, 64, 48>}, {pipeline_mode = #tpu.pipeline_mode<synchronous>, transform_indices = @transform_22, window_bounds = array<i64: 1, 48>}, {pipeline_mode = #tpu.pipeline_mode<synchronous>, transform_indices = @transform_23, window_bounds = array<i64: 5, 48, 96>}, {pipeline_mode = #tpu.pipeline_mode<synchronous>, transform_indices = @transform_24, window_bounds = array<i64: 5, 48, 64>}, {pipeline_mode = #tpu.pipeline_mode<synchronous>, transform_indices = @transform_25, window_bounds = array<i64: 1, 64>}, {pipeline_mode = #tpu.pipeline_mode<synchronous>, transform_indices = @transform_26, window_bounds = array<i64: 5, 24, 48>}, {pipeline_mode = #tpu.pipeline_mode<synchronous>, transform_indices = @transform_27, window_bounds = array<i64: 5, 64, 64>}, {pipeline_mode = #tpu.pipeline_mode<synchronous>, transform_indices = @transform_28, window_bounds = array<i64: 1, 64>}, {pipeline_mode = #tpu.pipeline_mode<synchronous>, transform_indices = @transform_29, window_bounds = array<i64: 5, 12, 24>}, {pipeline_mode = #tpu.pipeline_mode<synchronous>, transform_indices = @transform_30, window_bounds = array<i64: 5, 64, 64>}, {pipeline_mode = #tpu.pipeline_mode<synchronous>, transform_indices = @transform_31, window_bounds = array<i64: 1, 64>}, {pipeline_mode = #tpu.pipeline_mode<synchronous>, transform_indices = @transform_32, window_bounds = array<i64: 2, 4, 12>}, {pipeline_mode = #tpu.pipeline_mode<synchronous>, transform_indices = @transform_33, window_bounds = array<i64: 2, 4, 12>}, {pipeline_mode = #tpu.pipeline_mode<synchronous>, transform_indices = @transform_34, window_bounds = array<i64: 128, 64>}, {pipeline_mode = #tpu.pipeline_mode<synchronous>, transform_indices = @transform_35, window_bounds = array<i64: 1, 64>}, {pipeline_mode = #tpu.pipeline_mode<synchronous>, transform_indices = @transform_36, window_bounds = array<i64: 64, 11>}, {pipeline_mode = #tpu.pipeline_mode<synchronous>, transform_indices = @transform_37, window_bounds = array<i64: 1, 11>}, {pipeline_mode = #tpu.pipeline_mode<synchronous>, transform_indices = @transform_38, window_bounds = array<i64: 32, 48>}, {pipeline_mode = #tpu.pipeline_mode<synchronous>, transform_indices = @transform_39, window_bounds = array<i64: 4, 1>}, {pipeline_mode = #tpu.pipeline_mode<synchronous>, transform_indices = @transform_40, window_bounds = array<i64: 4, 128>}, {pipeline_mode = #tpu.pipeline_mode<synchronous>, transform_indices = @transform_41, window_bounds = array<i64: 2, 32>}, {pipeline_mode = #tpu.pipeline_mode<synchronous>, transform_indices = @transform_42, window_bounds = array<i64: 2, 32>}, {pipeline_mode = #tpu.pipeline_mode<synchronous>, transform_indices = @transform_43, window_bounds = array<i64: 4, 10>}]} {
    %c0 = arith.constant 0 : index
    %c0_0 = arith.constant 0 : index
    %0 = vector.load %arg1[%c0, %c0_0] : memref<32x48xbf16, #tpu.memory_space<vmem>>, vector<32x48xbf16>
    %c0_1 = arith.constant 0 : index
    %c0_2 = arith.constant 0 : index
    %c0_3 = arith.constant 0 : index
    %1 = vector.load %arg5[%c0_1, %c0_2, %c0_3] : memref<5x48x64xbf16, #tpu.memory_space<vmem>>, vector<1x48x64xbf16>
    %2 = vector.shape_cast %1 : vector<1x48x64xbf16> to vector<48x64xbf16>
    %cst = arith.constant dense<0.000000e+00> : vector<32x64xf32>
    %3 = tpu.matmul %0, %2, %cst {dimension_numbers = #tpu.dot_dimension_numbers<[1], [0], [0], [1], [0, 0, 1, 1], [], []>} : vector<32x48xbf16>, vector<48x64xbf16>, vector<32x64xf32> -> vector<32x64xf32>
    %c0_4 = arith.constant 0 : index
    %c0_5 = arith.constant 0 : index
    %c0_6 = arith.constant 0 : index
    %4 = vector.load %arg4[%c0_4, %c0_5, %c0_6] : memref<5x16x32xbf16, #tpu.memory_space<vmem>>, vector<1x16x32xbf16>
    %5 = vector.shape_cast %4 : vector<1x16x32xbf16> to vector<16x32xbf16>
    %6 = arith.truncf %3 : vector<32x64xf32> to vector<32x64xbf16>
    %cst_7 = arith.constant dense<0.000000e+00> : vector<16x64xf32>
    %7 = tpu.matmul %5, %6, %cst_7 {dimension_numbers = #tpu.dot_dimension_numbers<[1], [0], [0], [1], [0, 0, 1, 1], [], []>} : vector<16x32xbf16>, vector<32x64xbf16>, vector<16x64xf32> -> vector<16x64xf32>
    %c1 = arith.constant 1 : index
    %c0_8 = arith.constant 0 : index
    %c0_9 = arith.constant 0 : index
    %8 = vector.load %arg5[%c1, %c0_8, %c0_9] : memref<5x48x64xbf16, #tpu.memory_space<vmem>>, vector<1x48x64xbf16>
    %9 = vector.shape_cast %8 : vector<1x48x64xbf16> to vector<48x64xbf16>
    %cst_10 = arith.constant dense<0.000000e+00> : vector<32x64xf32>
    %10 = tpu.matmul %0, %9, %cst_10 {dimension_numbers = #tpu.dot_dimension_numbers<[1], [0], [0], [1], [0, 0, 1, 1], [], []>} : vector<32x48xbf16>, vector<48x64xbf16>, vector<32x64xf32> -> vector<32x64xf32>
    %c1_11 = arith.constant 1 : index
    %c0_12 = arith.constant 0 : index
    %c0_13 = arith.constant 0 : index
    %11 = vector.load %arg4[%c1_11, %c0_12, %c0_13] : memref<5x16x32xbf16, #tpu.memory_space<vmem>>, vector<1x16x32xbf16>
    %12 = vector.shape_cast %11 : vector<1x16x32xbf16> to vector<16x32xbf16>
    %13 = arith.truncf %10 : vector<32x64xf32> to vector<32x64xbf16>
    %cst_14 = arith.constant dense<0.000000e+00> : vector<16x64xf32>
    %14 = tpu.matmul %12, %13, %cst_14 {dimension_numbers = #tpu.dot_dimension_numbers<[1], [0], [0], [1], [0, 0, 1, 1], [], []>} : vector<16x32xbf16>, vector<32x64xbf16>, vector<16x64xf32> -> vector<16x64xf32>
    %15 = arith.addf %7, %14 : vector<16x64xf32>
    %c2 = arith.constant 2 : index
    %c0_15 = arith.constant 0 : index
    %c0_16 = arith.constant 0 : index
    %16 = vector.load %arg5[%c2, %c0_15, %c0_16] : memref<5x48x64xbf16, #tpu.memory_space<vmem>>, vector<1x48x64xbf16>
    %17 = vector.shape_cast %16 : vector<1x48x64xbf16> to vector<48x64xbf16>
    %cst_17 = arith.constant dense<0.000000e+00> : vector<32x64xf32>
    %18 = tpu.matmul %0, %17, %cst_17 {dimension_numbers = #tpu.dot_dimension_numbers<[1], [0], [0], [1], [0, 0, 1, 1], [], []>} : vector<32x48xbf16>, vector<48x64xbf16>, vector<32x64xf32> -> vector<32x64xf32>
    %c2_18 = arith.constant 2 : index
    %c0_19 = arith.constant 0 : index
    %c0_20 = arith.constant 0 : index
    %19 = vector.load %arg4[%c2_18, %c0_19, %c0_20] : memref<5x16x32xbf16, #tpu.memory_space<vmem>>, vector<1x16x32xbf16>
    %20 = vector.shape_cast %19 : vector<1x16x32xbf16> to vector<16x32xbf16>
    %21 = arith.truncf %18 : vector<32x64xf32> to vector<32x64xbf16>
    %cst_21 = arith.constant dense<0.000000e+00> : vector<16x64xf32>
    %22 = tpu.matmul %20, %21, %cst_21 {dimension_numbers = #tpu.dot_dimension_numbers<[1], [0], [0], [1], [0, 0, 1, 1], [], []>} : vector<16x32xbf16>, vector<32x64xbf16>, vector<16x64xf32> -> vector<16x64xf32>
    %23 = arith.addf %15, %22 : vector<16x64xf32>
    %c3 = arith.constant 3 : index
    %c0_22 = arith.constant 0 : index
    %c0_23 = arith.constant 0 : index
    %24 = vector.load %arg5[%c3, %c0_22, %c0_23] : memref<5x48x64xbf16, #tpu.memory_space<vmem>>, vector<1x48x64xbf16>
    %25 = vector.shape_cast %24 : vector<1x48x64xbf16> to vector<48x64xbf16>
    %cst_24 = arith.constant dense<0.000000e+00> : vector<32x64xf32>
    %26 = tpu.matmul %0, %25, %cst_24 {dimension_numbers = #tpu.dot_dimension_numbers<[1], [0], [0], [1], [0, 0, 1, 1], [], []>} : vector<32x48xbf16>, vector<48x64xbf16>, vector<32x64xf32> -> vector<32x64xf32>
    %c3_25 = arith.constant 3 : index
    %c0_26 = arith.constant 0 : index
    %c0_27 = arith.constant 0 : index
    %27 = vector.load %arg4[%c3_25, %c0_26, %c0_27] : memref<5x16x32xbf16, #tpu.memory_space<vmem>>, vector<1x16x32xbf16>
    %28 = vector.shape_cast %27 : vector<1x16x32xbf16> to vector<16x32xbf16>
    %29 = arith.truncf %26 : vector<32x64xf32> to vector<32x64xbf16>
    %cst_28 = arith.constant dense<0.000000e+00> : vector<16x64xf32>
    %30 = tpu.matmul %28, %29, %cst_28 {dimension_numbers = #tpu.dot_dimension_numbers<[1], [0], [0], [1], [0, 0, 1, 1], [], []>} : vector<16x32xbf16>, vector<32x64xbf16>, vector<16x64xf32> -> vector<16x64xf32>
    %31 = arith.addf %23, %30 : vector<16x64xf32>
    %c4 = arith.constant 4 : index
    %c0_29 = arith.constant 0 : index
    %c0_30 = arith.constant 0 : index
    %32 = vector.load %arg5[%c4, %c0_29, %c0_30] : memref<5x48x64xbf16, #tpu.memory_space<vmem>>, vector<1x48x64xbf16>
    %33 = vector.shape_cast %32 : vector<1x48x64xbf16> to vector<48x64xbf16>
    %cst_31 = arith.constant dense<0.000000e+00> : vector<32x64xf32>
    %34 = tpu.matmul %0, %33, %cst_31 {dimension_numbers = #tpu.dot_dimension_numbers<[1], [0], [0], [1], [0, 0, 1, 1], [], []>} : vector<32x48xbf16>, vector<48x64xbf16>, vector<32x64xf32> -> vector<32x64xf32>
    %c4_32 = arith.constant 4 : index
    %c0_33 = arith.constant 0 : index
    %c0_34 = arith.constant 0 : index
    %35 = vector.load %arg4[%c4_32, %c0_33, %c0_34] : memref<5x16x32xbf16, #tpu.memory_space<vmem>>, vector<1x16x32xbf16>
    %36 = vector.shape_cast %35 : vector<1x16x32xbf16> to vector<16x32xbf16>
    %37 = arith.truncf %34 : vector<32x64xf32> to vector<32x64xbf16>
    %cst_35 = arith.constant dense<0.000000e+00> : vector<16x64xf32>
    %38 = tpu.matmul %36, %37, %cst_35 {dimension_numbers = #tpu.dot_dimension_numbers<[1], [0], [0], [1], [0, 0, 1, 1], [], []>} : vector<16x32xbf16>, vector<32x64xbf16>, vector<16x64xf32> -> vector<16x64xf32>
    %39 = arith.addf %31, %38 : vector<16x64xf32>
    %c0_36 = arith.constant 0 : index
    %c0_37 = arith.constant 0 : index
    %40 = vector.load %arg6[%c0_36, %c0_37] : memref<1x64xf32, #tpu.memory_space<vmem>>, vector<1x64xf32>
    %41 = vector.broadcast %40 : vector<1x64xf32> to vector<16x64xf32>
    %42 = arith.addf %39, %41 : vector<16x64xf32>
    %cst_38 = arith.constant 0.000000e+00 : f32
    %43 = vector.broadcast %cst_38 : f32 to vector<16x64xf32>
    %44 = arith.maximumf %42, %43 : vector<16x64xf32>
    %45 = arith.truncf %44 : vector<16x64xf32> to vector<16x64xbf16>
    %c0_39 = arith.constant 0 : index
    %c0_40 = arith.constant 0 : index
    %c0_41 = arith.constant 0 : index
    %46 = vector.load %arg8[%c0_39, %c0_40, %c0_41] : memref<5x64x64xbf16, #tpu.memory_space<vmem>>, vector<1x64x64xbf16>
    %47 = vector.shape_cast %46 : vector<1x64x64xbf16> to vector<64x64xbf16>
    %cst_42 = arith.constant dense<0.000000e+00> : vector<16x64xf32>
    %48 = tpu.matmul %45, %47, %cst_42 {dimension_numbers = #tpu.dot_dimension_numbers<[1], [0], [0], [1], [0, 0, 1, 1], [], []>} : vector<16x64xbf16>, vector<64x64xbf16>, vector<16x64xf32> -> vector<16x64xf32>
    %c0_43 = arith.constant 0 : index
    %c0_44 = arith.constant 0 : index
    %c0_45 = arith.constant 0 : index
    %49 = vector.load %arg7[%c0_43, %c0_44, %c0_45] : memref<5x8x16xbf16, #tpu.memory_space<vmem>>, vector<1x8x16xbf16>
    %50 = vector.shape_cast %49 : vector<1x8x16xbf16> to vector<8x16xbf16>
    %51 = arith.truncf %48 : vector<16x64xf32> to vector<16x64xbf16>
    %cst_46 = arith.constant dense<0.000000e+00> : vector<8x64xf32>
    %52 = tpu.matmul %50, %51, %cst_46 {dimension_numbers = #tpu.dot_dimension_numbers<[1], [0], [0], [1], [0, 0, 1, 1], [], []>} : vector<8x16xbf16>, vector<16x64xbf16>, vector<8x64xf32> -> vector<8x64xf32>
    %c1_47 = arith.constant 1 : index
    %c0_48 = arith.constant 0 : index
    %c0_49 = arith.constant 0 : index
    %53 = vector.load %arg8[%c1_47, %c0_48, %c0_49] : memref<5x64x64xbf16, #tpu.memory_space<vmem>>, vector<1x64x64xbf16>
    %54 = vector.shape_cast %53 : vector<1x64x64xbf16> to vector<64x64xbf16>
    %cst_50 = arith.constant dense<0.000000e+00> : vector<16x64xf32>
    %55 = tpu.matmul %45, %54, %cst_50 {dimension_numbers = #tpu.dot_dimension_numbers<[1], [0], [0], [1], [0, 0, 1, 1], [], []>} : vector<16x64xbf16>, vector<64x64xbf16>, vector<16x64xf32> -> vector<16x64xf32>
    %c1_51 = arith.constant 1 : index
    %c0_52 = arith.constant 0 : index
    %c0_53 = arith.constant 0 : index
    %56 = vector.load %arg7[%c1_51, %c0_52, %c0_53] : memref<5x8x16xbf16, #tpu.memory_space<vmem>>, vector<1x8x16xbf16>
    %57 = vector.shape_cast %56 : vector<1x8x16xbf16> to vector<8x16xbf16>
    %58 = arith.truncf %55 : vector<16x64xf32> to vector<16x64xbf16>
    %cst_54 = arith.constant dense<0.000000e+00> : vector<8x64xf32>
    %59 = tpu.matmul %57, %58, %cst_54 {dimension_numbers = #tpu.dot_dimension_numbers<[1], [0], [0], [1], [0, 0, 1, 1], [], []>} : vector<8x16xbf16>, vector<16x64xbf16>, vector<8x64xf32> -> vector<8x64xf32>
    %60 = arith.addf %52, %59 : vector<8x64xf32>
    %c2_55 = arith.constant 2 : index
    %c0_56 = arith.constant 0 : index
    %c0_57 = arith.constant 0 : index
    %61 = vector.load %arg8[%c2_55, %c0_56, %c0_57] : memref<5x64x64xbf16, #tpu.memory_space<vmem>>, vector<1x64x64xbf16>
    %62 = vector.shape_cast %61 : vector<1x64x64xbf16> to vector<64x64xbf16>
    %cst_58 = arith.constant dense<0.000000e+00> : vector<16x64xf32>
    %63 = tpu.matmul %45, %62, %cst_58 {dimension_numbers = #tpu.dot_dimension_numbers<[1], [0], [0], [1], [0, 0, 1, 1], [], []>} : vector<16x64xbf16>, vector<64x64xbf16>, vector<16x64xf32> -> vector<16x64xf32>
    %c2_59 = arith.constant 2 : index
    %c0_60 = arith.constant 0 : index
    %c0_61 = arith.constant 0 : index
    %64 = vector.load %arg7[%c2_59, %c0_60, %c0_61] : memref<5x8x16xbf16, #tpu.memory_space<vmem>>, vector<1x8x16xbf16>
    %65 = vector.shape_cast %64 : vector<1x8x16xbf16> to vector<8x16xbf16>
    %66 = arith.truncf %63 : vector<16x64xf32> to vector<16x64xbf16>
    %cst_62 = arith.constant dense<0.000000e+00> : vector<8x64xf32>
    %67 = tpu.matmul %65, %66, %cst_62 {dimension_numbers = #tpu.dot_dimension_numbers<[1], [0], [0], [1], [0, 0, 1, 1], [], []>} : vector<8x16xbf16>, vector<16x64xbf16>, vector<8x64xf32> -> vector<8x64xf32>
    %68 = arith.addf %60, %67 : vector<8x64xf32>
    %c3_63 = arith.constant 3 : index
    %c0_64 = arith.constant 0 : index
    %c0_65 = arith.constant 0 : index
    %69 = vector.load %arg8[%c3_63, %c0_64, %c0_65] : memref<5x64x64xbf16, #tpu.memory_space<vmem>>, vector<1x64x64xbf16>
    %70 = vector.shape_cast %69 : vector<1x64x64xbf16> to vector<64x64xbf16>
    %cst_66 = arith.constant dense<0.000000e+00> : vector<16x64xf32>
    %71 = tpu.matmul %45, %70, %cst_66 {dimension_numbers = #tpu.dot_dimension_numbers<[1], [0], [0], [1], [0, 0, 1, 1], [], []>} : vector<16x64xbf16>, vector<64x64xbf16>, vector<16x64xf32> -> vector<16x64xf32>
    %c3_67 = arith.constant 3 : index
    %c0_68 = arith.constant 0 : index
    %c0_69 = arith.constant 0 : index
    %72 = vector.load %arg7[%c3_67, %c0_68, %c0_69] : memref<5x8x16xbf16, #tpu.memory_space<vmem>>, vector<1x8x16xbf16>
    %73 = vector.shape_cast %72 : vector<1x8x16xbf16> to vector<8x16xbf16>
    %74 = arith.truncf %71 : vector<16x64xf32> to vector<16x64xbf16>
    %cst_70 = arith.constant dense<0.000000e+00> : vector<8x64xf32>
    %75 = tpu.matmul %73, %74, %cst_70 {dimension_numbers = #tpu.dot_dimension_numbers<[1], [0], [0], [1], [0, 0, 1, 1], [], []>} : vector<8x16xbf16>, vector<16x64xbf16>, vector<8x64xf32> -> vector<8x64xf32>
    %76 = arith.addf %68, %75 : vector<8x64xf32>
    %c4_71 = arith.constant 4 : index
    %c0_72 = arith.constant 0 : index
    %c0_73 = arith.constant 0 : index
    %77 = vector.load %arg8[%c4_71, %c0_72, %c0_73] : memref<5x64x64xbf16, #tpu.memory_space<vmem>>, vector<1x64x64xbf16>
    %78 = vector.shape_cast %77 : vector<1x64x64xbf16> to vector<64x64xbf16>
    %cst_74 = arith.constant dense<0.000000e+00> : vector<16x64xf32>
    %79 = tpu.matmul %45, %78, %cst_74 {dimension_numbers = #tpu.dot_dimension_numbers<[1], [0], [0], [1], [0, 0, 1, 1], [], []>} : vector<16x64xbf16>, vector<64x64xbf16>, vector<16x64xf32> -> vector<16x64xf32>
    %c4_75 = arith.constant 4 : index
    %c0_76 = arith.constant 0 : index
    %c0_77 = arith.constant 0 : index
    %80 = vector.load %arg7[%c4_75, %c0_76, %c0_77] : memref<5x8x16xbf16, #tpu.memory_space<vmem>>, vector<1x8x16xbf16>
    %81 = vector.shape_cast %80 : vector<1x8x16xbf16> to vector<8x16xbf16>
    %82 = arith.truncf %79 : vector<16x64xf32> to vector<16x64xbf16>
    %cst_78 = arith.constant dense<0.000000e+00> : vector<8x64xf32>
    %83 = tpu.matmul %81, %82, %cst_78 {dimension_numbers = #tpu.dot_dimension_numbers<[1], [0], [0], [1], [0, 0, 1, 1], [], []>} : vector<8x16xbf16>, vector<16x64xbf16>, vector<8x64xf32> -> vector<8x64xf32>
    %84 = arith.addf %76, %83 : vector<8x64xf32>
    %c0_79 = arith.constant 0 : index
    %c0_80 = arith.constant 0 : index
    %85 = vector.load %arg9[%c0_79, %c0_80] : memref<1x64xf32, #tpu.memory_space<vmem>>, vector<1x64xf32>
    %86 = vector.broadcast %85 : vector<1x64xf32> to vector<8x64xf32>
    %87 = arith.addf %84, %86 : vector<8x64xf32>
    %cst_81 = arith.constant 0.000000e+00 : f32
    %88 = vector.broadcast %cst_81 : f32 to vector<8x64xf32>
    %89 = arith.maximumf %87, %88 : vector<8x64xf32>
    %90 = arith.truncf %89 : vector<8x64xf32> to vector<8x64xbf16>
    %c0_82 = arith.constant 0 : index
    %c0_83 = arith.constant 0 : index
    %c0_84 = arith.constant 0 : index
    %91 = vector.load %arg10[%c0_82, %c0_83, %c0_84] : memref<4x2x8xbf16, #tpu.memory_space<vmem>>, vector<1x2x8xbf16>
    %92 = vector.shape_cast %91 : vector<1x2x8xbf16> to vector<2x8xbf16>
    %cst_85 = arith.constant dense<0.000000e+00> : vector<2x64xf32>
    %93 = tpu.matmul %92, %90, %cst_85 {dimension_numbers = #tpu.dot_dimension_numbers<[1], [0], [0], [1], [0, 0, 1, 1], [], []>} : vector<2x8xbf16>, vector<8x64xbf16>, vector<2x64xf32> -> vector<2x64xf32>
    %94 = arith.truncf %93 : vector<2x64xf32> to vector<2x64xbf16>
    %c0_86 = arith.constant 0 : index
    %c0_87 = arith.constant 0 : index
    %95 = vector.load %arg11[%c0_86, %c0_87] : memref<256x64xbf16, #tpu.memory_space<vmem>>, vector<64x64xbf16>
    %cst_88 = arith.constant dense<0.000000e+00> : vector<2x64xf32>
    %96 = tpu.matmul %94, %95, %cst_88 {dimension_numbers = #tpu.dot_dimension_numbers<[1], [0], [0], [1], [0, 0, 1, 1], [], []>} : vector<2x64xbf16>, vector<64x64xbf16>, vector<2x64xf32> -> vector<2x64xf32>
    %c1_89 = arith.constant 1 : index
    %c0_90 = arith.constant 0 : index
    %c0_91 = arith.constant 0 : index
    %97 = vector.load %arg10[%c1_89, %c0_90, %c0_91] : memref<4x2x8xbf16, #tpu.memory_space<vmem>>, vector<1x2x8xbf16>
    %98 = vector.shape_cast %97 : vector<1x2x8xbf16> to vector<2x8xbf16>
    %cst_92 = arith.constant dense<0.000000e+00> : vector<2x64xf32>
    %99 = tpu.matmul %98, %90, %cst_92 {dimension_numbers = #tpu.dot_dimension_numbers<[1], [0], [0], [1], [0, 0, 1, 1], [], []>} : vector<2x8xbf16>, vector<8x64xbf16>, vector<2x64xf32> -> vector<2x64xf32>
    %100 = arith.truncf %99 : vector<2x64xf32> to vector<2x64xbf16>
    %c64 = arith.constant 64 : index
    %c0_93 = arith.constant 0 : index
    %101 = vector.load %arg11[%c64, %c0_93] : memref<256x64xbf16, #tpu.memory_space<vmem>>, vector<64x64xbf16>
    %cst_94 = arith.constant dense<0.000000e+00> : vector<2x64xf32>
    %102 = tpu.matmul %100, %101, %cst_94 {dimension_numbers = #tpu.dot_dimension_numbers<[1], [0], [0], [1], [0, 0, 1, 1], [], []>} : vector<2x64xbf16>, vector<64x64xbf16>, vector<2x64xf32> -> vector<2x64xf32>
    %103 = arith.addf %96, %102 : vector<2x64xf32>
    %c2_95 = arith.constant 2 : index
    %c0_96 = arith.constant 0 : index
    %c0_97 = arith.constant 0 : index
    %104 = vector.load %arg10[%c2_95, %c0_96, %c0_97] : memref<4x2x8xbf16, #tpu.memory_space<vmem>>, vector<1x2x8xbf16>
    %105 = vector.shape_cast %104 : vector<1x2x8xbf16> to vector<2x8xbf16>
    %cst_98 = arith.constant dense<0.000000e+00> : vector<2x64xf32>
    %106 = tpu.matmul %105, %90, %cst_98 {dimension_numbers = #tpu.dot_dimension_numbers<[1], [0], [0], [1], [0, 0, 1, 1], [], []>} : vector<2x8xbf16>, vector<8x64xbf16>, vector<2x64xf32> -> vector<2x64xf32>
    %107 = arith.truncf %106 : vector<2x64xf32> to vector<2x64xbf16>
    %c128 = arith.constant 128 : index
    %c0_99 = arith.constant 0 : index
    %108 = vector.load %arg11[%c128, %c0_99] : memref<256x64xbf16, #tpu.memory_space<vmem>>, vector<64x64xbf16>
    %cst_100 = arith.constant dense<0.000000e+00> : vector<2x64xf32>
    %109 = tpu.matmul %107, %108, %cst_100 {dimension_numbers = #tpu.dot_dimension_numbers<[1], [0], [0], [1], [0, 0, 1, 1], [], []>} : vector<2x64xbf16>, vector<64x64xbf16>, vector<2x64xf32> -> vector<2x64xf32>
    %110 = arith.addf %103, %109 : vector<2x64xf32>
    %c3_101 = arith.constant 3 : index
    %c0_102 = arith.constant 0 : index
    %c0_103 = arith.constant 0 : index
    %111 = vector.load %arg10[%c3_101, %c0_102, %c0_103] : memref<4x2x8xbf16, #tpu.memory_space<vmem>>, vector<1x2x8xbf16>
    %112 = vector.shape_cast %111 : vector<1x2x8xbf16> to vector<2x8xbf16>
    %cst_104 = arith.constant dense<0.000000e+00> : vector<2x64xf32>
    %113 = tpu.matmul %112, %90, %cst_104 {dimension_numbers = #tpu.dot_dimension_numbers<[1], [0], [0], [1], [0, 0, 1, 1], [], []>} : vector<2x8xbf16>, vector<8x64xbf16>, vector<2x64xf32> -> vector<2x64xf32>
    %114 = arith.truncf %113 : vector<2x64xf32> to vector<2x64xbf16>
    %c192 = arith.constant 192 : index
    %c0_105 = arith.constant 0 : index
    %115 = vector.load %arg11[%c192, %c0_105] : memref<256x64xbf16, #tpu.memory_space<vmem>>, vector<64x64xbf16>
    %cst_106 = arith.constant dense<0.000000e+00> : vector<2x64xf32>
    %116 = tpu.matmul %114, %115, %cst_106 {dimension_numbers = #tpu.dot_dimension_numbers<[1], [0], [0], [1], [0, 0, 1, 1], [], []>} : vector<2x64xbf16>, vector<64x64xbf16>, vector<2x64xf32> -> vector<2x64xf32>
    %117 = arith.addf %110, %116 : vector<2x64xf32>
    %c0_107 = arith.constant 0 : index
    %c0_108 = arith.constant 0 : index
    %118 = vector.load %arg12[%c0_107, %c0_108] : memref<1x64xf32, #tpu.memory_space<vmem>>, vector<1x64xf32>
    %119 = vector.broadcast %118 : vector<1x64xf32> to vector<2x64xf32>
    %120 = arith.addf %117, %119 : vector<2x64xf32>
    %cst_109 = arith.constant 0.000000e+00 : f32
    %121 = vector.broadcast %cst_109 : f32 to vector<2x64xf32>
    %122 = arith.maximumf %120, %121 : vector<2x64xf32>
    %c0_110 = arith.constant 0 : index
    %c0_111 = arith.constant 0 : index
    %123 = vector.load %arg13[%c0_110, %c0_111] : memref<64x64xbf16, #tpu.memory_space<vmem>>, vector<64x64xbf16>
    %124 = arith.truncf %122 : vector<2x64xf32> to vector<2x64xbf16>
    %cst_112 = arith.constant dense<0.000000e+00> : vector<2x64xf32>
    %125 = tpu.matmul %124, %123, %cst_112 {dimension_numbers = #tpu.dot_dimension_numbers<[1], [0], [0], [1], [0, 0, 1, 1], [], []>} : vector<2x64xbf16>, vector<64x64xbf16>, vector<2x64xf32> -> vector<2x64xf32>
    %c0_113 = arith.constant 0 : index
    %c0_114 = arith.constant 0 : index
    %126 = vector.load %arg14[%c0_113, %c0_114] : memref<1x64xf32, #tpu.memory_space<vmem>>, vector<1x64xf32>
    %127 = vector.broadcast %126 : vector<1x64xf32> to vector<2x64xf32>
    %128 = arith.addf %125, %127 : vector<2x64xf32>
    %129 = vector.extract_strided_slice %128 {offsets = [0, 0], sizes = [2, 32], strides = [1, 1]} : vector<2x64xf32> to vector<2x32xf32>
    %130 = vector.extract_strided_slice %128 {offsets = [0, 32], sizes = [2, 32], strides = [1, 1]} : vector<2x64xf32> to vector<2x32xf32>
    %c0_115 = arith.constant 0 : index
    %c0_116 = arith.constant 0 : index
    %131 = vector.load %arg42[%c0_115, %c0_116] : memref<2x32xf32, #tpu.memory_space<vmem>>, vector<2x32xf32>
    tpu.vector_store %arg42[%c0_115, %c0_116], %129 {strides = array<i32>} : memref<2x32xf32, #tpu.memory_space<vmem>>, vector<2x32xf32>,
    %c0_117 = arith.constant 0 : index
    %c0_118 = arith.constant 0 : index
    %132 = vector.load %arg43[%c0_117, %c0_118] : memref<2x32xf32, #tpu.memory_space<vmem>>, vector<2x32xf32>
    tpu.vector_store %arg43[%c0_117, %c0_118], %130 {strides = array<i32>} : memref<2x32xf32, #tpu.memory_space<vmem>>, vector<2x32xf32>,
    %c0_119 = arith.constant 0 : index
    %c0_120 = arith.constant 0 : index
    %133 = vector.load %arg2[%c0_119, %c0_120] : memref<2x32xf32, #tpu.memory_space<vmem>>, vector<2x32xf32>
    %cst_121 = arith.constant 5.000000e-01 : f32
    %134 = vector.broadcast %cst_121 : f32 to vector<2x32xf32>
    %135 = arith.mulf %134, %130 : vector<2x32xf32>
    %136 = math.exp %135 : vector<2x32xf32>
    %137 = arith.mulf %133, %136 : vector<2x32xf32>
    %138 = arith.addf %137, %129 : vector<2x32xf32>
    %c0_122 = arith.constant 0 : index
    %c0_123 = arith.constant 0 : index
    %139 = vector.load %arg45[%c0_122, %c0_123] : memref<4x32xf32, #tpu.memory_space<vmem>>, vector<2x32xf32>
    tpu.vector_store %arg45[%c0_122, %c0_123], %138 {strides = array<i32>} : memref<4x32xf32, #tpu.memory_space<vmem>>, vector<2x32xf32>,
    %c0_124 = arith.constant 0 : index
    %c0_125 = arith.constant 0 : index
    %140 = vector.load %arg3[%c0_124, %c0_125] : memref<2x32xf32, #tpu.memory_space<vmem>>, vector<2x32xf32>
    %c2_126 = arith.constant 2 : index
    %c0_127 = arith.constant 0 : index
    %141 = vector.load %arg45[%c2_126, %c0_127] : memref<4x32xf32, #tpu.memory_space<vmem>>, vector<2x32xf32>
    tpu.vector_store %arg45[%c2_126, %c0_127], %140 {strides = array<i32>} : memref<4x32xf32, #tpu.memory_space<vmem>>, vector<2x32xf32>,
    %c0_128 = arith.constant 0 : index
    %c0_129 = arith.constant 0 : index
    %142 = vector.load %arg45[%c0_128, %c0_129] : memref<4x32xf32, #tpu.memory_space<vmem>>, vector<4x32xf32>
    %c0_130 = arith.constant 0 : index
    %c0_131 = arith.constant 0 : index
    %143 = vector.load %arg15[%c0_130, %c0_131] : memref<32x256xbf16, #tpu.memory_space<vmem>>, vector<32x256xbf16>
    %144 = arith.truncf %142 : vector<4x32xf32> to vector<4x32xbf16>
    %cst_132 = arith.constant dense<0.000000e+00> : vector<4x256xf32>
    %145 = tpu.matmul %144, %143, %cst_132 {dimension_numbers = #tpu.dot_dimension_numbers<[1], [0], [0], [1], [0, 0, 1, 1], [], []>} : vector<4x32xbf16>, vector<32x256xbf16>, vector<4x256xf32> -> vector<4x256xf32>
    %c0_133 = arith.constant 0 : index
    %c0_134 = arith.constant 0 : index
    %146 = vector.load %arg16[%c0_133, %c0_134] : memref<1x256xf32, #tpu.memory_space<vmem>>, vector<1x256xf32>
    %147 = vector.broadcast %146 : vector<1x256xf32> to vector<4x256xf32>
    %148 = arith.addf %145, %147 : vector<4x256xf32>
    %cst_135 = arith.constant 0.000000e+00 : f32
    %149 = vector.broadcast %cst_135 : f32 to vector<4x256xf32>
    %150 = arith.maximumf %148, %149 : vector<4x256xf32>
    %c0_136 = arith.constant 0 : index
    %c0_137 = arith.constant 0 : index
    %c0_138 = arith.constant 0 : index
    %151 = vector.load %arg17[%c0_136, %c0_137, %c0_138] : memref<4x16x4xbf16, #tpu.memory_space<vmem>>, vector<1x16x4xbf16>
    %152 = vector.shape_cast %151 : vector<1x16x4xbf16> to vector<16x4xbf16>
    %153 = vector.extract_strided_slice %150 {offsets = [0, 0], sizes = [4, 64], strides = [1, 1]} : vector<4x256xf32> to vector<4x64xf32>
    %154 = arith.truncf %153 : vector<4x64xf32> to vector<4x64xbf16>
    %cst_139 = arith.constant dense<0.000000e+00> : vector<16x64xf32>
    %155 = tpu.matmul %152, %154, %cst_139 {dimension_numbers = #tpu.dot_dimension_numbers<[1], [0], [0], [1], [0, 0, 1, 1], [], []>} : vector<16x4xbf16>, vector<4x64xbf16>, vector<16x64xf32> -> vector<16x64xf32>
    %c1_140 = arith.constant 1 : index
    %c0_141 = arith.constant 0 : index
    %c0_142 = arith.constant 0 : index
    %156 = vector.load %arg17[%c1_140, %c0_141, %c0_142] : memref<4x16x4xbf16, #tpu.memory_space<vmem>>, vector<1x16x4xbf16>
    %157 = vector.shape_cast %156 : vector<1x16x4xbf16> to vector<16x4xbf16>
    %158 = vector.extract_strided_slice %150 {offsets = [0, 64], sizes = [4, 64], strides = [1, 1]} : vector<4x256xf32> to vector<4x64xf32>
    %159 = arith.truncf %158 : vector<4x64xf32> to vector<4x64xbf16>
    %cst_143 = arith.constant dense<0.000000e+00> : vector<16x64xf32>
    %160 = tpu.matmul %157, %159, %cst_143 {dimension_numbers = #tpu.dot_dimension_numbers<[1], [0], [0], [1], [0, 0, 1, 1], [], []>} : vector<16x4xbf16>, vector<4x64xbf16>, vector<16x64xf32> -> vector<16x64xf32>
    %161 = arith.addf %155, %160 : vector<16x64xf32>
    %c2_144 = arith.constant 2 : index
    %c0_145 = arith.constant 0 : index
    %c0_146 = arith.constant 0 : index
    %162 = vector.load %arg17[%c2_144, %c0_145, %c0_146] : memref<4x16x4xbf16, #tpu.memory_space<vmem>>, vector<1x16x4xbf16>
    %163 = vector.shape_cast %162 : vector<1x16x4xbf16> to vector<16x4xbf16>
    %164 = vector.extract_strided_slice %150 {offsets = [0, 128], sizes = [4, 64], strides = [1, 1]} : vector<4x256xf32> to vector<4x64xf32>
    %165 = arith.truncf %164 : vector<4x64xf32> to vector<4x64xbf16>
    %cst_147 = arith.constant dense<0.000000e+00> : vector<16x64xf32>
    %166 = tpu.matmul %163, %165, %cst_147 {dimension_numbers = #tpu.dot_dimension_numbers<[1], [0], [0], [1], [0, 0, 1, 1], [], []>} : vector<16x4xbf16>, vector<4x64xbf16>, vector<16x64xf32> -> vector<16x64xf32>
    %167 = arith.addf %161, %166 : vector<16x64xf32>
    %c3_148 = arith.constant 3 : index
    %c0_149 = arith.constant 0 : index
    %c0_150 = arith.constant 0 : index
    %168 = vector.load %arg17[%c3_148, %c0_149, %c0_150] : memref<4x16x4xbf16, #tpu.memory_space<vmem>>, vector<1x16x4xbf16>
    %169 = vector.shape_cast %168 : vector<1x16x4xbf16> to vector<16x4xbf16>
    %170 = vector.extract_strided_slice %150 {offsets = [0, 192], sizes = [4, 64], strides = [1, 1]} : vector<4x256xf32> to vector<4x64xf32>
    %171 = arith.truncf %170 : vector<4x64xf32> to vector<4x64xbf16>
    %cst_151 = arith.constant dense<0.000000e+00> : vector<16x64xf32>
    %172 = tpu.matmul %169, %171, %cst_151 {dimension_numbers = #tpu.dot_dimension_numbers<[1], [0], [0], [1], [0, 0, 1, 1], [], []>} : vector<16x4xbf16>, vector<4x64xbf16>, vector<16x64xf32> -> vector<16x64xf32>
    %173 = arith.addf %167, %172 : vector<16x64xf32>
    %174 = arith.truncf %173 : vector<16x64xf32> to vector<16x64xbf16>
    %c0_152 = arith.constant 0 : index
    %c0_153 = arith.constant 0 : index
    %c0_154 = arith.constant 0 : index
    %175 = vector.load %arg19[%c0_152, %c0_153, %c0_154] : memref<5x64x64xbf16, #tpu.memory_space<vmem>>, vector<1x64x64xbf16>
    %176 = vector.shape_cast %175 : vector<1x64x64xbf16> to vector<64x64xbf16>
    %cst_155 = arith.constant dense<0.000000e+00> : vector<16x64xf32>
    %177 = tpu.matmul %174, %176, %cst_155 {dimension_numbers = #tpu.dot_dimension_numbers<[1], [0], [0], [1], [0, 0, 1, 1], [], []>} : vector<16x64xbf16>, vector<64x64xbf16>, vector<16x64xf32> -> vector<16x64xf32>
    %c0_156 = arith.constant 0 : index
    %c0_157 = arith.constant 0 : index
    %c0_158 = arith.constant 0 : index
    %178 = vector.load %arg18[%c0_156, %c0_157, %c0_158] : memref<5x32x16xbf16, #tpu.memory_space<vmem>>, vector<1x32x16xbf16>
    %179 = vector.shape_cast %178 : vector<1x32x16xbf16> to vector<32x16xbf16>
    %180 = arith.truncf %177 : vector<16x64xf32> to vector<16x64xbf16>
    %cst_159 = arith.constant dense<0.000000e+00> : vector<32x64xf32>
    %181 = tpu.matmul %179, %180, %cst_159 {dimension_numbers = #tpu.dot_dimension_numbers<[1], [0], [0], [1], [0, 0, 1, 1], [], []>} : vector<32x16xbf16>, vector<16x64xbf16>, vector<32x64xf32> -> vector<32x64xf32>
    %c1_160 = arith.constant 1 : index
    %c0_161 = arith.constant 0 : index
    %c0_162 = arith.constant 0 : index
    %182 = vector.load %arg19[%c1_160, %c0_161, %c0_162] : memref<5x64x64xbf16, #tpu.memory_space<vmem>>, vector<1x64x64xbf16>
    %183 = vector.shape_cast %182 : vector<1x64x64xbf16> to vector<64x64xbf16>
    %cst_163 = arith.constant dense<0.000000e+00> : vector<16x64xf32>
    %184 = tpu.matmul %174, %183, %cst_163 {dimension_numbers = #tpu.dot_dimension_numbers<[1], [0], [0], [1], [0, 0, 1, 1], [], []>} : vector<16x64xbf16>, vector<64x64xbf16>, vector<16x64xf32> -> vector<16x64xf32>
    %c1_164 = arith.constant 1 : index
    %c0_165 = arith.constant 0 : index
    %c0_166 = arith.constant 0 : index
    %185 = vector.load %arg18[%c1_164, %c0_165, %c0_166] : memref<5x32x16xbf16, #tpu.memory_space<vmem>>, vector<1x32x16xbf16>
    %186 = vector.shape_cast %185 : vector<1x32x16xbf16> to vector<32x16xbf16>
    %187 = arith.truncf %184 : vector<16x64xf32> to vector<16x64xbf16>
    %cst_167 = arith.constant dense<0.000000e+00> : vector<32x64xf32>
    %188 = tpu.matmul %186, %187, %cst_167 {dimension_numbers = #tpu.dot_dimension_numbers<[1], [0], [0], [1], [0, 0, 1, 1], [], []>} : vector<32x16xbf16>, vector<16x64xbf16>, vector<32x64xf32> -> vector<32x64xf32>
    %189 = arith.addf %181, %188 : vector<32x64xf32>
    %c2_168 = arith.constant 2 : index
    %c0_169 = arith.constant 0 : index
    %c0_170 = arith.constant 0 : index
    %190 = vector.load %arg19[%c2_168, %c0_169, %c0_170] : memref<5x64x64xbf16, #tpu.memory_space<vmem>>, vector<1x64x64xbf16>
    %191 = vector.shape_cast %190 : vector<1x64x64xbf16> to vector<64x64xbf16>
    %cst_171 = arith.constant dense<0.000000e+00> : vector<16x64xf32>
    %192 = tpu.matmul %174, %191, %cst_171 {dimension_numbers = #tpu.dot_dimension_numbers<[1], [0], [0], [1], [0, 0, 1, 1], [], []>} : vector<16x64xbf16>, vector<64x64xbf16>, vector<16x64xf32> -> vector<16x64xf32>
    %c2_172 = arith.constant 2 : index
    %c0_173 = arith.constant 0 : index
    %c0_174 = arith.constant 0 : index
    %193 = vector.load %arg18[%c2_172, %c0_173, %c0_174] : memref<5x32x16xbf16, #tpu.memory_space<vmem>>, vector<1x32x16xbf16>
    %194 = vector.shape_cast %193 : vector<1x32x16xbf16> to vector<32x16xbf16>
    %195 = arith.truncf %192 : vector<16x64xf32> to vector<16x64xbf16>
    %cst_175 = arith.constant dense<0.000000e+00> : vector<32x64xf32>
    %196 = tpu.matmul %194, %195, %cst_175 {dimension_numbers = #tpu.dot_dimension_numbers<[1], [0], [0], [1], [0, 0, 1, 1], [], []>} : vector<32x16xbf16>, vector<16x64xbf16>, vector<32x64xf32> -> vector<32x64xf32>
    %197 = arith.addf %189, %196 : vector<32x64xf32>
    %c3_176 = arith.constant 3 : index
    %c0_177 = arith.constant 0 : index
    %c0_178 = arith.constant 0 : index
    %198 = vector.load %arg19[%c3_176, %c0_177, %c0_178] : memref<5x64x64xbf16, #tpu.memory_space<vmem>>, vector<1x64x64xbf16>
    %199 = vector.shape_cast %198 : vector<1x64x64xbf16> to vector<64x64xbf16>
    %cst_179 = arith.constant dense<0.000000e+00> : vector<16x64xf32>
    %200 = tpu.matmul %174, %199, %cst_179 {dimension_numbers = #tpu.dot_dimension_numbers<[1], [0], [0], [1], [0, 0, 1, 1], [], []>} : vector<16x64xbf16>, vector<64x64xbf16>, vector<16x64xf32> -> vector<16x64xf32>
    %c3_180 = arith.constant 3 : index
    %c0_181 = arith.constant 0 : index
    %c0_182 = arith.constant 0 : index
    %201 = vector.load %arg18[%c3_180, %c0_181, %c0_182] : memref<5x32x16xbf16, #tpu.memory_space<vmem>>, vector<1x32x16xbf16>
    %202 = vector.shape_cast %201 : vector<1x32x16xbf16> to vector<32x16xbf16>
    %203 = arith.truncf %200 : vector<16x64xf32> to vector<16x64xbf16>
    %cst_183 = arith.constant dense<0.000000e+00> : vector<32x64xf32>
    %204 = tpu.matmul %202, %203, %cst_183 {dimension_numbers = #tpu.dot_dimension_numbers<[1], [0], [0], [1], [0, 0, 1, 1], [], []>} : vector<32x16xbf16>, vector<16x64xbf16>, vector<32x64xf32> -> vector<32x64xf32>
    %205 = arith.addf %197, %204 : vector<32x64xf32>
    %c4_184 = arith.constant 4 : index
    %c0_185 = arith.constant 0 : index
    %c0_186 = arith.constant 0 : index
    %206 = vector.load %arg19[%c4_184, %c0_185, %c0_186] : memref<5x64x64xbf16, #tpu.memory_space<vmem>>, vector<1x64x64xbf16>
    %207 = vector.shape_cast %206 : vector<1x64x64xbf16> to vector<64x64xbf16>
    %cst_187 = arith.constant dense<0.000000e+00> : vector<16x64xf32>
    %208 = tpu.matmul %174, %207, %cst_187 {dimension_numbers = #tpu.dot_dimension_numbers<[1], [0], [0], [1], [0, 0, 1, 1], [], []>} : vector<16x64xbf16>, vector<64x64xbf16>, vector<16x64xf32> -> vector<16x64xf32>
    %c4_188 = arith.constant 4 : index
    %c0_189 = arith.constant 0 : index
    %c0_190 = arith.constant 0 : index
    %209 = vector.load %arg18[%c4_188, %c0_189, %c0_190] : memref<5x32x16xbf16, #tpu.memory_space<vmem>>, vector<1x32x16xbf16>
    %210 = vector.shape_cast %209 : vector<1x32x16xbf16> to vector<32x16xbf16>
    %211 = arith.truncf %208 : vector<16x64xf32> to vector<16x64xbf16>
    %cst_191 = arith.constant dense<0.000000e+00> : vector<32x64xf32>
    %212 = tpu.matmul %210, %211, %cst_191 {dimension_numbers = #tpu.dot_dimension_numbers<[1], [0], [0], [1], [0, 0, 1, 1], [], []>} : vector<32x16xbf16>, vector<16x64xbf16>, vector<32x64xf32> -> vector<32x64xf32>
    %213 = arith.addf %205, %212 : vector<32x64xf32>
    %c0_192 = arith.constant 0 : index
    %c0_193 = arith.constant 0 : index
    %214 = vector.load %arg20[%c0_192, %c0_193] : memref<1x64xf32, #tpu.memory_space<vmem>>, vector<1x64xf32>
    %215 = vector.broadcast %214 : vector<1x64xf32> to vector<32x64xf32>
    %216 = arith.addf %213, %215 : vector<32x64xf32>
    %cst_194 = arith.constant 0.000000e+00 : f32
    %217 = vector.broadcast %cst_194 : f32 to vector<32x64xf32>
    %218 = arith.maximumf %216, %217 : vector<32x64xf32>
    %219 = arith.truncf %218 : vector<32x64xf32> to vector<32x64xbf16>
    %c0_195 = arith.constant 0 : index
    %c0_196 = arith.constant 0 : index
    %c0_197 = arith.constant 0 : index
    %220 = vector.load %arg22[%c0_195, %c0_196, %c0_197] : memref<5x64x48xbf16, #tpu.memory_space<vmem>>, vector<1x64x48xbf16>
    %221 = vector.shape_cast %220 : vector<1x64x48xbf16> to vector<64x48xbf16>
    %cst_198 = arith.constant dense<0.000000e+00> : vector<32x48xf32>
    %222 = tpu.matmul %219, %221, %cst_198 {dimension_numbers = #tpu.dot_dimension_numbers<[1], [0], [0], [1], [0, 0, 1, 1], [], []>} : vector<32x64xbf16>, vector<64x48xbf16>, vector<32x48xf32> -> vector<32x48xf32>
    %c0_199 = arith.constant 0 : index
    %c0_200 = arith.constant 0 : index
    %c0_201 = arith.constant 0 : index
    %223 = vector.load %arg21[%c0_199, %c0_200, %c0_201] : memref<5x64x32xbf16, #tpu.memory_space<vmem>>, vector<1x64x32xbf16>
    %224 = vector.shape_cast %223 : vector<1x64x32xbf16> to vector<64x32xbf16>
    %225 = arith.truncf %222 : vector<32x48xf32> to vector<32x48xbf16>
    %cst_202 = arith.constant dense<0.000000e+00> : vector<64x48xf32>
    %226 = tpu.matmul %224, %225, %cst_202 {dimension_numbers = #tpu.dot_dimension_numbers<[1], [0], [0], [1], [0, 0, 1, 1], [], []>} : vector<64x32xbf16>, vector<32x48xbf16>, vector<64x48xf32> -> vector<64x48xf32>
    %c1_203 = arith.constant 1 : index
    %c0_204 = arith.constant 0 : index
    %c0_205 = arith.constant 0 : index
    %227 = vector.load %arg22[%c1_203, %c0_204, %c0_205] : memref<5x64x48xbf16, #tpu.memory_space<vmem>>, vector<1x64x48xbf16>
    %228 = vector.shape_cast %227 : vector<1x64x48xbf16> to vector<64x48xbf16>
    %cst_206 = arith.constant dense<0.000000e+00> : vector<32x48xf32>
    %229 = tpu.matmul %219, %228, %cst_206 {dimension_numbers = #tpu.dot_dimension_numbers<[1], [0], [0], [1], [0, 0, 1, 1], [], []>} : vector<32x64xbf16>, vector<64x48xbf16>, vector<32x48xf32> -> vector<32x48xf32>
    %c1_207 = arith.constant 1 : index
    %c0_208 = arith.constant 0 : index
    %c0_209 = arith.constant 0 : index
    %230 = vector.load %arg21[%c1_207, %c0_208, %c0_209] : memref<5x64x32xbf16, #tpu.memory_space<vmem>>, vector<1x64x32xbf16>
    %231 = vector.shape_cast %230 : vector<1x64x32xbf16> to vector<64x32xbf16>
    %232 = arith.truncf %229 : vector<32x48xf32> to vector<32x48xbf16>
    %cst_210 = arith.constant dense<0.000000e+00> : vector<64x48xf32>
    %233 = tpu.matmul %231, %232, %cst_210 {dimension_numbers = #tpu.dot_dimension_numbers<[1], [0], [0], [1], [0, 0, 1, 1], [], []>} : vector<64x32xbf16>, vector<32x48xbf16>, vector<64x48xf32> -> vector<64x48xf32>
    %234 = arith.addf %226, %233 : vector<64x48xf32>
    %c2_211 = arith.constant 2 : index
    %c0_212 = arith.constant 0 : index
    %c0_213 = arith.constant 0 : index
    %235 = vector.load %arg22[%c2_211, %c0_212, %c0_213] : memref<5x64x48xbf16, #tpu.memory_space<vmem>>, vector<1x64x48xbf16>
    %236 = vector.shape_cast %235 : vector<1x64x48xbf16> to vector<64x48xbf16>
    %cst_214 = arith.constant dense<0.000000e+00> : vector<32x48xf32>
    %237 = tpu.matmul %219, %236, %cst_214 {dimension_numbers = #tpu.dot_dimension_numbers<[1], [0], [0], [1], [0, 0, 1, 1], [], []>} : vector<32x64xbf16>, vector<64x48xbf16>, vector<32x48xf32> -> vector<32x48xf32>
    %c2_215 = arith.constant 2 : index
    %c0_216 = arith.constant 0 : index
    %c0_217 = arith.constant 0 : index
    %238 = vector.load %arg21[%c2_215, %c0_216, %c0_217] : memref<5x64x32xbf16, #tpu.memory_space<vmem>>, vector<1x64x32xbf16>
    %239 = vector.shape_cast %238 : vector<1x64x32xbf16> to vector<64x32xbf16>
    %240 = arith.truncf %237 : vector<32x48xf32> to vector<32x48xbf16>
    %cst_218 = arith.constant dense<0.000000e+00> : vector<64x48xf32>
    %241 = tpu.matmul %239, %240, %cst_218 {dimension_numbers = #tpu.dot_dimension_numbers<[1], [0], [0], [1], [0, 0, 1, 1], [], []>} : vector<64x32xbf16>, vector<32x48xbf16>, vector<64x48xf32> -> vector<64x48xf32>
    %242 = arith.addf %234, %241 : vector<64x48xf32>
    %c3_219 = arith.constant 3 : index
    %c0_220 = arith.constant 0 : index
    %c0_221 = arith.constant 0 : index
    %243 = vector.load %arg22[%c3_219, %c0_220, %c0_221] : memref<5x64x48xbf16, #tpu.memory_space<vmem>>, vector<1x64x48xbf16>
    %244 = vector.shape_cast %243 : vector<1x64x48xbf16> to vector<64x48xbf16>
    %cst_222 = arith.constant dense<0.000000e+00> : vector<32x48xf32>
    %245 = tpu.matmul %219, %244, %cst_222 {dimension_numbers = #tpu.dot_dimension_numbers<[1], [0], [0], [1], [0, 0, 1, 1], [], []>} : vector<32x64xbf16>, vector<64x48xbf16>, vector<32x48xf32> -> vector<32x48xf32>
    %c3_223 = arith.constant 3 : index
    %c0_224 = arith.constant 0 : index
    %c0_225 = arith.constant 0 : index
    %246 = vector.load %arg21[%c3_223, %c0_224, %c0_225] : memref<5x64x32xbf16, #tpu.memory_space<vmem>>, vector<1x64x32xbf16>
    %247 = vector.shape_cast %246 : vector<1x64x32xbf16> to vector<64x32xbf16>
    %248 = arith.truncf %245 : vector<32x48xf32> to vector<32x48xbf16>
    %cst_226 = arith.constant dense<0.000000e+00> : vector<64x48xf32>
    %249 = tpu.matmul %247, %248, %cst_226 {dimension_numbers = #tpu.dot_dimension_numbers<[1], [0], [0], [1], [0, 0, 1, 1], [], []>} : vector<64x32xbf16>, vector<32x48xbf16>, vector<64x48xf32> -> vector<64x48xf32>
    %250 = arith.addf %242, %249 : vector<64x48xf32>
    %c4_227 = arith.constant 4 : index
    %c0_228 = arith.constant 0 : index
    %c0_229 = arith.constant 0 : index
    %251 = vector.load %arg22[%c4_227, %c0_228, %c0_229] : memref<5x64x48xbf16, #tpu.memory_space<vmem>>, vector<1x64x48xbf16>
    %252 = vector.shape_cast %251 : vector<1x64x48xbf16> to vector<64x48xbf16>
    %cst_230 = arith.constant dense<0.000000e+00> : vector<32x48xf32>
    %253 = tpu.matmul %219, %252, %cst_230 {dimension_numbers = #tpu.dot_dimension_numbers<[1], [0], [0], [1], [0, 0, 1, 1], [], []>} : vector<32x64xbf16>, vector<64x48xbf16>, vector<32x48xf32> -> vector<32x48xf32>
    %c4_231 = arith.constant 4 : index
    %c0_232 = arith.constant 0 : index
    %c0_233 = arith.constant 0 : index
    %254 = vector.load %arg21[%c4_231, %c0_232, %c0_233] : memref<5x64x32xbf16, #tpu.memory_space<vmem>>, vector<1x64x32xbf16>
    %255 = vector.shape_cast %254 : vector<1x64x32xbf16> to vector<64x32xbf16>
    %256 = arith.truncf %253 : vector<32x48xf32> to vector<32x48xbf16>
    %cst_234 = arith.constant dense<0.000000e+00> : vector<64x48xf32>
    %257 = tpu.matmul %255, %256, %cst_234 {dimension_numbers = #tpu.dot_dimension_numbers<[1], [0], [0], [1], [0, 0, 1, 1], [], []>} : vector<64x32xbf16>, vector<32x48xbf16>, vector<64x48xf32> -> vector<64x48xf32>
    %258 = arith.addf %250, %257 : vector<64x48xf32>
    %c0_235 = arith.constant 0 : index
    %c0_236 = arith.constant 0 : index
    %259 = vector.load %arg23[%c0_235, %c0_236] : memref<1x48xf32, #tpu.memory_space<vmem>>, vector<1x48xf32>
    %260 = vector.broadcast %259 : vector<1x48xf32> to vector<64x48xf32>
    %261 = arith.addf %258, %260 : vector<64x48xf32>
    %262 = math.tanh %261 : vector<64x48xf32>
    %263 = vector.extract_strided_slice %262 {offsets = [32, 0], sizes = [32, 48], strides = [1, 1]} : vector<64x48xf32> to vector<32x48xf32>
    %c0_237 = arith.constant 0 : index
    %c0_238 = arith.constant 0 : index
    %264 = vector.load %arg39[%c0_237, %c0_238] : memref<32x48xf32, #tpu.memory_space<vmem>>, vector<32x48xf32>
    tpu.vector_store %arg39[%c0_237, %c0_238], %263 {strides = array<i32>} : memref<32x48xf32, #tpu.memory_space<vmem>>, vector<32x48xf32>,
    %265 = vector.extract_strided_slice %262 {offsets = [0, 0], sizes = [32, 48], strides = [1, 1]} : vector<64x48xf32> to vector<32x48xf32>
    %266 = arith.truncf %265 : vector<32x48xf32> to vector<32x48xbf16>
    %c0_239 = arith.constant 0 : index
    %c0_240 = arith.constant 0 : index
    %267 = vector.load %arg46[%c0_239, %c0_240] : memref<96x48xbf16, #tpu.memory_space<vmem>>, vector<32x48xbf16>
    tpu.vector_store %arg46[%c0_239, %c0_240], %266 {strides = array<i32>} : memref<96x48xbf16, #tpu.memory_space<vmem>>, vector<32x48xbf16>,
    %c32 = arith.constant 32 : index
    %c0_241 = arith.constant 0 : index
    %268 = vector.load %arg46[%c32, %c0_241] : memref<96x48xbf16, #tpu.memory_space<vmem>>, vector<32x48xbf16>
    tpu.vector_store %arg46[%c32, %c0_241], %0 {strides = array<i32>} : memref<96x48xbf16, #tpu.memory_space<vmem>>, vector<32x48xbf16>,
    %269 = vector.extract_strided_slice %262 {offsets = [32, 0], sizes = [32, 48], strides = [1, 1]} : vector<64x48xf32> to vector<32x48xf32>
    %270 = arith.truncf %269 : vector<32x48xf32> to vector<32x48xbf16>
    %c64_242 = arith.constant 64 : index
    %c0_243 = arith.constant 0 : index
    %271 = vector.load %arg46[%c64_242, %c0_243] : memref<96x48xbf16, #tpu.memory_space<vmem>>, vector<32x48xbf16>
    tpu.vector_store %arg46[%c64_242, %c0_243], %270 {strides = array<i32>} : memref<96x48xbf16, #tpu.memory_space<vmem>>, vector<32x48xbf16>,
    %c0_244 = arith.constant 0 : index
    %c0_245 = arith.constant 0 : index
    %272 = vector.load %arg46[%c0_244, %c0_245] : memref<96x48xbf16, #tpu.memory_space<vmem>>, vector<96x48xbf16>
    %c0_246 = arith.constant 0 : index
    %c0_247 = arith.constant 0 : index
    %c0_248 = arith.constant 0 : index
    %273 = vector.load %arg25[%c0_246, %c0_247, %c0_248] : memref<5x48x64xbf16, #tpu.memory_space<vmem>>, vector<1x48x64xbf16>
    %274 = vector.shape_cast %273 : vector<1x48x64xbf16> to vector<48x64xbf16>
    %cst_249 = arith.constant dense<0.000000e+00> : vector<96x64xf32>
    %275 = tpu.matmul %272, %274, %cst_249 {dimension_numbers = #tpu.dot_dimension_numbers<[1], [0], [0], [1], [0, 0, 1, 1], [], []>} : vector<96x48xbf16>, vector<48x64xbf16>, vector<96x64xf32> -> vector<96x64xf32>
    %c0_250 = arith.constant 0 : index
    %c0_251 = arith.constant 0 : index
    %c0_252 = arith.constant 0 : index
    %276 = vector.load %arg24[%c0_250, %c0_251, %c0_252] : memref<5x48x96xbf16, #tpu.memory_space<vmem>>, vector<1x48x96xbf16>
    %277 = vector.shape_cast %276 : vector<1x48x96xbf16> to vector<48x96xbf16>
    %278 = arith.truncf %275 : vector<96x64xf32> to vector<96x64xbf16>
    %cst_253 = arith.constant dense<0.000000e+00> : vector<48x64xf32>
    %279 = tpu.matmul %277, %278, %cst_253 {dimension_numbers = #tpu.dot_dimension_numbers<[1], [0], [0], [1], [0, 0, 1, 1], [], []>} : vector<48x96xbf16>, vector<96x64xbf16>, vector<48x64xf32> -> vector<48x64xf32>
    %c1_254 = arith.constant 1 : index
    %c0_255 = arith.constant 0 : index
    %c0_256 = arith.constant 0 : index
    %280 = vector.load %arg25[%c1_254, %c0_255, %c0_256] : memref<5x48x64xbf16, #tpu.memory_space<vmem>>, vector<1x48x64xbf16>
    %281 = vector.shape_cast %280 : vector<1x48x64xbf16> to vector<48x64xbf16>
    %cst_257 = arith.constant dense<0.000000e+00> : vector<96x64xf32>
    %282 = tpu.matmul %272, %281, %cst_257 {dimension_numbers = #tpu.dot_dimension_numbers<[1], [0], [0], [1], [0, 0, 1, 1], [], []>} : vector<96x48xbf16>, vector<48x64xbf16>, vector<96x64xf32> -> vector<96x64xf32>
    %c1_258 = arith.constant 1 : index
    %c0_259 = arith.constant 0 : index
    %c0_260 = arith.constant 0 : index
    %283 = vector.load %arg24[%c1_258, %c0_259, %c0_260] : memref<5x48x96xbf16, #tpu.memory_space<vmem>>, vector<1x48x96xbf16>
    %284 = vector.shape_cast %283 : vector<1x48x96xbf16> to vector<48x96xbf16>
    %285 = arith.truncf %282 : vector<96x64xf32> to vector<96x64xbf16>
    %cst_261 = arith.constant dense<0.000000e+00> : vector<48x64xf32>
    %286 = tpu.matmul %284, %285, %cst_261 {dimension_numbers = #tpu.dot_dimension_numbers<[1], [0], [0], [1], [0, 0, 1, 1], [], []>} : vector<48x96xbf16>, vector<96x64xbf16>, vector<48x64xf32> -> vector<48x64xf32>
    %287 = arith.addf %279, %286 : vector<48x64xf32>
    %c2_262 = arith.constant 2 : index
    %c0_263 = arith.constant 0 : index
    %c0_264 = arith.constant 0 : index
    %288 = vector.load %arg25[%c2_262, %c0_263, %c0_264] : memref<5x48x64xbf16, #tpu.memory_space<vmem>>, vector<1x48x64xbf16>
    %289 = vector.shape_cast %288 : vector<1x48x64xbf16> to vector<48x64xbf16>
    %cst_265 = arith.constant dense<0.000000e+00> : vector<96x64xf32>
    %290 = tpu.matmul %272, %289, %cst_265 {dimension_numbers = #tpu.dot_dimension_numbers<[1], [0], [0], [1], [0, 0, 1, 1], [], []>} : vector<96x48xbf16>, vector<48x64xbf16>, vector<96x64xf32> -> vector<96x64xf32>
    %c2_266 = arith.constant 2 : index
    %c0_267 = arith.constant 0 : index
    %c0_268 = arith.constant 0 : index
    %291 = vector.load %arg24[%c2_266, %c0_267, %c0_268] : memref<5x48x96xbf16, #tpu.memory_space<vmem>>, vector<1x48x96xbf16>
    %292 = vector.shape_cast %291 : vector<1x48x96xbf16> to vector<48x96xbf16>
    %293 = arith.truncf %290 : vector<96x64xf32> to vector<96x64xbf16>
    %cst_269 = arith.constant dense<0.000000e+00> : vector<48x64xf32>
    %294 = tpu.matmul %292, %293, %cst_269 {dimension_numbers = #tpu.dot_dimension_numbers<[1], [0], [0], [1], [0, 0, 1, 1], [], []>} : vector<48x96xbf16>, vector<96x64xbf16>, vector<48x64xf32> -> vector<48x64xf32>
    %295 = arith.addf %287, %294 : vector<48x64xf32>
    %c3_270 = arith.constant 3 : index
    %c0_271 = arith.constant 0 : index
    %c0_272 = arith.constant 0 : index
    %296 = vector.load %arg25[%c3_270, %c0_271, %c0_272] : memref<5x48x64xbf16, #tpu.memory_space<vmem>>, vector<1x48x64xbf16>
    %297 = vector.shape_cast %296 : vector<1x48x64xbf16> to vector<48x64xbf16>
    %cst_273 = arith.constant dense<0.000000e+00> : vector<96x64xf32>
    %298 = tpu.matmul %272, %297, %cst_273 {dimension_numbers = #tpu.dot_dimension_numbers<[1], [0], [0], [1], [0, 0, 1, 1], [], []>} : vector<96x48xbf16>, vector<48x64xbf16>, vector<96x64xf32> -> vector<96x64xf32>
    %c3_274 = arith.constant 3 : index
    %c0_275 = arith.constant 0 : index
    %c0_276 = arith.constant 0 : index
    %299 = vector.load %arg24[%c3_274, %c0_275, %c0_276] : memref<5x48x96xbf16, #tpu.memory_space<vmem>>, vector<1x48x96xbf16>
    %300 = vector.shape_cast %299 : vector<1x48x96xbf16> to vector<48x96xbf16>
    %301 = arith.truncf %298 : vector<96x64xf32> to vector<96x64xbf16>
    %cst_277 = arith.constant dense<0.000000e+00> : vector<48x64xf32>
    %302 = tpu.matmul %300, %301, %cst_277 {dimension_numbers = #tpu.dot_dimension_numbers<[1], [0], [0], [1], [0, 0, 1, 1], [], []>} : vector<48x96xbf16>, vector<96x64xbf16>, vector<48x64xf32> -> vector<48x64xf32>
    %303 = arith.addf %295, %302 : vector<48x64xf32>
    %c4_278 = arith.constant 4 : index
    %c0_279 = arith.constant 0 : index
    %c0_280 = arith.constant 0 : index
    %304 = vector.load %arg25[%c4_278, %c0_279, %c0_280] : memref<5x48x64xbf16, #tpu.memory_space<vmem>>, vector<1x48x64xbf16>
    %305 = vector.shape_cast %304 : vector<1x48x64xbf16> to vector<48x64xbf16>
    %cst_281 = arith.constant dense<0.000000e+00> : vector<96x64xf32>
    %306 = tpu.matmul %272, %305, %cst_281 {dimension_numbers = #tpu.dot_dimension_numbers<[1], [0], [0], [1], [0, 0, 1, 1], [], []>} : vector<96x48xbf16>, vector<48x64xbf16>, vector<96x64xf32> -> vector<96x64xf32>
    %c4_282 = arith.constant 4 : index
    %c0_283 = arith.constant 0 : index
    %c0_284 = arith.constant 0 : index
    %307 = vector.load %arg24[%c4_282, %c0_283, %c0_284] : memref<5x48x96xbf16, #tpu.memory_space<vmem>>, vector<1x48x96xbf16>
    %308 = vector.shape_cast %307 : vector<1x48x96xbf16> to vector<48x96xbf16>
    %309 = arith.truncf %306 : vector<96x64xf32> to vector<96x64xbf16>
    %cst_285 = arith.constant dense<0.000000e+00> : vector<48x64xf32>
    %310 = tpu.matmul %308, %309, %cst_285 {dimension_numbers = #tpu.dot_dimension_numbers<[1], [0], [0], [1], [0, 0, 1, 1], [], []>} : vector<48x96xbf16>, vector<96x64xbf16>, vector<48x64xf32> -> vector<48x64xf32>
    %311 = arith.addf %303, %310 : vector<48x64xf32>
    %c0_286 = arith.constant 0 : index
    %c0_287 = arith.constant 0 : index
    %312 = vector.load %arg26[%c0_286, %c0_287] : memref<1x64xf32, #tpu.memory_space<vmem>>, vector<1x64xf32>
    %313 = vector.broadcast %312 : vector<1x64xf32> to vector<48x64xf32>
    %314 = arith.addf %311, %313 : vector<48x64xf32>
    %cst_288 = arith.constant 0.000000e+00 : f32
    %315 = vector.broadcast %cst_288 : f32 to vector<48x64xf32>
    %316 = arith.maximumf %314, %315 : vector<48x64xf32>
    %317 = arith.truncf %316 : vector<48x64xf32> to vector<48x64xbf16>
    %c0_289 = arith.constant 0 : index
    %c0_290 = arith.constant 0 : index
    %c0_291 = arith.constant 0 : index
    %318 = vector.load %arg28[%c0_289, %c0_290, %c0_291] : memref<5x64x64xbf16, #tpu.memory_space<vmem>>, vector<1x64x64xbf16>
    %319 = vector.shape_cast %318 : vector<1x64x64xbf16> to vector<64x64xbf16>
    %cst_292 = arith.constant dense<0.000000e+00> : vector<48x64xf32>
    %320 = tpu.matmul %317, %319, %cst_292 {dimension_numbers = #tpu.dot_dimension_numbers<[1], [0], [0], [1], [0, 0, 1, 1], [], []>} : vector<48x64xbf16>, vector<64x64xbf16>, vector<48x64xf32> -> vector<48x64xf32>
    %c0_293 = arith.constant 0 : index
    %c0_294 = arith.constant 0 : index
    %c0_295 = arith.constant 0 : index
    %321 = vector.load %arg27[%c0_293, %c0_294, %c0_295] : memref<5x24x48xbf16, #tpu.memory_space<vmem>>, vector<1x24x48xbf16>
    %322 = vector.shape_cast %321 : vector<1x24x48xbf16> to vector<24x48xbf16>
    %323 = arith.truncf %320 : vector<48x64xf32> to vector<48x64xbf16>
    %cst_296 = arith.constant dense<0.000000e+00> : vector<24x64xf32>
    %324 = tpu.matmul %322, %323, %cst_296 {dimension_numbers = #tpu.dot_dimension_numbers<[1], [0], [0], [1], [0, 0, 1, 1], [], []>} : vector<24x48xbf16>, vector<48x64xbf16>, vector<24x64xf32> -> vector<24x64xf32>
    %c1_297 = arith.constant 1 : index
    %c0_298 = arith.constant 0 : index
    %c0_299 = arith.constant 0 : index
    %325 = vector.load %arg28[%c1_297, %c0_298, %c0_299] : memref<5x64x64xbf16, #tpu.memory_space<vmem>>, vector<1x64x64xbf16>
    %326 = vector.shape_cast %325 : vector<1x64x64xbf16> to vector<64x64xbf16>
    %cst_300 = arith.constant dense<0.000000e+00> : vector<48x64xf32>
    %327 = tpu.matmul %317, %326, %cst_300 {dimension_numbers = #tpu.dot_dimension_numbers<[1], [0], [0], [1], [0, 0, 1, 1], [], []>} : vector<48x64xbf16>, vector<64x64xbf16>, vector<48x64xf32> -> vector<48x64xf32>
    %c1_301 = arith.constant 1 : index
    %c0_302 = arith.constant 0 : index
    %c0_303 = arith.constant 0 : index
    %328 = vector.load %arg27[%c1_301, %c0_302, %c0_303] : memref<5x24x48xbf16, #tpu.memory_space<vmem>>, vector<1x24x48xbf16>
    %329 = vector.shape_cast %328 : vector<1x24x48xbf16> to vector<24x48xbf16>
    %330 = arith.truncf %327 : vector<48x64xf32> to vector<48x64xbf16>
    %cst_304 = arith.constant dense<0.000000e+00> : vector<24x64xf32>
    %331 = tpu.matmul %329, %330, %cst_304 {dimension_numbers = #tpu.dot_dimension_numbers<[1], [0], [0], [1], [0, 0, 1, 1], [], []>} : vector<24x48xbf16>, vector<48x64xbf16>, vector<24x64xf32> -> vector<24x64xf32>
    %332 = arith.addf %324, %331 : vector<24x64xf32>
    %c2_305 = arith.constant 2 : index
    %c0_306 = arith.constant 0 : index
    %c0_307 = arith.constant 0 : index
    %333 = vector.load %arg28[%c2_305, %c0_306, %c0_307] : memref<5x64x64xbf16, #tpu.memory_space<vmem>>, vector<1x64x64xbf16>
    %334 = vector.shape_cast %333 : vector<1x64x64xbf16> to vector<64x64xbf16>
    %cst_308 = arith.constant dense<0.000000e+00> : vector<48x64xf32>
    %335 = tpu.matmul %317, %334, %cst_308 {dimension_numbers = #tpu.dot_dimension_numbers<[1], [0], [0], [1], [0, 0, 1, 1], [], []>} : vector<48x64xbf16>, vector<64x64xbf16>, vector<48x64xf32> -> vector<48x64xf32>
    %c2_309 = arith.constant 2 : index
    %c0_310 = arith.constant 0 : index
    %c0_311 = arith.constant 0 : index
    %336 = vector.load %arg27[%c2_309, %c0_310, %c0_311] : memref<5x24x48xbf16, #tpu.memory_space<vmem>>, vector<1x24x48xbf16>
    %337 = vector.shape_cast %336 : vector<1x24x48xbf16> to vector<24x48xbf16>
    %338 = arith.truncf %335 : vector<48x64xf32> to vector<48x64xbf16>
    %cst_312 = arith.constant dense<0.000000e+00> : vector<24x64xf32>
    %339 = tpu.matmul %337, %338, %cst_312 {dimension_numbers = #tpu.dot_dimension_numbers<[1], [0], [0], [1], [0, 0, 1, 1], [], []>} : vector<24x48xbf16>, vector<48x64xbf16>, vector<24x64xf32> -> vector<24x64xf32>
    %340 = arith.addf %332, %339 : vector<24x64xf32>
    %c3_313 = arith.constant 3 : index
    %c0_314 = arith.constant 0 : index
    %c0_315 = arith.constant 0 : index
    %341 = vector.load %arg28[%c3_313, %c0_314, %c0_315] : memref<5x64x64xbf16, #tpu.memory_space<vmem>>, vector<1x64x64xbf16>
    %342 = vector.shape_cast %341 : vector<1x64x64xbf16> to vector<64x64xbf16>
    %cst_316 = arith.constant dense<0.000000e+00> : vector<48x64xf32>
    %343 = tpu.matmul %317, %342, %cst_316 {dimension_numbers = #tpu.dot_dimension_numbers<[1], [0], [0], [1], [0, 0, 1, 1], [], []>} : vector<48x64xbf16>, vector<64x64xbf16>, vector<48x64xf32> -> vector<48x64xf32>
    %c3_317 = arith.constant 3 : index
    %c0_318 = arith.constant 0 : index
    %c0_319 = arith.constant 0 : index
    %344 = vector.load %arg27[%c3_317, %c0_318, %c0_319] : memref<5x24x48xbf16, #tpu.memory_space<vmem>>, vector<1x24x48xbf16>
    %345 = vector.shape_cast %344 : vector<1x24x48xbf16> to vector<24x48xbf16>
    %346 = arith.truncf %343 : vector<48x64xf32> to vector<48x64xbf16>
    %cst_320 = arith.constant dense<0.000000e+00> : vector<24x64xf32>
    %347 = tpu.matmul %345, %346, %cst_320 {dimension_numbers = #tpu.dot_dimension_numbers<[1], [0], [0], [1], [0, 0, 1, 1], [], []>} : vector<24x48xbf16>, vector<48x64xbf16>, vector<24x64xf32> -> vector<24x64xf32>
    %348 = arith.addf %340, %347 : vector<24x64xf32>
    %c4_321 = arith.constant 4 : index
    %c0_322 = arith.constant 0 : index
    %c0_323 = arith.constant 0 : index
    %349 = vector.load %arg28[%c4_321, %c0_322, %c0_323] : memref<5x64x64xbf16, #tpu.memory_space<vmem>>, vector<1x64x64xbf16>
    %350 = vector.shape_cast %349 : vector<1x64x64xbf16> to vector<64x64xbf16>
    %cst_324 = arith.constant dense<0.000000e+00> : vector<48x64xf32>
    %351 = tpu.matmul %317, %350, %cst_324 {dimension_numbers = #tpu.dot_dimension_numbers<[1], [0], [0], [1], [0, 0, 1, 1], [], []>} : vector<48x64xbf16>, vector<64x64xbf16>, vector<48x64xf32> -> vector<48x64xf32>
    %c4_325 = arith.constant 4 : index
    %c0_326 = arith.constant 0 : index
    %c0_327 = arith.constant 0 : index
    %352 = vector.load %arg27[%c4_325, %c0_326, %c0_327] : memref<5x24x48xbf16, #tpu.memory_space<vmem>>, vector<1x24x48xbf16>
    %353 = vector.shape_cast %352 : vector<1x24x48xbf16> to vector<24x48xbf16>
    %354 = arith.truncf %351 : vector<48x64xf32> to vector<48x64xbf16>
    %cst_328 = arith.constant dense<0.000000e+00> : vector<24x64xf32>
    %355 = tpu.matmul %353, %354, %cst_328 {dimension_numbers = #tpu.dot_dimension_numbers<[1], [0], [0], [1], [0, 0, 1, 1], [], []>} : vector<24x48xbf16>, vector<48x64xbf16>, vector<24x64xf32> -> vector<24x64xf32>
    %356 = arith.addf %348, %355 : vector<24x64xf32>
    %c0_329 = arith.constant 0 : index
    %c0_330 = arith.constant 0 : index
    %357 = vector.load %arg29[%c0_329, %c0_330] : memref<1x64xf32, #tpu.memory_space<vmem>>, vector<1x64xf32>
    %358 = vector.broadcast %357 : vector<1x64xf32> to vector<24x64xf32>
    %359 = arith.addf %356, %358 : vector<24x64xf32>
    %cst_331 = arith.constant 0.000000e+00 : f32
    %360 = vector.broadcast %cst_331 : f32 to vector<24x64xf32>
    %361 = arith.maximumf %359, %360 : vector<24x64xf32>
    %362 = arith.truncf %361 : vector<24x64xf32> to vector<24x64xbf16>
    %c0_332 = arith.constant 0 : index
    %c0_333 = arith.constant 0 : index
    %c0_334 = arith.constant 0 : index
    %363 = vector.load %arg31[%c0_332, %c0_333, %c0_334] : memref<5x64x64xbf16, #tpu.memory_space<vmem>>, vector<1x64x64xbf16>
    %364 = vector.shape_cast %363 : vector<1x64x64xbf16> to vector<64x64xbf16>
    %cst_335 = arith.constant dense<0.000000e+00> : vector<24x64xf32>
    %365 = tpu.matmul %362, %364, %cst_335 {dimension_numbers = #tpu.dot_dimension_numbers<[1], [0], [0], [1], [0, 0, 1, 1], [], []>} : vector<24x64xbf16>, vector<64x64xbf16>, vector<24x64xf32> -> vector<24x64xf32>
    %c0_336 = arith.constant 0 : index
    %c0_337 = arith.constant 0 : index
    %c0_338 = arith.constant 0 : index
    %366 = vector.load %arg30[%c0_336, %c0_337, %c0_338] : memref<5x12x24xbf16, #tpu.memory_space<vmem>>, vector<1x12x24xbf16>
    %367 = vector.shape_cast %366 : vector<1x12x24xbf16> to vector<12x24xbf16>
    %368 = arith.truncf %365 : vector<24x64xf32> to vector<24x64xbf16>
    %cst_339 = arith.constant dense<0.000000e+00> : vector<12x64xf32>
    %369 = tpu.matmul %367, %368, %cst_339 {dimension_numbers = #tpu.dot_dimension_numbers<[1], [0], [0], [1], [0, 0, 1, 1], [], []>} : vector<12x24xbf16>, vector<24x64xbf16>, vector<12x64xf32> -> vector<12x64xf32>
    %c1_340 = arith.constant 1 : index
    %c0_341 = arith.constant 0 : index
    %c0_342 = arith.constant 0 : index
    %370 = vector.load %arg31[%c1_340, %c0_341, %c0_342] : memref<5x64x64xbf16, #tpu.memory_space<vmem>>, vector<1x64x64xbf16>
    %371 = vector.shape_cast %370 : vector<1x64x64xbf16> to vector<64x64xbf16>
    %cst_343 = arith.constant dense<0.000000e+00> : vector<24x64xf32>
    %372 = tpu.matmul %362, %371, %cst_343 {dimension_numbers = #tpu.dot_dimension_numbers<[1], [0], [0], [1], [0, 0, 1, 1], [], []>} : vector<24x64xbf16>, vector<64x64xbf16>, vector<24x64xf32> -> vector<24x64xf32>
    %c1_344 = arith.constant 1 : index
    %c0_345 = arith.constant 0 : index
    %c0_346 = arith.constant 0 : index
    %373 = vector.load %arg30[%c1_344, %c0_345, %c0_346] : memref<5x12x24xbf16, #tpu.memory_space<vmem>>, vector<1x12x24xbf16>
    %374 = vector.shape_cast %373 : vector<1x12x24xbf16> to vector<12x24xbf16>
    %375 = arith.truncf %372 : vector<24x64xf32> to vector<24x64xbf16>
    %cst_347 = arith.constant dense<0.000000e+00> : vector<12x64xf32>
    %376 = tpu.matmul %374, %375, %cst_347 {dimension_numbers = #tpu.dot_dimension_numbers<[1], [0], [0], [1], [0, 0, 1, 1], [], []>} : vector<12x24xbf16>, vector<24x64xbf16>, vector<12x64xf32> -> vector<12x64xf32>
    %377 = arith.addf %369, %376 : vector<12x64xf32>
    %c2_348 = arith.constant 2 : index
    %c0_349 = arith.constant 0 : index
    %c0_350 = arith.constant 0 : index
    %378 = vector.load %arg31[%c2_348, %c0_349, %c0_350] : memref<5x64x64xbf16, #tpu.memory_space<vmem>>, vector<1x64x64xbf16>
    %379 = vector.shape_cast %378 : vector<1x64x64xbf16> to vector<64x64xbf16>
    %cst_351 = arith.constant dense<0.000000e+00> : vector<24x64xf32>
    %380 = tpu.matmul %362, %379, %cst_351 {dimension_numbers = #tpu.dot_dimension_numbers<[1], [0], [0], [1], [0, 0, 1, 1], [], []>} : vector<24x64xbf16>, vector<64x64xbf16>, vector<24x64xf32> -> vector<24x64xf32>
    %c2_352 = arith.constant 2 : index
    %c0_353 = arith.constant 0 : index
    %c0_354 = arith.constant 0 : index
    %381 = vector.load %arg30[%c2_352, %c0_353, %c0_354] : memref<5x12x24xbf16, #tpu.memory_space<vmem>>, vector<1x12x24xbf16>
    %382 = vector.shape_cast %381 : vector<1x12x24xbf16> to vector<12x24xbf16>
    %383 = arith.truncf %380 : vector<24x64xf32> to vector<24x64xbf16>
    %cst_355 = arith.constant dense<0.000000e+00> : vector<12x64xf32>
    %384 = tpu.matmul %382, %383, %cst_355 {dimension_numbers = #tpu.dot_dimension_numbers<[1], [0], [0], [1], [0, 0, 1, 1], [], []>} : vector<12x24xbf16>, vector<24x64xbf16>, vector<12x64xf32> -> vector<12x64xf32>
    %385 = arith.addf %377, %384 : vector<12x64xf32>
    %c3_356 = arith.constant 3 : index
    %c0_357 = arith.constant 0 : index
    %c0_358 = arith.constant 0 : index
    %386 = vector.load %arg31[%c3_356, %c0_357, %c0_358] : memref<5x64x64xbf16, #tpu.memory_space<vmem>>, vector<1x64x64xbf16>
    %387 = vector.shape_cast %386 : vector<1x64x64xbf16> to vector<64x64xbf16>
    %cst_359 = arith.constant dense<0.000000e+00> : vector<24x64xf32>
    %388 = tpu.matmul %362, %387, %cst_359 {dimension_numbers = #tpu.dot_dimension_numbers<[1], [0], [0], [1], [0, 0, 1, 1], [], []>} : vector<24x64xbf16>, vector<64x64xbf16>, vector<24x64xf32> -> vector<24x64xf32>
    %c3_360 = arith.constant 3 : index
    %c0_361 = arith.constant 0 : index
    %c0_362 = arith.constant 0 : index
    %389 = vector.load %arg30[%c3_360, %c0_361, %c0_362] : memref<5x12x24xbf16, #tpu.memory_space<vmem>>, vector<1x12x24xbf16>
    %390 = vector.shape_cast %389 : vector<1x12x24xbf16> to vector<12x24xbf16>
    %391 = arith.truncf %388 : vector<24x64xf32> to vector<24x64xbf16>
    %cst_363 = arith.constant dense<0.000000e+00> : vector<12x64xf32>
    %392 = tpu.matmul %390, %391, %cst_363 {dimension_numbers = #tpu.dot_dimension_numbers<[1], [0], [0], [1], [0, 0, 1, 1], [], []>} : vector<12x24xbf16>, vector<24x64xbf16>, vector<12x64xf32> -> vector<12x64xf32>
    %393 = arith.addf %385, %392 : vector<12x64xf32>
    %c4_364 = arith.constant 4 : index
    %c0_365 = arith.constant 0 : index
    %c0_366 = arith.constant 0 : index
    %394 = vector.load %arg31[%c4_364, %c0_365, %c0_366] : memref<5x64x64xbf16, #tpu.memory_space<vmem>>, vector<1x64x64xbf16>
    %395 = vector.shape_cast %394 : vector<1x64x64xbf16> to vector<64x64xbf16>
    %cst_367 = arith.constant dense<0.000000e+00> : vector<24x64xf32>
    %396 = tpu.matmul %362, %395, %cst_367 {dimension_numbers = #tpu.dot_dimension_numbers<[1], [0], [0], [1], [0, 0, 1, 1], [], []>} : vector<24x64xbf16>, vector<64x64xbf16>, vector<24x64xf32> -> vector<24x64xf32>
    %c4_368 = arith.constant 4 : index
    %c0_369 = arith.constant 0 : index
    %c0_370 = arith.constant 0 : index
    %397 = vector.load %arg30[%c4_368, %c0_369, %c0_370] : memref<5x12x24xbf16, #tpu.memory_space<vmem>>, vector<1x12x24xbf16>
    %398 = vector.shape_cast %397 : vector<1x12x24xbf16> to vector<12x24xbf16>
    %399 = arith.truncf %396 : vector<24x64xf32> to vector<24x64xbf16>
    %cst_371 = arith.constant dense<0.000000e+00> : vector<12x64xf32>
    %400 = tpu.matmul %398, %399, %cst_371 {dimension_numbers = #tpu.dot_dimension_numbers<[1], [0], [0], [1], [0, 0, 1, 1], [], []>} : vector<12x24xbf16>, vector<24x64xbf16>, vector<12x64xf32> -> vector<12x64xf32>
    %401 = arith.addf %393, %400 : vector<12x64xf32>
    %c0_372 = arith.constant 0 : index
    %c0_373 = arith.constant 0 : index
    %402 = vector.load %arg32[%c0_372, %c0_373] : memref<1x64xf32, #tpu.memory_space<vmem>>, vector<1x64xf32>
    %403 = vector.broadcast %402 : vector<1x64xf32> to vector<12x64xf32>
    %404 = arith.addf %401, %403 : vector<12x64xf32>
    %cst_374 = arith.constant 0.000000e+00 : f32
    %405 = vector.broadcast %cst_374 : f32 to vector<12x64xf32>
    %406 = arith.maximumf %404, %405 : vector<12x64xf32>
    %c0_375 = arith.constant 0 : index
    %c0_376 = arith.constant 0 : index
    %c0_377 = arith.constant 0 : index
    %407 = vector.load %arg33[%c0_375, %c0_376, %c0_377] : memref<2x4x12xbf16, #tpu.memory_space<vmem>>, vector<1x4x12xbf16>
    %408 = vector.shape_cast %407 : vector<1x4x12xbf16> to vector<4x12xbf16>
    %409 = arith.truncf %406 : vector<12x64xf32> to vector<12x64xbf16>
    %cst_378 = arith.constant dense<0.000000e+00> : vector<4x64xf32>
    %410 = tpu.matmul %408, %409, %cst_378 {dimension_numbers = #tpu.dot_dimension_numbers<[1], [0], [0], [1], [0, 0, 1, 1], [], []>} : vector<4x12xbf16>, vector<12x64xbf16>, vector<4x64xf32> -> vector<4x64xf32>
    %c0_379 = arith.constant 0 : index
    %c0_380 = arith.constant 0 : index
    %411 = vector.load %arg41[%c0_379, %c0_380] : memref<4x128xf32, #tpu.memory_space<vmem>>, vector<4x64xf32>
    tpu.vector_store %arg41[%c0_379, %c0_380], %410 {strides = array<i32>} : memref<4x128xf32, #tpu.memory_space<vmem>>, vector<4x64xf32>,
    %c1_381 = arith.constant 1 : index
    %c0_382 = arith.constant 0 : index
    %c0_383 = arith.constant 0 : index
    %412 = vector.load %arg33[%c1_381, %c0_382, %c0_383] : memref<2x4x12xbf16, #tpu.memory_space<vmem>>, vector<1x4x12xbf16>
    %413 = vector.shape_cast %412 : vector<1x4x12xbf16> to vector<4x12xbf16>
    %414 = arith.truncf %406 : vector<12x64xf32> to vector<12x64xbf16>
    %cst_384 = arith.constant dense<0.000000e+00> : vector<4x64xf32>
    %415 = tpu.matmul %413, %414, %cst_384 {dimension_numbers = #tpu.dot_dimension_numbers<[1], [0], [0], [1], [0, 0, 1, 1], [], []>} : vector<4x12xbf16>, vector<12x64xbf16>, vector<4x64xf32> -> vector<4x64xf32>
    %c0_385 = arith.constant 0 : index
    %c64_386 = arith.constant 64 : index
    %416 = vector.load %arg41[%c0_385, %c64_386] : memref<4x128xf32, #tpu.memory_space<vmem>>, vector<4x64xf32>
    tpu.vector_store %arg41[%c0_385, %c64_386], %415 {strides = array<i32>} : memref<4x128xf32, #tpu.memory_space<vmem>>, vector<4x64xf32>,
    %417 = arith.truncf %406 : vector<12x64xf32> to vector<12x64xbf16>
    %c0_387 = arith.constant 0 : index
    %c0_388 = arith.constant 0 : index
    %c0_389 = arith.constant 0 : index
    %418 = vector.load %arg34[%c0_387, %c0_388, %c0_389] : memref<2x4x12xbf16, #tpu.memory_space<vmem>>, vector<1x4x12xbf16>
    %419 = vector.shape_cast %418 : vector<1x4x12xbf16> to vector<4x12xbf16>
    %cst_390 = arith.constant dense<0.000000e+00> : vector<4x64xf32>
    %420 = tpu.matmul %419, %417, %cst_390 {dimension_numbers = #tpu.dot_dimension_numbers<[1], [0], [0], [1], [0, 0, 1, 1], [], []>} : vector<4x12xbf16>, vector<12x64xbf16>, vector<4x64xf32> -> vector<4x64xf32>
    %421 = arith.truncf %420 : vector<4x64xf32> to vector<4x64xbf16>
    %c0_391 = arith.constant 0 : index
    %c0_392 = arith.constant 0 : index
    %422 = vector.load %arg35[%c0_391, %c0_392] : memref<128x64xbf16, #tpu.memory_space<vmem>>, vector<64x64xbf16>
    %cst_393 = arith.constant dense<0.000000e+00> : vector<4x64xf32>
    %423 = tpu.matmul %421, %422, %cst_393 {dimension_numbers = #tpu.dot_dimension_numbers<[1], [0], [0], [1], [0, 0, 1, 1], [], []>} : vector<4x64xbf16>, vector<64x64xbf16>, vector<4x64xf32> -> vector<4x64xf32>
    %c1_394 = arith.constant 1 : index
    %c0_395 = arith.constant 0 : index
    %c0_396 = arith.constant 0 : index
    %424 = vector.load %arg34[%c1_394, %c0_395, %c0_396] : memref<2x4x12xbf16, #tpu.memory_space<vmem>>, vector<1x4x12xbf16>
    %425 = vector.shape_cast %424 : vector<1x4x12xbf16> to vector<4x12xbf16>
    %cst_397 = arith.constant dense<0.000000e+00> : vector<4x64xf32>
    %426 = tpu.matmul %425, %417, %cst_397 {dimension_numbers = #tpu.dot_dimension_numbers<[1], [0], [0], [1], [0, 0, 1, 1], [], []>} : vector<4x12xbf16>, vector<12x64xbf16>, vector<4x64xf32> -> vector<4x64xf32>
    %427 = arith.truncf %426 : vector<4x64xf32> to vector<4x64xbf16>
    %c64_398 = arith.constant 64 : index
    %c0_399 = arith.constant 0 : index
    %428 = vector.load %arg35[%c64_398, %c0_399] : memref<128x64xbf16, #tpu.memory_space<vmem>>, vector<64x64xbf16>
    %cst_400 = arith.constant dense<0.000000e+00> : vector<4x64xf32>
    %429 = tpu.matmul %427, %428, %cst_400 {dimension_numbers = #tpu.dot_dimension_numbers<[1], [0], [0], [1], [0, 0, 1, 1], [], []>} : vector<4x64xbf16>, vector<64x64xbf16>, vector<4x64xf32> -> vector<4x64xf32>
    %430 = arith.addf %423, %429 : vector<4x64xf32>
    %c0_401 = arith.constant 0 : index
    %c0_402 = arith.constant 0 : index
    %431 = vector.load %arg36[%c0_401, %c0_402] : memref<1x64xf32, #tpu.memory_space<vmem>>, vector<1x64xf32>
    %432 = vector.broadcast %431 : vector<1x64xf32> to vector<4x64xf32>
    %433 = arith.addf %430, %432 : vector<4x64xf32>
    %cst_403 = arith.constant 0.000000e+00 : f32
    %434 = vector.broadcast %cst_403 : f32 to vector<4x64xf32>
    %435 = arith.maximumf %433, %434 : vector<4x64xf32>
    %c0_404 = arith.constant 0 : index
    %c0_405 = arith.constant 0 : index
    %436 = vector.load %arg37[%c0_404, %c0_405] : memref<64x11xbf16, #tpu.memory_space<vmem>>, vector<64x11xbf16>
    %437 = arith.truncf %435 : vector<4x64xf32> to vector<4x64xbf16>
    %cst_406 = arith.constant dense<0.000000e+00> : vector<4x11xf32>
    %438 = tpu.matmul %437, %436, %cst_406 {dimension_numbers = #tpu.dot_dimension_numbers<[1], [0], [0], [1], [0, 0, 1, 1], [], []>} : vector<4x64xbf16>, vector<64x11xbf16>, vector<4x11xf32> -> vector<4x11xf32>
    %c0_407 = arith.constant 0 : index
    %c0_408 = arith.constant 0 : index
    %439 = vector.load %arg38[%c0_407, %c0_408] : memref<1x11xf32, #tpu.memory_space<vmem>>, vector<1x11xf32>
    %440 = vector.broadcast %439 : vector<1x11xf32> to vector<4x11xf32>
    %441 = arith.addf %438, %440 : vector<4x11xf32>
    %442 = vector.extract_strided_slice %441 {offsets = [0, 0], sizes = [4, 1], strides = [1, 1]} : vector<4x11xf32> to vector<4x1xf32>
    %cst_409 = arith.constant 0.000000e+00 : f32
    %443 = vector.broadcast %cst_409 : f32 to vector<4x1xf32>
    %444 = arith.subf %443, %442 : vector<4x1xf32>
    %445 = math.exp %444 : vector<4x1xf32>
    %cst_410 = arith.constant 1.000000e+00 : f32
    %446 = vector.broadcast %cst_410 : f32 to vector<4x1xf32>
    %447 = arith.addf %446, %445 : vector<4x1xf32>
    %cst_411 = arith.constant 1.000000e+00 : f32
    %448 = vector.broadcast %cst_411 : f32 to vector<4x1xf32>
    %449 = arith.divf %448, %447 : vector<4x1xf32>
    %c0_412 = arith.constant 0 : index
    %c0_413 = arith.constant 0 : index
    %450 = vector.load %arg40[%c0_412, %c0_413] : memref<4x1xf32, #tpu.memory_space<vmem>>, vector<4x1xf32>
    tpu.vector_store %arg40[%c0_412, %c0_413], %449 {strides = array<i32>} : memref<4x1xf32, #tpu.memory_space<vmem>>, vector<4x1xf32>,
    %451 = vector.extract_strided_slice %441 {offsets = [0, 1], sizes = [4, 10], strides = [1, 1]} : vector<4x11xf32> to vector<4x10xf32>
    %cst_414 = arith.constant dense<0xFF800000> : vector<4xf32>
    %452 = vector.multi_reduction <maximumf>, %451, %cst_414 [1] : vector<4x10xf32> to vector<4xf32>
    %453 = vector.shape_cast %452 : vector<4xf32> to vector<4x1xf32>
    %454 = vector.broadcast %453 : vector<4x1xf32> to vector<4x10xf32>
    %455 = arith.subf %451, %454 : vector<4x10xf32>
    %456 = vector.broadcast %453 : vector<4x1xf32> to vector<4x10xf32>
    %457 = arith.subf %451, %456 : vector<4x10xf32>
    %458 = math.exp %457 : vector<4x10xf32>
    %cst_415 = arith.constant dense<0.000000e+00> : vector<4xf32>
    %459 = vector.multi_reduction <add>, %458, %cst_415 [1] : vector<4x10xf32> to vector<4xf32>
    %460 = vector.shape_cast %459 : vector<4xf32> to vector<4x1xf32>
    %461 = math.log %460 : vector<4x1xf32>
    %462 = vector.broadcast %461 : vector<4x1xf32> to vector<4x10xf32>
    %463 = arith.subf %455, %462 : vector<4x10xf32>
    %c0_416 = arith.constant 0 : index
    %c0_417 = arith.constant 0 : index
    %464 = vector.load %arg44[%c0_416, %c0_417] : memref<4x10xf32, #tpu.memory_space<vmem>>, vector<4x10xf32>
    tpu.vector_store %arg44[%c0_416, %c0_417], %463 {strides = array<i32>} : memref<4x10xf32, #tpu.memory_space<vmem>>, vector<4x10xf32>,
    return
  }
  func.func @transform_0(%arg0: i32) -> (i32, i32) {
    %c0_i32 = arith.constant 0 : i32
    %c0_i32_0 = arith.constant 0 : i32
    %c0_i32_1 = arith.constant 0 : i32
    return %c0_i32, %c0_i32_0 : i32, i32
  }
  func.func @transform_1(%arg0: i32) -> (i32, i32) {
    %c0_i32 = arith.constant 0 : i32
    %c0_i32_0 = arith.constant 0 : i32
    %c0_i32_1 = arith.constant 0 : i32
    return %c0_i32, %c0_i32_0 : i32, i32
  }
  func.func @transform_2(%arg0: i32) -> (i32, i32) {
    %c0_i32 = arith.constant 0 : i32
    %c0_i32_0 = arith.constant 0 : i32
    %c0_i32_1 = arith.constant 0 : i32
    return %c0_i32, %c0_i32_0 : i32, i32
  }
  func.func @transform_3(%arg0: i32) -> (i32, i32, i32) {
    %c0_i32 = arith.constant 0 : i32
    %c0_i32_0 = arith.constant 0 : i32
    %c0_i32_1 = arith.constant 0 : i32
    %c0_i32_2 = arith.constant 0 : i32
    return %c0_i32, %c0_i32_0, %c0_i32_1 : i32, i32, i32
  }
  func.func @transform_4(%arg0: i32) -> (i32, i32, i32) {
    %c0_i32 = arith.constant 0 : i32
    %c0_i32_0 = arith.constant 0 : i32
    %c0_i32_1 = arith.constant 0 : i32
    %c0_i32_2 = arith.constant 0 : i32
    return %c0_i32, %c0_i32_0, %c0_i32_1 : i32, i32, i32
  }
  func.func @transform_5(%arg0: i32) -> (i32, i32) {
    %c0_i32 = arith.constant 0 : i32
    %c0_i32_0 = arith.constant 0 : i32
    %c0_i32_1 = arith.constant 0 : i32
    return %c0_i32, %c0_i32_0 : i32, i32
  }
  func.func @transform_6(%arg0: i32) -> (i32, i32, i32) {
    %c0_i32 = arith.constant 0 : i32
    %c0_i32_0 = arith.constant 0 : i32
    %c0_i32_1 = arith.constant 0 : i32
    %c0_i32_2 = arith.constant 0 : i32
    return %c0_i32, %c0_i32_0, %c0_i32_1 : i32, i32, i32
  }
  func.func @transform_7(%arg0: i32) -> (i32, i32, i32) {
    %c0_i32 = arith.constant 0 : i32
    %c0_i32_0 = arith.constant 0 : i32
    %c0_i32_1 = arith.constant 0 : i32
    %c0_i32_2 = arith.constant 0 : i32
    return %c0_i32, %c0_i32_0, %c0_i32_1 : i32, i32, i32
  }
  func.func @transform_8(%arg0: i32) -> (i32, i32) {
    %c0_i32 = arith.constant 0 : i32
    %c0_i32_0 = arith.constant 0 : i32
    %c0_i32_1 = arith.constant 0 : i32
    return %c0_i32, %c0_i32_0 : i32, i32
  }
  func.func @transform_9(%arg0: i32) -> (i32, i32, i32) {
    %c0_i32 = arith.constant 0 : i32
    %c0_i32_0 = arith.constant 0 : i32
    %c0_i32_1 = arith.constant 0 : i32
    %c0_i32_2 = arith.constant 0 : i32
    return %c0_i32, %c0_i32_0, %c0_i32_1 : i32, i32, i32
  }
  func.func @transform_10(%arg0: i32) -> (i32, i32) {
    %c0_i32 = arith.constant 0 : i32
    %c0_i32_0 = arith.constant 0 : i32
    %c0_i32_1 = arith.constant 0 : i32
    return %c0_i32, %c0_i32_0 : i32, i32
  }
  func.func @transform_11(%arg0: i32) -> (i32, i32) {
    %c0_i32 = arith.constant 0 : i32
    %c0_i32_0 = arith.constant 0 : i32
    %c0_i32_1 = arith.constant 0 : i32
    return %c0_i32, %c0_i32_0 : i32, i32
  }
  func.func @transform_12(%arg0: i32) -> (i32, i32) {
    %c0_i32 = arith.constant 0 : i32
    %c0_i32_0 = arith.constant 0 : i32
    %c0_i32_1 = arith.constant 0 : i32
    return %c0_i32, %c0_i32_0 : i32, i32
  }
  func.func @transform_13(%arg0: i32) -> (i32, i32) {
    %c0_i32 = arith.constant 0 : i32
    %c0_i32_0 = arith.constant 0 : i32
    %c0_i32_1 = arith.constant 0 : i32
    return %c0_i32, %c0_i32_0 : i32, i32
  }
  func.func @transform_14(%arg0: i32) -> (i32, i32) {
    %c0_i32 = arith.constant 0 : i32
    %c0_i32_0 = arith.constant 0 : i32
    %c0_i32_1 = arith.constant 0 : i32
    return %c0_i32, %c0_i32_0 : i32, i32
  }
  func.func @transform_15(%arg0: i32) -> (i32, i32) {
    %c0_i32 = arith.constant 0 : i32
    %c0_i32_0 = arith.constant 0 : i32
    %c0_i32_1 = arith.constant 0 : i32
    return %c0_i32, %c0_i32_0 : i32, i32
  }
  func.func @transform_16(%arg0: i32) -> (i32, i32, i32) {
    %c0_i32 = arith.constant 0 : i32
    %c0_i32_0 = arith.constant 0 : i32
    %c0_i32_1 = arith.constant 0 : i32
    %c0_i32_2 = arith.constant 0 : i32
    return %c0_i32, %c0_i32_0, %c0_i32_1 : i32, i32, i32
  }
  func.func @transform_17(%arg0: i32) -> (i32, i32, i32) {
    %c0_i32 = arith.constant 0 : i32
    %c0_i32_0 = arith.constant 0 : i32
    %c0_i32_1 = arith.constant 0 : i32
    %c0_i32_2 = arith.constant 0 : i32
    return %c0_i32, %c0_i32_0, %c0_i32_1 : i32, i32, i32
  }
  func.func @transform_18(%arg0: i32) -> (i32, i32, i32) {
    %c0_i32 = arith.constant 0 : i32
    %c0_i32_0 = arith.constant 0 : i32
    %c0_i32_1 = arith.constant 0 : i32
    %c0_i32_2 = arith.constant 0 : i32
    return %c0_i32, %c0_i32_0, %c0_i32_1 : i32, i32, i32
  }
  func.func @transform_19(%arg0: i32) -> (i32, i32) {
    %c0_i32 = arith.constant 0 : i32
    %c0_i32_0 = arith.constant 0 : i32
    %c0_i32_1 = arith.constant 0 : i32
    return %c0_i32, %c0_i32_0 : i32, i32
  }
  func.func @transform_20(%arg0: i32) -> (i32, i32, i32) {
    %c0_i32 = arith.constant 0 : i32
    %c0_i32_0 = arith.constant 0 : i32
    %c0_i32_1 = arith.constant 0 : i32
    %c0_i32_2 = arith.constant 0 : i32
    return %c0_i32, %c0_i32_0, %c0_i32_1 : i32, i32, i32
  }
  func.func @transform_21(%arg0: i32) -> (i32, i32, i32) {
    %c0_i32 = arith.constant 0 : i32
    %c0_i32_0 = arith.constant 0 : i32
    %c0_i32_1 = arith.constant 0 : i32
    %c0_i32_2 = arith.constant 0 : i32
    return %c0_i32, %c0_i32_0, %c0_i32_1 : i32, i32, i32
  }
  func.func @transform_22(%arg0: i32) -> (i32, i32) {
    %c0_i32 = arith.constant 0 : i32
    %c0_i32_0 = arith.constant 0 : i32
    %c0_i32_1 = arith.constant 0 : i32
    return %c0_i32, %c0_i32_0 : i32, i32
  }
  func.func @transform_23(%arg0: i32) -> (i32, i32, i32) {
    %c0_i32 = arith.constant 0 : i32
    %c0_i32_0 = arith.constant 0 : i32
    %c0_i32_1 = arith.constant 0 : i32
    %c0_i32_2 = arith.constant 0 : i32
    return %c0_i32, %c0_i32_0, %c0_i32_1 : i32, i32, i32
  }
  func.func @transform_24(%arg0: i32) -> (i32, i32, i32) {
    %c0_i32 = arith.constant 0 : i32
    %c0_i32_0 = arith.constant 0 : i32
    %c0_i32_1 = arith.constant 0 : i32
    %c0_i32_2 = arith.constant 0 : i32
    return %c0_i32, %c0_i32_0, %c0_i32_1 : i32, i32, i32
  }
  func.func @transform_25(%arg0: i32) -> (i32, i32) {
    %c0_i32 = arith.constant 0 : i32
    %c0_i32_0 = arith.constant 0 : i32
    %c0_i32_1 = arith.constant 0 : i32
    return %c0_i32, %c0_i32_0 : i32, i32
  }
  func.func @transform_26(%arg0: i32) -> (i32, i32, i32) {
    %c0_i32 = arith.constant 0 : i32
    %c0_i32_0 = arith.constant 0 : i32
    %c0_i32_1 = arith.constant 0 : i32
    %c0_i32_2 = arith.constant 0 : i32
    return %c0_i32, %c0_i32_0, %c0_i32_1 : i32, i32, i32
  }
  func.func @transform_27(%arg0: i32) -> (i32, i32, i32) {
    %c0_i32 = arith.constant 0 : i32
    %c0_i32_0 = arith.constant 0 : i32
    %c0_i32_1 = arith.constant 0 : i32
    %c0_i32_2 = arith.constant 0 : i32
    return %c0_i32, %c0_i32_0, %c0_i32_1 : i32, i32, i32
  }
  func.func @transform_28(%arg0: i32) -> (i32, i32) {
    %c0_i32 = arith.constant 0 : i32
    %c0_i32_0 = arith.constant 0 : i32
    %c0_i32_1 = arith.constant 0 : i32
    return %c0_i32, %c0_i32_0 : i32, i32
  }
  func.func @transform_29(%arg0: i32) -> (i32, i32, i32) {
    %c0_i32 = arith.constant 0 : i32
    %c0_i32_0 = arith.constant 0 : i32
    %c0_i32_1 = arith.constant 0 : i32
    %c0_i32_2 = arith.constant 0 : i32
    return %c0_i32, %c0_i32_0, %c0_i32_1 : i32, i32, i32
  }
  func.func @transform_30(%arg0: i32) -> (i32, i32, i32) {
    %c0_i32 = arith.constant 0 : i32
    %c0_i32_0 = arith.constant 0 : i32
    %c0_i32_1 = arith.constant 0 : i32
    %c0_i32_2 = arith.constant 0 : i32
    return %c0_i32, %c0_i32_0, %c0_i32_1 : i32, i32, i32
  }
  func.func @transform_31(%arg0: i32) -> (i32, i32) {
    %c0_i32 = arith.constant 0 : i32
    %c0_i32_0 = arith.constant 0 : i32
    %c0_i32_1 = arith.constant 0 : i32
    return %c0_i32, %c0_i32_0 : i32, i32
  }
  func.func @transform_32(%arg0: i32) -> (i32, i32, i32) {
    %c0_i32 = arith.constant 0 : i32
    %c0_i32_0 = arith.constant 0 : i32
    %c0_i32_1 = arith.constant 0 : i32
    %c0_i32_2 = arith.constant 0 : i32
    return %c0_i32, %c0_i32_0, %c0_i32_1 : i32, i32, i32
  }
  func.func @transform_33(%arg0: i32) -> (i32, i32, i32) {
    %c0_i32 = arith.constant 0 : i32
    %c0_i32_0 = arith.constant 0 : i32
    %c0_i32_1 = arith.constant 0 : i32
    %c0_i32_2 = arith.constant 0 : i32
    return %c0_i32, %c0_i32_0, %c0_i32_1 : i32, i32, i32
  }
  func.func @transform_34(%arg0: i32) -> (i32, i32) {
    %c0_i32 = arith.constant 0 : i32
    %c0_i32_0 = arith.constant 0 : i32
    %c0_i32_1 = arith.constant 0 : i32
    return %c0_i32, %c0_i32_0 : i32, i32
  }
  func.func @transform_35(%arg0: i32) -> (i32, i32) {
    %c0_i32 = arith.constant 0 : i32
    %c0_i32_0 = arith.constant 0 : i32
    %c0_i32_1 = arith.constant 0 : i32
    return %c0_i32, %c0_i32_0 : i32, i32
  }
  func.func @transform_36(%arg0: i32) -> (i32, i32) {
    %c0_i32 = arith.constant 0 : i32
    %c0_i32_0 = arith.constant 0 : i32
    %c0_i32_1 = arith.constant 0 : i32
    return %c0_i32, %c0_i32_0 : i32, i32
  }
  func.func @transform_37(%arg0: i32) -> (i32, i32) {
    %c0_i32 = arith.constant 0 : i32
    %c0_i32_0 = arith.constant 0 : i32
    %c0_i32_1 = arith.constant 0 : i32
    return %c0_i32, %c0_i32_0 : i32, i32
  }
  func.func @transform_38(%arg0: i32) -> (i32, i32) {
    %c0_i32 = arith.constant 0 : i32
    %c0_i32_0 = arith.constant 0 : i32
    %c0_i32_1 = arith.constant 0 : i32
    return %c0_i32, %c0_i32_0 : i32, i32
  }
  func.func @transform_39(%arg0: i32) -> (i32, i32) {
    %c0_i32 = arith.constant 0 : i32
    %c0_i32_0 = arith.constant 0 : i32
    %c0_i32_1 = arith.constant 0 : i32
    return %c0_i32, %c0_i32_0 : i32, i32
  }
  func.func @transform_40(%arg0: i32) -> (i32, i32) {
    %c0_i32 = arith.constant 0 : i32
    %c0_i32_0 = arith.constant 0 : i32
    %c0_i32_1 = arith.constant 0 : i32
    return %c0_i32, %c0_i32_0 : i32, i32
  }
  func.func @transform_41(%arg0: i32) -> (i32, i32) {
    %c0_i32 = arith.constant 0 : i32
    %c0_i32_0 = arith.constant 0 : i32
    %c0_i32_1 = arith.constant 0 : i32
    return %c0_i32, %c0_i32_0 : i32, i32
  }
  func.func @transform_42(%arg0: i32) -> (i32, i32) {
    %c0_i32 = arith.constant 0 : i32
    %c0_i32_0 = arith.constant 0 : i32
    %c0_i32_1 = arith.constant 0 : i32
    return %c0_i32, %c0_i32_0 : i32, i32
  }
  func.func @transform_43(%arg0: i32) -> (i32, i32) {
    %c0_i32 = arith.constant 0 : i32
    %c0_i32_0 = arith.constant 0 : i32
    %c0_i32_1 = arith.constant 0 : i32
    return %c0_i32, %c0_i32_0 : i32, i32
  }
}

</mosaic_0001>

<bundles_post_ra>
// kernel: forward.1
= control target key start
LH: loop header
LB: loop body
LE: loop exit
PB: predicated region body
PF: predicated region fallthrough
CT: control target
= control target key end

     0   :  { %s7211_s6 = smov 1   ;;  %s7212_s10 = smov 2   ;;  %s8179_s0 = inlined_call_operand.smem [shape: u32[44], index: -1, kind: input, shape index: {}] }
   0x1   :  { %s7298_s5 = sld [smem:[%s8179_s0]]   ;;  %s7213_s14 = smov 3  }
   0x2   :  { %s7303_s9 = sld [smem:[%s8179_s0 + %s7211_s6]]   ;;  %s7214_s18 = smov 4  }
   0x3   :  { %s7308_s13 = sld [smem:[%s8179_s0 + %s7212_s10]]   ;;  %s7215_s22 = smov 5  }
   0x4   :  { %s7313_s17 = sld [smem:[%s8179_s0 + %s7213_s14]]   ;;  %s7216_s26 = smov 6  }
   0x5   :  { %s7318_s21 = sld [smem:[%s8179_s0 + %s7214_s18]]   ;;  %s7217_s30 = smov 7  }
   0x6   :  { %s7323_s25 = sld [smem:[%s8179_s0 + %s7215_s22]]   ;;  %s7218_s4 = smov 8  }
   0x7   :  { %8193 = sst [smem:[#allocation60_spill]] %s7298_s5  ;;  %s7219_s10 = smov 9  }
   0x8   :  { %s7328_s29 = sld [smem:[%s8179_s0 + %s7216_s26]]   ;;  %s7220_s15 = smov 10  }
   0x9   :  { %s7333_s3 = sld [smem:[%s8179_s0 + %s7217_s30]]   ;;  %s7221_s20 = smov 11  }
   0xa   :  { %s7338_s8 = sld [smem:[%s8179_s0 + %s7218_s4]]   ;;  %s7222_s26 = smov 12  }
   0xb   :  { %s7343_s14 = sld [smem:[%s8179_s0 + %s7219_s10]]   ;;  %s7223_s1 = smov 13  }
   0xc   :  { %8194 = sst [smem:[#allocation61_spill]] %s7323_s25  ;;  %s7224_s7 = smov 14  }
   0xd   :  { %s7348_s19 = sld [smem:[%s8179_s0 + %s7220_s15]]   ;;  %s7225_s15 = smov 15  }
   0xe   :  { %s7353_s24 = sld [smem:[%s8179_s0 + %s7221_s20]]   ;;  %s7226_s22 = smov 16  }
   0xf   :  { %s7358_s30 = sld [smem:[%s8179_s0 + %s7222_s26]]   ;;  %s7227_s28 = smov 17  }
  0x10   :  { %8195 = sst [smem:[#allocation62_spill]] %s7338_s8 }
  0x11   :  { %s7363_s6 = sld [smem:[%s8179_s0 + %s7223_s1]]  }
  0x12   :  { %s7368_s12 = sld [smem:[%s8179_s0 + %s7224_s7]]   ;;  %s7228_s7 = smov 18  }
  0x13   :  { %s7373_s20 = sld [smem:[%s8179_s0 + %s7225_s15]]   ;;  %s7229_s15 = smov 19  }
  0x14   :  { %8196 = sst [smem:[#allocation63_spill]] %s7353_s24 }
  0x15   :  { %8197 = sst [smem:[#allocation64_spill]] %s7358_s30 }
  0x16   :  { %s7378_s27 = sld [smem:[%s8179_s0 + %s7226_s22]]   ;;  %s7230_s22 = smov 20  }
  0x17   :  { %8198 = sst [smem:[#allocation65_spill]] %s7363_s6 }
  0x18   :  { %s7383_s4 = sld [smem:[%s8179_s0 + %s7227_s28]]   ;;  %s7231_s28 = smov 21  }
  0x19   :  { %8199 = sst [smem:[#allocation66_spill]] %s7373_s20 }
  0x1a   :  { %s7388_s6 = sld [smem:[%s8179_s0 + %s7228_s7]]   ;;  %s7232_s7 = smov 22  }
  0x1b   :  { %s7393_s20 = sld [smem:[%s8179_s0 + %s7229_s15]]   ;;  %s7233_s15 = smov 23  }
  0x1c   :  { %8200 = sst [smem:[#allocation67_spill]] %s7378_s27 }
  0x1d   :  { %s7398_s24 = sld [smem:[%s8179_s0 + %s7230_s22]]   ;;  %s7234_s22 = smov 24  }
  0x1e   :  { %s7403_s8 = sld [smem:[%s8179_s0 + %s7231_s28]]   ;;  %s7235_s28 = smov 25  }
  0x1f   :  { %s7408_s25 = sld [smem:[%s8179_s0 + %s7232_s7]]   ;;  %s7236_s7 = smov 26  }
  0x20   :  { %8201 = sst [smem:[#allocation68_spill]] %s7388_s6 }
  0x21   :  { %8202 = sst [smem:[#allocation69_spill]] %s7393_s20 }
  0x22   :  { %s7413_s20 = sld [smem:[%s8179_s0 + %s7233_s15]]   ;;  %s7237_s15 = smov 27  }
  0x23   :  { %s7418_s5 = sld [smem:[%s8179_s0 + %s7234_s22]]   ;;  %s7238_s22 = smov 28  }
  0x24   :  { %8203 = sst [smem:[#allocation70_spill]] %s7403_s8 }
  0x25   :  { %8204 = sst [smem:[#allocation71_spill]] %s7408_s25 }
  0x26   :  { %s7423_s8 = sld [smem:[%s8179_s0 + %s7235_s28]]   ;;  %s7239_s28 = smov 29  }
  0x27   :  { %s7428_s25 = sld [smem:[%s8179_s0 + %s7236_s7]]   ;;  %s7240_s7 = smov 30  }
  0x28   :  { %s7433_s6 = sld [smem:[%s8179_s0 + %s7237_s15]]   ;;  %s7241_s15 = smov 31  }
  0x29   :  { %8205 = sst [smem:[#allocation72_spill]] %s7418_s5 }
  0x2a   :  { %s7438_s5 = sld [smem:[%s8179_s0 + %s7238_s22]]   ;;  %s7242_s22 = smov 32  }
  0x2b   :  { %s7448_s27 = sld [smem:[%s8179_s0 + %s7240_s7]]   ;;  %s7244_s7 = smov 34  }
  0x2c   :  { %8206 = sst [smem:[#allocation73_spill]] %s7423_s8 }
  0x2d   :  { %s7443_s8 = sld [smem:[%s8179_s0 + %s7239_s28]]   ;;  %s7243_s28 = smov 33  }
  0x2e   :  { %8207 = sst [smem:[#allocation74_spill]] %s7433_s6 }
  0x2f   :  { %s7453_s6 = sld [smem:[%s8179_s0 + %s7241_s15]]   ;;  %s7245_s15 = smov 35  }
  0x30   :  { %8208 = sst [smem:[#allocation75_spill]] %s7438_s5 }
  0x31   :  { %8210 = sst [smem:[#allocation77_spill]] %s7448_s27 }
  0x32   :  { %s7458_s5 = sld [smem:[%s8179_s0 + %s7242_s22]]   ;;  %s7246_s22 = smov 36  }
  0x33   :  { %8209 = sst [smem:[#allocation76_spill]] %s7443_s8 }
  0x34   :  { %s7463_s8 = sld [smem:[%s8179_s0 + %s7243_s28]]   ;;  %s7247_s28 = smov 37  }
  0x35   :  { %8211 = sst [smem:[#allocation78_spill]] %s7453_s6 }
  0x36   :  { %s7468_s27 = sld [smem:[%s8179_s0 + %s7244_s7]]   ;;  %s7248_s7 = smov 38  }
  0x37   :  { %s7473_s6 = sld [smem:[%s8179_s0 + %s7245_s15]]   ;;  %s7249_s15 = smov 39  }
  0x38   :  { %s7478_s30 = sld [smem:[%s8179_s0 + %s7246_s22]]   ;;  %s7250_s22 = smov 40  }
  0x3a   :  { %8212 = sst [smem:[#allocation79_spill]] %s7463_s8 }
  0x3b   :  { %s7483_s8 = sld [smem:[%s8179_s0 + %s7247_s28]]   ;;  %s7251_s28 = smov 41  }
  0x3c   :  { %8213 = sst [smem:[#allocation80_spill]] %s7468_s27 }
  0x3d   :  { %8214 = sst [smem:[#allocation81_spill]] %s7473_s6 }
  0x3e   :  { %8215 = sst [smem:[#allocation82_spill]] %s7478_s30 }
  0x3f   :  { %s7488_s27 = sld [smem:[%s8179_s0 + %s7248_s7]]   ;;  %s7252_s7 = smov 42  }
  0x40   :  { %s7493_s6 = sld [smem:[%s8179_s0 + %s7249_s15]]   ;;  %s7253_s15 = smov 43  }
  0x41   :  { %8216 = sst [smem:[#allocation83_spill]] %s7483_s8 }
  0x42   :  { %s7498_s30 = sld [smem:[%s8179_s0 + %s7250_s22]]  }
  0x43   :  { %s7503_s8 = sld [smem:[%s8179_s0 + %s7251_s28]]  }
  0x45   :  { %8217 = sst [smem:[#allocation84_spill]] %s7488_s27 }
  0x46   :  { %8218 = sst [smem:[#allocation85_spill]] %s7493_s6 }
  0x47   :  { %s7508_s27 = sld [smem:[%s8179_s0 + %s7252_s7]]  }
  0x48   :  { %s7513_s6 = sld [smem:[%s8179_s0 + %s7253_s15]]  }
  0x49   :  { %93 = vsyncpa [#allocation5], 0 }
  0x4a   :  { %94 = vsyncpa [#allocation8], 0 }
  0x4b   :  { %95 = vsyncpa [#allocation11], 0 }
  0x4c   :  { %96 = vsyncpa [#allocation14], 0 }
  0x4d   :  { %97 = vsyncpa [#allocation17], 0 }
  0x4e   :  { %98 = vsyncpa [#allocation20], 0 }
  0x4f   :  { %99 = vsyncpa [#allocation23], 0 }
  0x50   :  { %100 = vsyncpa [#allocation26], 0 }
  0x51   :  { %101 = vsyncpa [#allocation29], 0 }
  0x52   :  { %102 = vsyncpa [#allocation32], 0 }
  0x53   :  { %103 = vsyncpa [#allocation35], 0 }
  0x54   :  { %104 = vsyncpa [#allocation38], 0 }
  0x55   :  { %105 = vsyncpa [#allocation6], 0 }
  0x56   :  { %106 = vsyncpa [#allocation41], 0  ;;  %s126_s22 = sshll.u32 %s7308_s13, 4  ;;  %s127_s22 = int_to_ptr.hbm [resolvable:$true] %s126_s22 }
  0x57   :  { %107 = vsyncpa [#allocation44], 0  ;;  %s7254_s0 = smov [#allocation7]   ;;  %s6557_s26 = sshra.s32 %s127_s22, 4  ;;  %s6558_s26 = int_to_ptr.hbm [resolvable:$true] %s6557_s26 }
  0x58   :  { %s128_s23 = sshll.u32 %s7254_s0, 4  ;;  %s6559_s28 = scalar_lea.hbm %s6558_s26, 2  ;;  %s129_s23 = int_to_ptr.vmem [resolvable:$true] %s128_s23 }
  0x59   :  { %p6560_p0 = scmp.ne.s32.totalorder %s6558_s26, %s6559_s28  ;;  %s6561_s1 = scalar_lea.hbm %s7308_s13, 2 }
  0x5a   :  { %p6562_p1 = scmp.lt.s32.totalorder %s6558_s26, %s7308_s13  ;;  %p6563_p2 = scmp.lt.s32.totalorder %s6561_s1, %s6559_s28 }
  0x5c   :  { %p6564_p3 = por %p6563_p2, %p6562_p1 }
  0x5e   :  { %p6565_p4 = pnand %p6564_p3, %p6560_p0 }
  0x60   :  { %6568 = shalt.err (!%p6565_p4)
}
  0x61   :  { %131 = dma.hbm_to_vmem [thread:$0]  %s127_s22, 32, %s129_s23, [#allocation8]  }
  0x62   :  { %s149_s2 = sshll.u32 %s7318_s21, 4  ;;  %s7255_s7 = smov [#allocation10]   ;;  %s150_s2 = int_to_ptr.hbm [resolvable:$true] %s149_s2 }
  0x63   :  { %s151_s10 = sshll.u32 %s7255_s7, 4  ;;  %s177_s11 = sshll.u32 %s7333_s3, 4  ;;  %s152_s10 = int_to_ptr.vmem [resolvable:$true] %s151_s10  ;;  %s7520_s11 = int_to_ptr.hbm [resolvable:$true] %s177_s11 }
  0x64   :  { %s6581_s15 = sshra.s32 %s150_s2, 4  ;;  %s6585_s16 = scalar_lea.hbm %s7318_s21, 120  ;;  %s6582_s15 = int_to_ptr.hbm [resolvable:$true] %s6581_s15 }
  0x65   :  { %s6583_s13 = scalar_lea.hbm %s6582_s15, 120  ;;  %p6586_p6 = scmp.lt.s32.totalorder %s6582_s15, %s7318_s21 }
  0x66   :  { %p6584_p5 = scmp.ne.s32.totalorder %s6582_s15, %s6583_s13  ;;  %p6587_p7 = scmp.lt.s32.totalorder %s6585_s16, %s6583_s13 }
  0x68   :  { %p6588_p8 = por %p6587_p7, %p6586_p6 }
  0x6a   :  { %p6589_p9 = pnand %p6588_p8, %p6584_p5 }
  0x6c   :  { %6592 = shalt.err (!%p6589_p9)
}
  0x6d   :  { %s7256_s18 = smov 64   ;;  %s7257_s22 = smov 4  }
  0x6e   :  { %157 = dma.hbm_to_vmem [thread:$0]  %s150_s2, 1920, %s152_s10, [#allocation11], %s7256_s18, %s7256_s18, %s7257_s22  }
  0x6f   :  { %s205_s0 = sshll.u32 %s7348_s19, 4  ;;  %s7258_s23 = smov [#allocation13]   ;;  %s7528_s0 = int_to_ptr.hbm [resolvable:$true] %s205_s0 }
  0x70   :  { %s179_s26 = sshll.u32 %s7258_s23, 4  ;;  %s6605_s21 = sshra.s32 %s7520_s11, 4  ;;  %s180_s26 = int_to_ptr.vmem [resolvable:$true] %s179_s26  ;;  %s6606_s21 = int_to_ptr.hbm [resolvable:$true] %s6605_s21 }
  0x71   :  { %s6607_s28 = scalar_lea.hbm %s6606_s21, 160  ;;  %s6609_s1 = scalar_lea.hbm %s7333_s3, 160 }
  0x72   :  { %p6608_p10 = scmp.ne.s32.totalorder %s6606_s21, %s6607_s28  ;;  %p6610_p11 = scmp.lt.s32.totalorder %s6606_s21, %s7333_s3 }
  0x73   :  { %p6611_p12 = scmp.lt.s32.totalorder %s6609_s1, %s6607_s28 }
  0x75   :  { %p6612_p13 = por %p6611_p12, %p6610_p11 }
  0x77   :  { %p6613_p0 = pnand %p6612_p13, %p6608_p10 }
  0x79   :  { %6616 = shalt.err (!%p6613_p0)
}
  0x7a   :  { %185 = dma.hbm_to_vmem [thread:$0]  %s7520_s11, 2560, %s180_s26, [#allocation14], %s7256_s18, %s7256_s18, %s7257_s22  }
  0x7b   :  { %s7259_s2 = smov [#allocation16]   ;;  %s235_s10 = sshll.u32 %s7368_s12, 4  ;;  %s7538_s10 = int_to_ptr.hbm [resolvable:$true] %s235_s10 }
  0x7c   :  { %s207_s7 = sshll.u32 %s7259_s2, 4  ;;  %s6629_s3 = sshra.s32 %s7528_s0, 4  ;;  %s208_s7 = int_to_ptr.vmem [resolvable:$true] %s207_s7  ;;  %s6630_s3 = int_to_ptr.hbm [resolvable:$true] %s6629_s3 }
  0x7d   :  { %s6631_s15 = scalar_lea.hbm %s6630_s3, 128  ;;  %s6633_s13 = scalar_lea.hbm %s7348_s19, 128 }
  0x7e   :  { %p6632_p1 = scmp.ne.s32.totalorder %s6630_s3, %s6631_s15  ;;  %p6634_p2 = scmp.lt.s32.totalorder %s6630_s3, %s7348_s19 }
  0x7f   :  { %p6635_p3 = scmp.lt.s32.totalorder %s6633_s13, %s6631_s15 }
  0x81   :  { %p6636_p4 = por %p6635_p3, %p6634_p2 }
  0x83   :  { %p6637_p5 = pnand %p6636_p4, %p6632_p1 }
  0x85   :  { %6640 = shalt.err (!%p6637_p5)
}
  0x86   :  { %213 = dma.hbm_to_vmem [thread:$0]  %s7528_s0, 2048, %s208_s7, [#allocation17], %s7256_s18, %s7256_s18, %s7257_s22  }
  0x87   :  { %s7260_s11 = smov [#allocation19]   ;;  %s263_s23 = sshll.u32 %s7383_s4, 4  ;;  %s264_s23 = int_to_ptr.hbm [resolvable:$true] %s263_s23 }
  0x88   :  { %s237_s16 = sshll.u32 %s7260_s11, 4  ;;  %s6653_s26 = sshra.s32 %s7538_s10, 4  ;;  %s238_s16 = int_to_ptr.vmem [resolvable:$true] %s237_s16  ;;  %s6654_s26 = int_to_ptr.hbm [resolvable:$true] %s6653_s26 }
  0x89   :  { %s6655_s19 = scalar_lea.hbm %s6654_s26, 32  ;;  %s6657_s21 = scalar_lea.hbm %s7368_s12, 32 }
  0x8a   :  { %p6656_p6 = scmp.ne.s32.totalorder %s6654_s26, %s6655_s19  ;;  %p6658_p7 = scmp.lt.s32.totalorder %s6654_s26, %s7368_s12 }
  0x8b   :  { %p6659_p8 = scmp.lt.s32.totalorder %s6657_s21, %s6655_s19 }
  0x8d   :  { %p6660_p9 = por %p6659_p8, %p6658_p7 }
  0x8f   :  { %p6661_p10 = pnand %p6660_p9, %p6656_p6 }
  0x91   :  { %6664 = shalt.err (!%p6661_p10)
}
  0x92   :  { %s7261_s28 = smov 128   ;;  %s7262_s0 = smov 8  }
  0x93   :  { %243 = dma.hbm_to_vmem [thread:$0]  %s7538_s10, 512, %s238_s16, [#allocation20], %s7261_s28, %s7261_s28, %s7262_s0  }
  0x94   :  { %s7263_s1 = smov [#allocation22]   ;;  %s291_s7 = sshll.u32 %s7398_s24, 4  ;;  %s7553_s7 = int_to_ptr.hbm [resolvable:$true] %s291_s7 }
  0x95   :  { %s265_s2 = sshll.u32 %s7263_s1, 4  ;;  %s6677_s3 = sshra.s32 %s264_s23, 4  ;;  %s266_s2 = int_to_ptr.vmem [resolvable:$true] %s265_s2  ;;  %s6678_s3 = int_to_ptr.hbm [resolvable:$true] %s6677_s3 }
  0x96   :  { %s6679_s12 = scalar_lea.hbm %s6678_s3, 80  ;;  %s6681_s15 = scalar_lea.hbm %s7383_s4, 80 }
  0x97   :  { %p6680_p11 = scmp.ne.s32.totalorder %s6678_s3, %s6679_s12  ;;  %p6682_p12 = scmp.lt.s32.totalorder %s6678_s3, %s7383_s4 }
  0x98   :  { %p6683_p13 = scmp.lt.s32.totalorder %s6681_s15, %s6679_s12 }
  0x9a   :  { %p6684_p0 = por %p6683_p13, %p6682_p12 }
  0x9c   :  { %p6685_p1 = pnand %p6684_p0, %p6680_p11 }
  0x9e   :  { %6688 = shalt.err (!%p6685_p1)
}
  0x9f   :  { %271 = dma.hbm_to_vmem [thread:$0]  %s264_s23, 1280, %s266_s2, [#allocation23], %s7256_s18, %s7256_s18, %s7257_s22  }
  0xa0   :  { %s319_s10 = sshll.u32 %s7413_s20, 4  ;;  %s7264_s13 = smov [#allocation25]   ;;  %s7561_s10 = int_to_ptr.hbm [resolvable:$true] %s319_s10 }
  0xa1   :  { %s293_s11 = sshll.u32 %s7264_s13, 4  ;;  %s6701_s16 = sshra.s32 %s7553_s7, 4  ;;  %s294_s11 = int_to_ptr.vmem [resolvable:$true] %s293_s11  ;;  %s6702_s16 = int_to_ptr.hbm [resolvable:$true] %s6701_s16 }
  0xa2   :  { %s6703_s4 = scalar_lea.hbm %s6702_s16, 160  ;;  %s6705_s26 = scalar_lea.hbm %s7398_s24, 160 }
  0xa3   :  { %p6704_p2 = scmp.ne.s32.totalorder %s6702_s16, %s6703_s4  ;;  %p6706_p3 = scmp.lt.s32.totalorder %s6702_s16, %s7398_s24 }
  0xa4   :  { %p6707_p4 = scmp.lt.s32.totalorder %s6705_s26, %s6703_s4 }
  0xa6   :  { %p6708_p5 = por %p6707_p4, %p6706_p3 }
  0xa8   :  { %p6709_p6 = pnand %p6708_p5, %p6704_p2 }
  0xaa   :  { %6712 = shalt.err (!%p6709_p6)
}
  0xab   :  { %299 = dma.hbm_to_vmem [thread:$0]  %s7553_s7, 2560, %s294_s11, [#allocation26], %s7256_s18, %s7256_s18, %s7257_s22  }
  0xac   :  { %s7265_s23 = smov [#allocation28]   ;;  %s347_s21 = sshll.u32 %s7428_s25, 4  ;;  %s7571_s21 = int_to_ptr.hbm [resolvable:$true] %s347_s21 }
  0xad   :  { %s321_s19 = sshll.u32 %s7265_s23, 4  ;;  %s6725_s24 = sshra.s32 %s7561_s10, 4  ;;  %s322_s19 = int_to_ptr.vmem [resolvable:$true] %s321_s19  ;;  %s6726_s24 = int_to_ptr.hbm [resolvable:$true] %s6725_s24 }
  0xae   :  { %s6727_s28 = scalar_lea.hbm %s6726_s24, 120  ;;  %s6729_s0 = scalar_lea.hbm %s7413_s20, 120 }
  0xaf   :  { %p6728_p7 = scmp.ne.s32.totalorder %s6726_s24, %s6727_s28  ;;  %p6730_p8 = scmp.lt.s32.totalorder %s6726_s24, %s7413_s20 }
  0xb0   :  { %p6731_p9 = scmp.lt.s32.totalorder %s6729_s0, %s6727_s28 }
  0xb2   :  { %p6732_p10 = por %p6731_p9, %p6730_p8 }
  0xb4   :  { %p6733_p11 = pnand %p6732_p10, %p6728_p7 }
  0xb6   :  { %6736 = shalt.err (!%p6733_p11)
}
  0xb7   :  { %327 = dma.hbm_to_vmem [thread:$0]  %s7561_s10, 1920, %s322_s19, [#allocation29], %s7256_s18, %s7256_s18, %s7257_s22  }
  0xb8   :  { %s381_s1 = sshll.u32 %s7458_s5, 4  ;;  %s7266_s2 = smov [#allocation31]   ;;  %s7581_s1 = int_to_ptr.hbm [resolvable:$true] %s381_s1 }
  0xb9   :  { %s349_s7 = sshll.u32 %s7266_s2, 4  ;;  %s6749_s20 = sshra.s32 %s7571_s21, 4  ;;  %s350_s7 = int_to_ptr.vmem [resolvable:$true] %s349_s7  ;;  %s6750_s20 = int_to_ptr.hbm [resolvable:$true] %s6749_s20 }
  0xba   :  { %s6751_s3 = scalar_lea.hbm %s6750_s20, 60  ;;  %s6753_s12 = scalar_lea.hbm %s7428_s25, 60 }
  0xbb   :  { %p6752_p12 = scmp.ne.s32.totalorder %s6750_s20, %s6751_s3  ;;  %p6754_p13 = scmp.lt.s32.totalorder %s6750_s20, %s7428_s25 }
  0xbc   :  { %p6755_p0 = scmp.lt.s32.totalorder %s6753_s12, %s6751_s3 }
  0xbe   :  { %p6756_p1 = por %p6755_p0, %p6754_p13 }
  0xc0   :  { %p6757_p2 = pnand %p6756_p1, %p6752_p12 }
  0xc2   :  { %6760 = shalt.err (!%p6757_p2)
}
  0xc3   :  { %355 = dma.hbm_to_vmem [thread:$0]  %s7571_s21, 960, %s350_s7, [#allocation32], %s7256_s18, %s7256_s18, %s7257_s22  }
  0xc4   :  { %s7267_s15 = smov [#allocation34]   ;;  %s6773_s13 = sshra.s32 %s7581_s1, 4  ;;  %s6774_s13 = int_to_ptr.hbm [resolvable:$true] %s6773_s13 }
  0xc5   :  { %s383_s10 = sshll.u32 %s7267_s15, 4  ;;  %s6775_s11 = scalar_lea.hbm %s6774_s13, 4  ;;  %s384_s10 = int_to_ptr.vmem [resolvable:$true] %s383_s10 }
  0xc6   :  { %p6776_p3 = scmp.ne.s32.totalorder %s6774_s13, %s6775_s11  ;;  %s6777_s25 = scalar_lea.hbm %s7458_s5, 4 }
  0xc7   :  { %p6778_p4 = scmp.lt.s32.totalorder %s6774_s13, %s7458_s5  ;;  %p6779_p5 = scmp.lt.s32.totalorder %s6777_s25, %s6775_s11 }
  0xc9   :  { %p6780_p6 = por %p6779_p5, %p6778_p4 }
  0xcb   :  { %p6781_p7 = pnand %p6780_p6, %p6776_p3 }
  0xcd   :  { %6784 = shalt.err (!%p6781_p7)
}
  0xce   :  { %s7268_s16 = smov 32   ;;  %s7269_s4 = smov 2  }
  0xcf   :  { %389 = dma.hbm_to_vmem [thread:$0]  %s7581_s1, 64, %s384_s10, [#allocation35], %s7268_s16, %s7268_s16, %s7269_s4  }
  0xd0   :  { %s115_s26 = sshll.u32 %s7303_s9, 4  ;;  %s7270_s23 = smov [#allocation4]   ;;  %s116_s26 = int_to_ptr.hbm [resolvable:$true] %s115_s26 }
  0xd1   :  { %s117_s19 = sshll.u32 %s7270_s23, 4  ;;  %s136_s5 = sshll.u32 %s7313_s17, 4  ;;  %s118_s19 = int_to_ptr.vmem [resolvable:$true] %s117_s19  ;;  %s137_s5 = int_to_ptr.hbm [resolvable:$true] %s136_s5 }
  0xd2   :  { %s6797_s21 = sshra.s32 %s116_s26, 4  ;;  %s6801_s28 = scalar_lea.hbm %s7303_s9, 2  ;;  %s6798_s21 = int_to_ptr.hbm [resolvable:$true] %s6797_s21 }
  0xd3   :  { %s6799_s24 = scalar_lea.hbm %s6798_s21, 2  ;;  %p6802_p9 = scmp.lt.s32.totalorder %s6798_s21, %s7303_s9 }
  0xd4   :  { %p6800_p8 = scmp.ne.s32.totalorder %s6798_s21, %s6799_s24  ;;  %p6803_p10 = scmp.lt.s32.totalorder %s6801_s28, %s6799_s24 }
  0xd6   :  { %p6804_p11 = por %p6803_p10, %p6802_p9 }
  0xd8   :  { %p6805_p12 = pnand %p6804_p11, %p6800_p8 }
  0xda   :  { %6808 = shalt.err (!%p6805_p12)
}
  0xdb   :  { %120 = dma.hbm_to_vmem [thread:$0]  %s116_s26, 32, %s118_s19, [#allocation5]  }
  0xdc   :  { %s7271_s0 = smov [#allocation9]   ;;  %s164_s2 = sshll.u32 %s7328_s29, 4  ;;  %s7602_s2 = int_to_ptr.hbm [resolvable:$true] %s164_s2 }
  0xdd   :  { %s138_s1 = sshll.u32 %s7271_s0, 4  ;;  %s6821_s7 = sshra.s32 %s137_s5, 4  ;;  %s139_s1 = int_to_ptr.vmem [resolvable:$true] %s138_s1  ;;  %s6822_s7 = int_to_ptr.hbm [resolvable:$true] %s6821_s7 }
  0xde   :  { %s6823_s20 = scalar_lea.hbm %s6822_s7, 40  ;;  %s6825_s9 = scalar_lea.hbm %s7313_s17, 40 }
  0xdf   :  { %p6824_p13 = scmp.ne.s32.totalorder %s6822_s7, %s6823_s20  ;;  %p6826_p0 = scmp.lt.s32.totalorder %s6822_s7, %s7313_s17 }
  0xe0   :  { %p6827_p1 = scmp.lt.s32.totalorder %s6825_s9, %s6823_s20 }
  0xe2   :  { %p6828_p2 = por %p6827_p1, %p6826_p0 }
  0xe4   :  { %p6829_p3 = pnand %p6828_p2, %p6824_p13 }
  0xe6   :  { %6832 = shalt.err (!%p6829_p3)
}
  0xe7   :  { %144 = dma.hbm_to_vmem [thread:$0]  %s137_s5, 640, %s139_s1, [#allocation8], %s7256_s18, %s7256_s18, %s7257_s22  }
  0xe8   :  { %s192_s3 = sshll.u32 %s7343_s14, 4  ;;  %s7272_s12 = smov [#allocation12]   ;;  %s7610_s3 = int_to_ptr.hbm [resolvable:$true] %s192_s3 }
  0xe9   :  { %s166_s15 = sshll.u32 %s7272_s12, 4  ;;  %s6845_s10 = sshra.s32 %s7602_s2, 4  ;;  %s167_s15 = int_to_ptr.vmem [resolvable:$true] %s166_s15  ;;  %s6846_s10 = int_to_ptr.hbm [resolvable:$true] %s6845_s10 }
  0xea   :  { %s6847_s17 = scalar_lea.hbm %s6846_s10, 20  ;;  %s6849_s13 = scalar_lea.hbm %s7328_s29, 20 }
  0xeb   :  { %p6848_p4 = scmp.ne.s32.totalorder %s6846_s10, %s6847_s17  ;;  %p6850_p5 = scmp.lt.s32.totalorder %s6846_s10, %s7328_s29 }
  0xec   :  { %p6851_p6 = scmp.lt.s32.totalorder %s6849_s13, %s6847_s17 }
  0xee   :  { %p6852_p7 = por %p6851_p6, %p6850_p5 }
  0xf0   :  { %p6853_p8 = pnand %p6852_p7, %p6848_p4 }
  0xf2   :  { %6856 = shalt.err (!%p6853_p8)
}
  0xf3   :  { %172 = dma.hbm_to_vmem [thread:$0]  %s7602_s2, 320, %s167_s15, [#allocation11], %s7256_s18, %s7256_s18, %s7257_s22  }
  0xf4   :  { %s7273_s11 = smov [#allocation15]   ;;  %s6869_s26 = sshra.s32 %s7610_s3, 4  ;;  %s6870_s26 = int_to_ptr.hbm [resolvable:$true] %s6869_s26 }
  0xf5   :  { %s194_s25 = sshll.u32 %s7273_s11, 4  ;;  %s6871_s23 = scalar_lea.hbm %s6870_s26, 4  ;;  %s195_s25 = int_to_ptr.vmem [resolvable:$true] %s194_s25 }
  0xf6   :  { %p6872_p9 = scmp.ne.s32.totalorder %s6870_s26, %s6871_s23  ;;  %s6873_s29 = scalar_lea.hbm %s7343_s14, 4 }
  0xf7   :  { %p6874_p10 = scmp.lt.s32.totalorder %s6870_s26, %s7343_s14  ;;  %p6875_p11 = scmp.lt.s32.totalorder %s6873_s29, %s6871_s23 }
  0xf9   :  { %p6876_p12 = por %p6875_p11, %p6874_p10 }
  0xfb   :  { %p6877_p13 = pnand %p6876_p12, %p6872_p9 }
  0xfd   :  { %6880 = shalt.err (!%p6877_p13)
}
  0xfe   :  { %s7274_s19 = smov 16   ;;  %s8219_s5 = sld [smem:[#allocation64_spill]] }
  0xff   :  { %s8220_s21 = sld [smem:[#allocation67_spill]]  ;;  %s7275_s24 = smov 1  }
 0x100   :  { %200 = dma.hbm_to_vmem [thread:$0]  %s7610_s3, 64, %s195_s25, [#allocation14], %s7274_s19, %s7274_s19, %s7275_s24  }
 0x101   :  { %s7276_s0 = smov [#allocation18]  }
 0x102   :  { %s222_s1 = sshll.u32 %s7276_s0, 4  ;;  %s223_s1 = int_to_ptr.vmem [resolvable:$true] %s222_s1 }
 0x104   :  { %s220_s28 = sshll.u32 %s8219_s5, 4  ;;  %s6897_s20 = scalar_lea.hbm %s8219_s5, 32  ;;  %s221_s28 = int_to_ptr.hbm [resolvable:$true] %s220_s28 }
 0x105   :  { %s250_s2 = sshll.u32 %s8220_s21, 4  ;;  %s6893_s7 = sshra.s32 %s221_s28, 4  ;;  %s6894_s7 = int_to_ptr.hbm [resolvable:$true] %s6893_s7  ;;  %s251_s2 = int_to_ptr.hbm [resolvable:$true] %s250_s2 }
 0x106   :  { %s6895_s14 = scalar_lea.hbm %s6894_s7, 32  ;;  %p6898_p1 = scmp.lt.s32.totalorder %s6894_s7, %s8219_s5 }
 0x107   :  { %p6896_p0 = scmp.ne.s32.totalorder %s6894_s7, %s6895_s14  ;;  %p6899_p2 = scmp.lt.s32.totalorder %s6897_s20, %s6895_s14 }
 0x109   :  { %p6900_p3 = por %p6899_p2, %p6898_p1 }
 0x10b   :  { %p6901_p4 = pnand %p6900_p3, %p6896_p0 }
 0x10d   :  { %6904 = shalt.err (!%p6901_p4)
}
 0x10e   :  { %s8221_s9 = sld [smem:[#allocation68_spill]]  ;;  %s7277_s3 = smov [#allocation21]  }
 0x10f   :  { %228 = dma.hbm_to_vmem [thread:$0]  %s221_s28, 512, %s223_s1, [#allocation17], %s7256_s18, %s7256_s18, %s7257_s22  }
 0x110   :  { %s252_s12 = sshll.u32 %s7277_s3, 4  ;;  %s6917_s10 = sshra.s32 %s251_s2, 4  ;;  %s253_s12 = int_to_ptr.vmem [resolvable:$true] %s252_s12  ;;  %s6918_s10 = int_to_ptr.hbm [resolvable:$true] %s6917_s10 }
 0x111   :  { %s6919_s17 = scalar_lea.hbm %s6918_s10, 32  ;;  %s6921_s13 = scalar_lea.hbm %s8220_s21, 32 }
 0x112   :  { %p6920_p5 = scmp.ne.s32.totalorder %s6918_s10, %s6919_s17  ;;  %p6922_p6 = scmp.lt.s32.totalorder %s6918_s10, %s8220_s21 }
 0x113   :  { %p6923_p7 = scmp.lt.s32.totalorder %s6921_s13, %s6919_s17 }
 0x114   :  { %s276_s15 = sshll.u32 %s8221_s9, 4  ;;  %s7631_s15 = int_to_ptr.hbm [resolvable:$true] %s276_s15 }
 0x115   :  { %p6924_p8 = por %p6923_p7, %p6922_p6 }
 0x117   :  { %p6925_p9 = pnand %p6924_p8, %p6920_p5 }
 0x119   :  { %6928 = shalt.err (!%p6925_p9)
}
 0x11a   :  { %s8222_s11 = sld [smem:[#allocation70_spill]]  ;;  %s7278_s26 = smov [#allocation24]  }
 0x11b   :  { %258 = dma.hbm_to_vmem [thread:$0]  %s251_s2, 512, %s253_s12, [#allocation20], %s7256_s18, %s7256_s18, %s7257_s22  }
 0x11c   :  { %s278_s23 = sshll.u32 %s7278_s26, 4  ;;  %s6941_s29 = sshra.s32 %s7631_s15, 4  ;;  %s279_s23 = int_to_ptr.vmem [resolvable:$true] %s278_s23  ;;  %s6942_s29 = int_to_ptr.hbm [resolvable:$true] %s6941_s29 }
 0x11d   :  { %s6943_s19 = scalar_lea.hbm %s6942_s29, 160  ;;  %s6945_s5 = scalar_lea.hbm %s8221_s9, 160 }
 0x11e   :  { %p6944_p10 = scmp.ne.s32.totalorder %s6942_s29, %s6943_s19  ;;  %p6946_p11 = scmp.lt.s32.totalorder %s6942_s29, %s8221_s9 }
 0x11f   :  { %p6947_p12 = scmp.lt.s32.totalorder %s6945_s5, %s6943_s19 }
 0x120   :  { %s304_s25 = sshll.u32 %s8222_s11, 4  ;;  %s7639_s25 = int_to_ptr.hbm [resolvable:$true] %s304_s25 }
 0x121   :  { %p6948_p13 = por %p6947_p12, %p6946_p11 }
 0x123   :  { %p6949_p0 = pnand %p6948_p13, %p6944_p10 }
 0x125   :  { %6952 = shalt.err (!%p6949_p0)
}
 0x126   :  { %s8223_s21 = sld [smem:[#allocation72_spill]]  ;;  %s7279_s24 = smov [#allocation27]  }
 0x127   :  { %284 = dma.hbm_to_vmem [thread:$0]  %s7631_s15, 2560, %s279_s23, [#allocation23], %s7256_s18, %s7256_s18, %s7257_s22  }
 0x128   :  { %s306_s28 = sshll.u32 %s7279_s24, 4  ;;  %s6965_s1 = sshra.s32 %s7639_s25, 4  ;;  %s307_s28 = int_to_ptr.vmem [resolvable:$true] %s306_s28  ;;  %s6966_s1 = int_to_ptr.hbm [resolvable:$true] %s6965_s1 }
 0x129   :  { %s6967_s2 = scalar_lea.hbm %s6966_s1, 160  ;;  %s6969_s7 = scalar_lea.hbm %s8222_s11, 160 }
 0x12a   :  { %p6968_p1 = scmp.ne.s32.totalorder %s6966_s1, %s6967_s2  ;;  %p6970_p2 = scmp.lt.s32.totalorder %s6966_s1, %s8222_s11 }
 0x12b   :  { %p6971_p3 = scmp.lt.s32.totalorder %s6969_s7, %s6967_s2 }
 0x12c   :  { %s332_s0 = sshll.u32 %s8223_s21, 4  ;;  %s7649_s0 = int_to_ptr.hbm [resolvable:$true] %s332_s0 }
 0x12d   :  { %p6972_p4 = por %p6971_p3, %p6970_p2 }
 0x12f   :  { %p6973_p5 = pnand %p6972_p4, %p6968_p1 }
 0x131   :  { %6976 = shalt.err (!%p6973_p5)
}
 0x132   :  { %s8224_s14 = sld [smem:[#allocation76_spill]]  ;;  %s7280_s9 = smov [#allocation30]  }
 0x133   :  { %312 = dma.hbm_to_vmem [thread:$0]  %s7639_s25, 2560, %s307_s28, [#allocation26], %s7256_s18, %s7256_s18, %s7257_s22  }
 0x134   :  { %s334_s3 = sshll.u32 %s7280_s9, 4  ;;  %s6989_s12 = sshra.s32 %s7649_s0, 4  ;;  %s335_s3 = int_to_ptr.vmem [resolvable:$true] %s334_s3  ;;  %s6990_s12 = int_to_ptr.hbm [resolvable:$true] %s6989_s12 }
 0x135   :  { %s6991_s15 = scalar_lea.hbm %s6990_s12, 120  ;;  %s6993_s10 = scalar_lea.hbm %s8223_s21, 120 }
 0x136   :  { %p6992_p6 = scmp.ne.s32.totalorder %s6990_s12, %s6991_s15  ;;  %p6994_p7 = scmp.lt.s32.totalorder %s6990_s12, %s8223_s21 }
 0x137   :  { %p6995_p8 = scmp.lt.s32.totalorder %s6993_s10, %s6991_s15 }
 0x138   :  { %s364_s20 = sshll.u32 %s8224_s14, 4  ;;  %s7659_s20 = int_to_ptr.hbm [resolvable:$true] %s364_s20 }
 0x139   :  { %p6996_p9 = por %p6995_p8, %p6994_p7 }
 0x13b   :  { %p6997_p10 = pnand %p6996_p9, %p6992_p6 }
 0x13d   :  { %7000 = shalt.err (!%p6997_p10)
}
 0x13e   :  { %s8225_s17 = sld [smem:[#allocation79_spill]]  ;;  %s7281_s13 = smov [#allocation33]  }
 0x13f   :  { %340 = dma.hbm_to_vmem [thread:$0]  %s7649_s0, 1920, %s335_s3, [#allocation29], %s7256_s18, %s7256_s18, %s7257_s22  }
 0x140   :  { %s366_s11 = sshll.u32 %s7281_s13, 4  ;;  %s7013_s26 = sshra.s32 %s7659_s20, 4  ;;  %s367_s11 = int_to_ptr.vmem [resolvable:$true] %s366_s11  ;;  %s7014_s26 = int_to_ptr.hbm [resolvable:$true] %s7013_s26 }
 0x141   :  { %s7015_s23 = scalar_lea.hbm %s7014_s26, 40  ;;  %s7017_s29 = scalar_lea.hbm %s8224_s14, 40 }
 0x142   :  { %p7016_p11 = scmp.ne.s32.totalorder %s7014_s26, %s7015_s23  ;;  %p7018_p12 = scmp.lt.s32.totalorder %s7014_s26, %s8224_s14 }
 0x143   :  { %p7019_p13 = scmp.lt.s32.totalorder %s7017_s29, %s7015_s23 }
 0x144   :  { %s394_s25 = sshll.u32 %s8225_s17, 4  ;;  %s7669_s25 = int_to_ptr.hbm [resolvable:$true] %s394_s25 }
 0x145   :  { %p7020_p0 = por %p7019_p13, %p7018_p12 }
 0x147   :  { %p7021_p1 = pnand %p7020_p0, %p7016_p11 }
 0x149   :  { %7024 = shalt.err (!%p7021_p1)
}
 0x14a   :  { %s8226_s19 = sld [smem:[#allocation82_spill]]  ;;  %s7282_s21 = smov [#allocation36]  }
 0x14b   :  { %372 = dma.hbm_to_vmem [thread:$0]  %s7659_s20, 640, %s367_s11, [#allocation32], %s7256_s18, %s7256_s18, %s7257_s22  }
 0x14c   :  { %s396_s24 = sshll.u32 %s7282_s21, 4  ;;  %s7037_s28 = sshra.s32 %s7669_s25, 4  ;;  %s397_s24 = int_to_ptr.vmem [resolvable:$true] %s396_s24  ;;  %s7038_s28 = int_to_ptr.hbm [resolvable:$true] %s7037_s28 }
 0x14d   :  { %s7039_s0 = scalar_lea.hbm %s7038_s28, 4  ;;  %s7041_s1 = scalar_lea.hbm %s8225_s17, 4 }
 0x14e   :  { %p7040_p2 = scmp.ne.s32.totalorder %s7038_s28, %s7039_s0  ;;  %p7042_p3 = scmp.lt.s32.totalorder %s7038_s28, %s8225_s17 }
 0x14f   :  { %p7043_p4 = scmp.lt.s32.totalorder %s7041_s1, %s7039_s0 }
 0x150   :  { %s411_s5 = sshll.u32 %s8226_s19, 4  ;;  %s7679_s5 = int_to_ptr.hbm [resolvable:$true] %s411_s5 }
 0x151   :  { %p7044_p5 = por %p7043_p4, %p7042_p3 }
 0x153   :  { %p7045_p6 = pnand %p7044_p5, %p7040_p2 }
 0x155   :  { %7048 = shalt.err (!%p7045_p6)
}
 0x156   :  { %402 = dma.hbm_to_vmem [thread:$0]  %s7669_s25, 64, %s397_s24, [#allocation35], %s7268_s16, %s7268_s16, %s7269_s4  }
 0x157   :  { %s7283_s2 = smov [#allocation37]   ;;  %s7061_s14 = sshra.s32 %s7679_s5, 4  ;;  %s7062_s14 = int_to_ptr.hbm [resolvable:$true] %s7061_s14 }
 0x158   :  { %s413_s7 = sshll.u32 %s7283_s2, 4  ;;  %s7063_s20 = scalar_lea.hbm %s7062_s14, 32  ;;  %s414_s7 = int_to_ptr.vmem [resolvable:$true] %s413_s7 }
 0x159   :  { %p7064_p7 = scmp.ne.s32.totalorder %s7062_s14, %s7063_s20  ;;  %s7065_s9 = scalar_lea.hbm %s8226_s19, 32 }
 0x15a   :  { %p7066_p8 = scmp.lt.s32.totalorder %s7062_s14, %s8226_s19  ;;  %p7067_p9 = scmp.lt.s32.totalorder %s7065_s9, %s7063_s20 }
 0x15c   :  { %p7068_p10 = por %p7067_p9, %p7066_p8 }
 0x15e   :  { %p7069_p11 = pnand %p7068_p10, %p7064_p7 }
 0x160   :  { %7072 = shalt.err (!%p7069_p11)
}
 0x161   :  { %419 = dma.hbm_to_vmem [thread:$0]  %s7679_s5, 512, %s414_s7, [#allocation38], %s7256_s18, %s7256_s18, %s7257_s22  }
 0x162   :  { %7181 = dma.done.wait [#allocation5], 32  }
 0x163   :  { %7182 = vsyncadd [#allocation5], 4294967264 }
 0x164   :  { %7183 = dma.done.wait [#allocation8], 672  }
 0x165   :  { %7184 = vsyncadd [#allocation8], 4294966624 }
 0x166   :  { %7185 = dma.done.wait [#allocation11], 2240  }
 0x167   :  { %7186 = vsyncadd [#allocation11], 4294965056 }
 0x168   :  { %7187 = dma.done.wait [#allocation14], 2624  }
 0x169   :  { %7188 = vsyncadd [#allocation14], 4294964672 }
 0x16a   :  { %7189 = dma.done.wait [#allocation17], 2560  }
 0x16b   :  { %7190 = vsyncadd [#allocation17], 4294964736 }
 0x16c   :  { %7191 = dma.done.wait [#allocation20], 1024  }
 0x16d   :  { %7192 = vsyncadd [#allocation20], 4294966272 }
 0x16e   :  { %7193 = dma.done.wait [#allocation23], 3840  }
 0x16f   :  { %7194 = vsyncadd [#allocation23], 4294963456 }
 0x170   :  { %7195 = dma.done.wait [#allocation26], 5120  }
 0x171   :  { %7196 = vsyncadd [#allocation26], 4294962176 }
 0x172   :  { %7197 = dma.done.wait [#allocation29], 3840  }
 0x173   :  { %7198 = vsyncadd [#allocation29], 4294963456 }
 0x174   :  { %7199 = dma.done.wait [#allocation32], 1600  }
 0x175   :  { %7200 = vsyncadd [#allocation32], 4294965696 }
 0x176   :  { %7201 = dma.done.wait [#allocation35], 128  }
 0x177   :  { %7202 = vsyncadd [#allocation35], 4294967168 }
 0x178   :  { %7203 = dma.done.wait [#allocation38], 512  }
 0x179   :  { %7204 = vsyncadd [#allocation38], 4294966784  ;;  %s8227_s22 = sld [smem:[#allocation60_spill]]  ;;  %v6207_v0 = vld [vmem:[#allocation10 + $0x10] sm:$0xff]  ;;  %v6211_v1 = vld [vmem:[#allocation10 + $0x28] sm:$0xff]  ;;  %vm549_vm0 = vcmask 392192  }
 0x17a   :  { %561 = vmatpush.bf16.msra.mxu0 %v6207_v0  ;;  %609 = vmatpush.bf16.msra.mxu1 %v6211_v1  ;;  %v6206_v2 = vld [vmem:[#allocation10 + $0x8] sm:$0xff]  ;;  %v6210_v3 = vld [vmem:[#allocation10 + $0x20] sm:$0xff]  ;;  %v6209_v5 = vld [vmem:[#allocation10 + $0x18] sm:$0xff]  ;;  %vm633_vm1 = vcmask 261120   ;;  %s8228_s16 = sld [smem:[#allocation61_spill]]  ;;  %vm933_vm2 = vcmask 523264  }
 0x17b   :  { %v6205_v4 = vld [vmem:[#allocation10] sm:$0xff]  ;;  %v6208_v22 = vld [vmem:[#allocation9] sm:$0xff]  ;;  %v6213_v24 = vld [vmem:[#allocation10 + $0x30] sm:$0xff]  ;;  %vm1003_vm3 = vcmask 130048   ;;  %s8229_s4 = sld [smem:[#allocation62_spill]]  ;;  %vm1249_vm4 = vcmask 1043456  }
 0x17c   :  { %v6215_v19 = vld [vmem:[#allocation10 + $0x40] sm:$0xff]  ;;  %v6214_v23 = vld [vmem:[#allocation10 + $0x38] sm:$0xff]  ;;  %v6223_v25 = vld [vmem:[#allocation10 + $0x70] sm:$0xff]  ;;  %vm1245_vm5 = vcmask 64512   ;;  %s8230_s3 = sld [smem:[#allocation63_spill]]  ;;  %vm1577_vm6 = vcmask 254976  }
 0x17d   :  { %v6212_v21 = vld [vmem:[#allocation9 + $0x8] sm:$0xff]  ;;  %v6222_v26 = vld [vmem:[#allocation10 + $0x68] sm:$0xff]  ;;  %v6219_v37 = vld [vmem:[#allocation10 + $0x58] sm:$0xff]  ;;  %s8231_s12 = sld [smem:[#allocation65_spill]]  ;;  %s7284_s15 = smov 96   ;;  %vm1678_vm7 = vcmask 1041408  }
 0x17e   :  { %562 = vmatpush.bf16.msra.mxu0 %v6206_v2  ;;  %610 = vmatpush.bf16.msra.mxu1 %v6210_v3  ;;  %v6221_v30 = vld [vmem:[#allocation10 + $0x60] sm:$0xff]  ;;  %v6216_v39 = vld [vmem:[#allocation9 + $0x10] sm:$0xff]  ;;  %v6218_v40 = vld [vmem:[#allocation10 + $0x50] sm:$0xff]  ;;  %s8232_s10 = sld [smem:[#allocation66_spill]]  ;;  %vm1674_vm8 = vcmask 31744   ;;  %vm2929_vm9 = vcmask 388096  }
 0x17f   :  { %v7696_v6 = vld [vmem:[%s8227_s22] sm:$0xff]  ;;  %v6204_v7 = vld [vmem:[%s8227_s22 + $0x8] sm:$0xff]  ;;  %v6224_v50 = vld [vmem:[#allocation9 + $0x20] sm:$0xff]  ;;  %s8233_s17 = sld [smem:[#allocation69_spill]]  ;;  %vm3173_vm10 = vcmask 785408   ;;  %vm4296_vm11 = vcmask 195584  }
 0x180   :  { %v6217_v41 = vld [vmem:[#allocation10 + $0x48] sm:$0xff]  ;;  %v6220_v59 = vld [vmem:[#allocation9 + $0x18] sm:$0xff]  ;;  %v6227_v63 = vld [vmem:[#allocation13 + $0x10] sm:$0xff]  ;;  %s8234_s13 = sld [smem:[#allocation71_spill]]  ;;  %vm4605_vm12 = vcmask 1045504   ;;  %vm4601_vm13 = vcmask 97280  }
 0x181   :  { %v6228_v60 = vld [vmem:[#allocation13 + $0x18] sm:$0xff]  ;;  %v6231_v0 = vld [vmem:[#allocation13 + $0x30] sm:$0xff]  ;;  %v6226_v2 = vld [vmem:[#allocation13 + $0x8] sm:$0xff]  ;;  %s8235_s11 = sld [smem:[#allocation84_spill]]  ;;  %vm4622_vm14 = vcmask 519168   ;;  %vm4646_vm15 = vcmask 1043968  }
 0x182   :  { %563 = vmatpush.bf16.msra.mxu0 %v6205_v4  ;;  %611 = vmatpush.bf16.msra.mxu1 %v6209_v5  ;;  %v6232_v61 = vld [vmem:[#allocation13 + $0x38] sm:$0xff]  ;;  %v6235_v1 = vld [vmem:[#allocation13 + $0x50] sm:$0xff]  ;;  %v6230_v3 = vld [vmem:[#allocation13 + $0x28] sm:$0xff]  ;;  %s8236_s25 = sld [smem:[#allocation74_spill]]  ;;  %s7285_s28 = smov 127  }
 0x183   :  { %v6236_v62 = vld [vmem:[#allocation13 + $0x58] sm:$0xff]  ;;  %v6234_v4 = vld [vmem:[#allocation13 + $0x48] sm:$0xff]  ;;  %v6225_v5 = vld [vmem:[#allocation13] sm:$0xff]  ;;  %s8237_s26 = sld [smem:[#allocation73_spill]]  ;;  %s7286_s0 = smov [#allocation40]  }
 0x184   :  { %s8238_s23 = sld [smem:[#allocation77_spill]]  ;;  %s4904_s1 = sshll.u32 %s7286_s0, 4  ;;  %s4905_s1 = int_to_ptr.vmem [resolvable:$true] %s4904_s1 }
 0x185   :  { %5030 = vmatmul.msk.bf16.vlgmr.msra.gmra.mxu0 %vm549_vm0, %v7696_v6  ;;  %5044 = vmatmul.msk.bf16.vlgmr.msra.gmra.mxu1 %vm549_vm0, %v7696_v6  ;;  %s8239_s29 = sld [smem:[#allocation75_spill]]  ;;  %s4906_s2 = sshll.u32 %s7503_s8, 4  ;;  %s4907_s2 = int_to_ptr.hbm [resolvable:$true] %s4906_s2 }
 0x186   :  { %849 = vmatpush.bf16.msrb.mxu1 %v6223_v25  ;;  %s8240_s19 = sld [smem:[#allocation78_spill]]  ;;  %s7097_s7 = sshra.s32 %s4907_s2, 4  ;;  %s7098_s7 = int_to_ptr.hbm [resolvable:$true] %s7097_s7 }
 0x187   :  { %s8241_s5 = sld [smem:[#allocation80_spill]]  ;;  %s7099_s14 = scalar_lea.hbm %s7098_s7, 2 }
 0x188   :  { %s8242_s21 = sld [smem:[#allocation81_spill]]  ;;  %p7100_p12 = scmp.ne.s32.totalorder %s7098_s7, %s7099_s14 }
 0x189   :  { %s8243_s24 = sld [smem:[#allocation83_spill]]  ;;  %s7101_s20 = scalar_lea.hbm %s7503_s8, 2 }
 0x18a   :  { %850 = vmatpush.bf16.msrb.mxu1 %v6222_v26  ;;  %p7102_p13 = scmp.lt.s32.totalorder %s7098_s7, %s7503_s8  ;;  %p7103_p0 = scmp.lt.s32.totalorder %s7101_s20, %s7099_s14 }
 0x18c   :  { %p7104_p1 = por %p7103_p0, %p7102_p13 }
 0x18e   :  { %851 = vmatpush.bf16.msrb.mxu1 %v6221_v30  ;;  %p7105_p2 = pnand %p7104_p1, %p7100_p12 }
 0x192   :  { %1073 = vmatpush.bf16.msra.mxu1 %v6236_v62 }
 0x195   :  { %5031 = vmatmul.msk.bf16.gmra.mxu0 %vm549_vm0, %v6204_v7  ;;  %5045 = vmatmul.msk.bf16.gmra.mxu1 %vm549_vm0, %v6204_v7 }
 0x196   :  { %1074 = vmatpush.bf16.msra.mxu1 %v6235_v1  ;;  %v6249_v1 = vld [vmem:[#allocation16 + $0x20] sm:$0xff] }
 0x19a   :  { %1075 = vmatpush.bf16.msra.mxu1 %v6234_v4 }
 0x1a5   :  { %5106 = vmatmul.msk.bf16.vlgmr.msrb.gmra.mxu1 %vm549_vm0, %v7696_v6 }
 0x1b5   :  { %5107 = vmatmul.msk.bf16.gmra.mxu1 %vm549_vm0, %v6204_v7 }
 0x202   :  { %v565_v8 = vpop.f32.mrf.mxu0  ;;  %v613_v9 = vpop.f32.mrf.mxu1 }
 0x20a   :  { %v567_v10 = vpop.f32.mrf.mxu0  ;;  %v615_v11 = vpop.f32.mrf.mxu1 }
 0x20b   :  { %v577_v18 = vpack.c.bf16 %v567_v10, %v565_v8  ;;  %v626_v20 = vpack.c.bf16 %v615_v11, %v613_v9  ;;  %v6244_v8 = vld [vmem:[#allocation13 + $0x98] sm:$0xff]  ;;  %v6243_v9 = vld [vmem:[#allocation13 + $0x90] sm:$0xff]  ;;  %v6242_v10 = vld [vmem:[#allocation13 + $0x88] sm:$0xff] }
 0x20c   :  { %v6241_v11 = vld [vmem:[#allocation13 + $0x80] sm:$0xff] }
 0x212   :  { %v570_v12 = vpop.f32.mrf.mxu0  ;;  %v618_v13 = vpop.f32.mrf.mxu1 }
 0x21a   :  { %v572_v14 = vpop.f32.mrf.mxu0  ;;  %v620_v15 = vpop.f32.mrf.mxu1 }
 0x21b   :  { %v627_v16 = vpack.c.bf16 %v620_v15, %v618_v13  ;;  %v578_v17 = vpack.c.bf16 %v572_v14, %v570_v12 }
 0x21d   :  { %643 = vmatpush.bf16.msra.mxu2 %v627_v16  ;;  %665 = vmatpush.bf16.msra.mxu3 %v578_v17 }
 0x221   :  { %644 = vmatpush.bf16.msra.mxu2 %v626_v20  ;;  %666 = vmatpush.bf16.msra.mxu3 %v577_v18  ;;  %v6520_v18 = vld [vmem:[%s8228_s16] ss:$0 sm:$0xff] }
 0x222   :  { %v853_v42 = vpop.f32.mrf.mxu1 }
 0x224   :  { %5050 = vmatmul.msk.bf16.vlgmr.msra.gmra.mxu2 %vm633_vm1, %v6212_v21  ;;  %5055 = vmatmul.msk.bf16.vlgmr.msra.gmra.mxu3 %vm633_vm1, %v6208_v22 }
 0x225   :  { %703 = vmatpush.bf16.msrb.mxu2 %v6215_v19 }
 0x229   :  { %704 = vmatpush.bf16.msrb.mxu2 %v6214_v23 }
 0x22a   :  { %v855_v43 = vpop.f32.mrf.mxu1 }
 0x22b   :  { %v866_v47 = vpack.c.bf16 %v855_v43, %v853_v42  ;;  %v6239_v42 = vld [vmem:[#allocation13 + $0x70] sm:$0xff]  ;;  %v6238_v43 = vld [vmem:[#allocation13 + $0x68] sm:$0xff] }
 0x22d   :  { %705 = vmatpush.bf16.msrb.mxu2 %v6213_v24 }
 0x232   :  { %v858_v44 = vpop.f32.mrf.mxu1 }
 0x234   :  { %5068 = vmatmul.msk.bf16.vlgmr.msrb.gmra.mxu2 %vm549_vm0, %v7696_v6 }
 0x23a   :  { %v860_v45 = vpop.f32.mrf.mxu1 }
 0x23b   :  { %v867_v46 = vpack.c.bf16 %v860_v45, %v858_v44 }
 0x23d   :  { %882 = vmatpush.bf16.msra.mxu2 %v867_v46  ;;  %v6237_v46 = vld [vmem:[#allocation13 + $0x60] sm:$0xff] }
 0x241   :  { %883 = vmatpush.bf16.msra.mxu2 %v866_v47  ;;  %v1218_v47 = vld [vmem:[#allocation12 + $0x10] sm:$0xf] }
 0x244   :  { %5069 = vmatmul.msk.bf16.gmra.mxu2 %vm549_vm0, %v6204_v7 }
 0x245   :  { %990 = vmatpush.bf16.msrb.mxu2 %v6232_v61 }
 0x249   :  { %991 = vmatpush.bf16.msrb.mxu2 %v6231_v0  ;;  %v6250_v0 = vld [vmem:[#allocation16 + $0x28] sm:$0xff] }
 0x24d   :  { %992 = vmatpush.bf16.msrb.mxu2 %v6230_v3 }
 0x254   :  { %5112 = vmatmul.msk.bf16.vlgmr.msra.gmra.mxu2 %vm633_vm1, %v6224_v50 }
 0x2a7   :  { %v646_v27 = vpop.f32.mrf.mxu2  ;;  %v668_v28 = vpop.f32.mrf.mxu3 }
 0x2a8   :  { %v669_v29 = vadd.f32 %v668_v28, %v646_v27 }
 0x2af   :  { %v7710_v31 = vpop.f32.mrf.mxu2  ;;  %v670_v48 = vpop.f32.mrf.mxu3 }
 0x2b0   :  { %v671_v15 = vadd.f32 %v670_v48, %v7710_v31 }
 0x2b7   :  { %v707_v32 = vpop.f32.mrf.mxu2 }
 0x2bf   :  { %v709_v33 = vpop.f32.mrf.mxu2 }
 0x2c0   :  { %v720_v38 = vpack.c.bf16 %v709_v33, %v707_v32 }
 0x2c7   :  { %v712_v34 = vpop.f32.mrf.mxu2 }
 0x2cf   :  { %v714_v35 = vpop.f32.mrf.mxu2 }
 0x2d0   :  { %v721_v36 = vpack.c.bf16 %v714_v35, %v712_v34  ;;  %v951_v35 = vld [vmem:[#allocation12] sm:$0xf] }
 0x2d2   :  { %736 = vmatpush.bf16.msrb.mxu3 %v721_v36  ;;  %v1084_v36 = vld [vmem:[#allocation12 + $0x8] sm:$0xf] }
 0x2d6   :  { %737 = vmatpush.bf16.msrb.mxu3 %v720_v38  ;;  %v6240_v38 = vld [vmem:[#allocation13 + $0x78] sm:$0xff] }
 0x2d7   :  { %v885_v12 = vpop.f32.mrf.mxu2 }
 0x2d9   :  { %5074 = vmatmul.msk.bf16.vlgmr.msrb.gmra.mxu3 %vm633_vm1, %v6216_v39 }
 0x2da   :  { %776 = vmatpush.bf16.msra.mxu3 %v6219_v37 }
 0x2de   :  { %777 = vmatpush.bf16.msra.mxu3 %v6218_v40 }
 0x2df   :  { %v887_v21 = vpop.f32.mrf.mxu2 }
 0x2e2   :  { %778 = vmatpush.bf16.msra.mxu3 %v6217_v41  ;;  %v1001_v41 = vld [vmem:[#allocation12 + $0x4] sm:$0xf] }
 0x2e9   :  { %5087 = vmatmul.msk.bf16.vlgmr.msra.gmra.mxu3 %vm549_vm0, %v7696_v6  ;;  %v6229_v6 = vld [vmem:[#allocation13 + $0x20] sm:$0xff] }
 0x2ea   :  { %993 = vmatpush.bf16.msrb.mxu2 %v6229_v6  ;;  %v6247_v6 = vld [vmem:[#allocation16 + $0x10] sm:$0xff] }
 0x2f9   :  { %5088 = vmatmul.msk.bf16.gmra.mxu3 %vm549_vm0, %v6204_v7  ;;  %v6233_v7 = vld [vmem:[#allocation13 + $0x40] sm:$0xff] }
 0x2fa   :  { %1076 = vmatpush.bf16.msra.mxu1 %v6233_v7 }
 0x2fe   :  { %1207 = vmatpush.bf16.msrb.mxu1 %v6244_v8 }
 0x302   :  { %1208 = vmatpush.bf16.msrb.mxu1 %v6243_v9 }
 0x306   :  { %1209 = vmatpush.bf16.msrb.mxu1 %v6242_v10 }
 0x30a   :  { %1210 = vmatpush.bf16.msrb.mxu1 %v6241_v11 }
 0x35c   :  { %v739_v49 = vpop.f32.mrf.mxu3 }
 0x35d   :  { %v744_v51 = vadd.f32 %v739_v49, %v669_v29 }
 0x364   :  { %v741_v52 = vpop.f32.mrf.mxu3 }
 0x365   :  { %v745_v16 = vadd.f32 %v741_v52, %v671_v15  ;;  %v1383_v15 = vld [vmem:[#allocation15 + $0x2] sm:$0x1] }
 0x36c   :  { %v780_v53 = vpop.f32.mrf.mxu3 }
 0x374   :  { %v782_v54 = vpop.f32.mrf.mxu3 }
 0x375   :  { %v793_v58 = vpack.c.bf16 %v782_v54, %v780_v53 }
 0x37c   :  { %v785_v55 = vpop.f32.mrf.mxu3 }
 0x384   :  { %v787_v56 = vpop.f32.mrf.mxu3 }
 0x385   :  { %v794_v57 = vpack.c.bf16 %v787_v56, %v785_v55 }
 0x387   :  { %809 = vmatpush.bf16.msrb.mxu0 %v794_v57 }
 0x38b   :  { %810 = vmatpush.bf16.msrb.mxu0 %v793_v58 }
 0x38e   :  { %5093 = vmatmul.msk.bf16.vlgmr.msrb.gmra.mxu0 %vm633_vm1, %v6220_v59  ;;  %v1151_v59 = vld [vmem:[#allocation12 + $0xc] sm:$0xf] }
 0x38f   :  { %941 = vmatpush.bf16.msra.mxu0 %v6228_v60  ;;  %v6252_v60 = vld [vmem:[#allocation16 + $0x38] sm:$0xff] }
 0x393   :  { %942 = vmatpush.bf16.msra.mxu0 %v6227_v63  ;;  %v6251_v63 = vld [vmem:[#allocation16 + $0x30] sm:$0xff] }
 0x397   :  { %943 = vmatpush.bf16.msra.mxu0 %v6226_v2  ;;  %v6248_v2 = vld [vmem:[#allocation16 + $0x18] sm:$0xff] }
 0x39b   :  { %944 = vmatpush.bf16.msra.mxu0 %v6225_v5  ;;  %v6521_v5 = vld [vmem:[%s8229_s4] ss:$0 sm:$0xff] }
 0x40b   :  { %v812_v13 = vpop.f32.mrf.mxu0 }
 0x40c   :  { %v817_v14 = vadd.f32 %v812_v13, %v744_v51  ;;  %v1244_v13 = vld [vmem:[#allocation15] sm:$0x1] }
 0x40e   :  { %v890_v17 = vadd.f32 %v885_v12, %v817_v14  ;;  %v1276_v14 = vld [vmem:[#allocation15 + $0x1] sm:$0x1] }
 0x410   :  { %v896_v22 = vadd.f32 %v6520_v18, %v890_v17  ;;  %v6245_v17 = vld [vmem:[#allocation16] sm:$0xff] }
 0x412   :  { %v898_v25 = vmax.f32 %v896_v22, 0.0 }
 0x413   :  { %v814_v19 = vpop.f32.mrf.mxu0 }
 0x414   :  { %v818_v20 = vadd.f32 %v814_v19, %v745_v16  ;;  %v6246_v16 = vld [vmem:[#allocation16 + $0x8] sm:$0xff]  ;;  %v6255_v19 = vld [vmem:[#allocation16 + $0x50] sm:$0xff] }
 0x416   :  { %v891_v23 = vadd.f32 %v887_v21, %v818_v20  ;;  %v6254_v20 = vld [vmem:[#allocation16 + $0x48] sm:$0xff]  ;;  %v6253_v21 = vld [vmem:[#allocation16 + $0x40] sm:$0xff] }
 0x418   :  { %v897_v24 = vadd.f32 %v6520_v18, %v891_v23  ;;  %v6256_v18 = vld [vmem:[#allocation16 + $0x58] sm:$0xff] }
 0x41a   :  { %v899_v26 = vmax.f32 %v897_v24, 0.0 }
 0x41c   :  { %v900_v27 = vpack.c.bf16 %v899_v26, %v898_v25 }
 0x41e   :  { %5129 = vmatmul.msk.bf16.vlgmr.msra.gmra.mxu0 %vm933_vm2, %v900_v27  ;;  %5146 = vmatmul.msk.bf16.vlgmr.msrb.gmra.mxu2 %vm933_vm2, %v900_v27 }
 0x41f   :  { %5165 = vmatmul.msk.bf16.vlgmr.msra.gmra.mxu1 %vm933_vm2, %v900_v27 }
 0x420   :  { %1333 = vmatpush.bf16.msra.mxu1 %v6252_v60 }
 0x424   :  { %1334 = vmatpush.bf16.msra.mxu1 %v6251_v63 }
 0x428   :  { %1335 = vmatpush.bf16.msra.mxu1 %v6250_v0 }
 0x42c   :  { %1336 = vmatpush.bf16.msra.mxu1 %v6249_v1 }
 0x42f   :  { %5201 = vmatmul.msk.bf16.vlgmr.msrb.gmra.mxu1 %vm933_vm2, %v900_v27 }
 0x49b   :  { %v946_v28 = vpop.f32.mrf.mxu0 }
 0x49c   :  { %v1078_v29 = vpop.f32.mrf.mxu1 }
 0x4a1   :  { %v995_v30 = vpop.f32.mrf.mxu2 }
 0x4a3   :  { %v948_v31 = vpop.f32.mrf.mxu0 }
 0x4a4   :  { %v952_v32 = vpack.c.bf16 %v948_v31, %v946_v28  ;;  %v1080_v33 = vpop.f32.mrf.mxu1  ;;  %v1451_v28 = vld [vmem:[#allocation15 + $0x3] sm:$0x1] }
 0x4a5   :  { %v1085_v34 = vpack.c.bf16 %v1080_v33, %v1078_v29  ;;  %v6259_v33 = vld [vmem:[#allocation16 + $0x70] sm:$0xff] }
 0x4a6   :  { %1030 = vmatpush.bf16.msrb.mxu0 %v952_v32  ;;  %v6260_v32 = vld [vmem:[#allocation16 + $0x78] sm:$0xff] }
 0x4a7   :  { %1096 = vmatpush.bf16.msra.mxu2 %v1085_v34  ;;  %v6258_v34 = vld [vmem:[#allocation16 + $0x68] sm:$0xff] }
 0x4a9   :  { %v997_v37 = vpop.f32.mrf.mxu2  ;;  %5148 = vmatmul.msk.bf16.vlgmr.msrb.gmra.mxu0 %vm1003_vm3, %v951_v35  ;;  %v6257_v35 = vld [vmem:[#allocation16 + $0x60] sm:$0xff] }
 0x4aa   :  { %v1002_v39 = vpack.c.bf16 %v997_v37, %v995_v30  ;;  %5166 = vmatmul.msk.bf16.vlgmr.msra.gmra.mxu2 %vm1003_vm3, %v1084_v36  ;;  %v6264_v36 = vld [vmem:[#allocation18 + $0x18] sm:$0xff]  ;;  %v6263_v37 = vld [vmem:[#allocation18 + $0x10] sm:$0xff] }
 0x4ac   :  { %v1212_v40 = vpop.f32.mrf.mxu1  ;;  %1014 = vmatpush.bf16.msrb.mxu3 %v1002_v39 }
 0x4af   :  { %5147 = vmatmul.msk.bf16.vlgmr.msrb.gmra.mxu3 %vm1003_vm3, %v1001_v41 }
 0x4b0   :  { %1140 = vmatpush.bf16.msra.mxu3 %v6240_v38 }
 0x4b4   :  { %1141 = vmatpush.bf16.msra.mxu3 %v6239_v42  ;;  %v1214_v44 = vpop.f32.mrf.mxu1 }
 0x4b5   :  { %v1219_v45 = vpack.c.bf16 %v1214_v44, %v1212_v40 }
 0x4b7   :  { %1230 = vmatpush.bf16.msrb.mxu2 %v1219_v45 }
 0x4b8   :  { %1142 = vmatpush.bf16.msra.mxu3 %v6238_v43 }
 0x4ba   :  { %5202 = vmatmul.msk.bf16.vlgmr.msrb.gmra.mxu2 %vm1003_vm3, %v1218_v47 }
 0x4bb   :  { %1373 = vmatpush.bf16.msra.mxu2 %v6248_v2  ;;  %v5302_v2 = vld [vmem:[#allocation19 + $0x10] sm:$0xf] }
 0x4bc   :  { %1143 = vmatpush.bf16.msra.mxu3 %v6237_v46 }
 0x4bf   :  { %5183 = vmatmul.msk.bf16.vlgmr.msra.gmra.mxu3 %vm933_vm2, %v900_v27  ;;  %1374 = vmatpush.bf16.msra.mxu2 %v6247_v6  ;;  %v5304_v6 = vld [vmem:[#allocation19 + $0x18] sm:$0xf0] }
 0x4c3   :  { %1375 = vmatpush.bf16.msra.mxu2 %v6246_v16 }
 0x4c7   :  { %1376 = vmatpush.bf16.msra.mxu2 %v6245_v17 }
 0x4cb   :  { %1508 = vmatpush.bf16.msrb.mxu2 %v6260_v32 }
 0x4cf   :  { %1509 = vmatpush.bf16.msrb.mxu2 %v6259_v33  ;;  %v6269_v33 = vld [vmem:[#allocation21] sm:$0xff] }
 0x4d3   :  { %1510 = vmatpush.bf16.msrb.mxu2 %v6258_v34 }
 0x4d7   :  { %1511 = vmatpush.bf16.msrb.mxu2 %v6257_v35 }
 0x526   :  { %v1032_v48 = vpop.f32.mrf.mxu0 }
 0x52d   :  { %v1098_v49 = vpop.f32.mrf.mxu2 }
 0x52e   :  { %v1034_v50 = vpop.f32.mrf.mxu0 }
 0x52f   :  { %v6261_v50 = vld [vmem:[#allocation18] sm:$0xff] }
 0x532   :  { %v1016_v51 = vpop.f32.mrf.mxu3 }
 0x533   :  { %v1033_v52 = vadd.f32 %v1032_v48, %v1016_v51  ;;  %v6522_v51 = vld [vmem:[%s8230_s3] ss:$0 sm:$0xff] }
 0x535   :  { %v1102_v53 = vadd.f32 %v1098_v49, %v1033_v52  ;;  %v1100_v54 = vpop.f32.mrf.mxu2  ;;  %v6262_v49 = vld [vmem:[#allocation18 + $0x8] sm:$0xff] }
 0x53a   :  { %v1018_v55 = vpop.f32.mrf.mxu3 }
 0x53d   :  { %v1232_v61 = vpop.f32.mrf.mxu2 }
 0x542   :  { %v1145_v56 = vpop.f32.mrf.mxu3 }
 0x545   :  { %v1234_v62 = vpop.f32.mrf.mxu2 }
 0x54a   :  { %v1147_v57 = vpop.f32.mrf.mxu3 }
 0x54b   :  { %v1152_v58 = vpack.c.bf16 %v1147_v57, %v1145_v56 }
 0x54d   :  { %1163 = vmatpush.bf16.msra.mxu0 %v1152_v58  ;;  %v1595_v58 = vld [vmem:[#allocation7] sm:$0x3] }
 0x54e   :  { %1596 = vst.msk [vmem:[#allocation2 + $0x2] sm:$0x3] %vm1577_vm6, %v1595_v58 }
 0x550   :  { %5184 = vmatmul.msk.bf16.vlgmr.msra.gmra.mxu0 %vm1003_vm3, %v1151_v59  ;;  %v6523_v59 = vld [vmem:[%s8231_s12] ss:$0 sm:$0xff] }
 0x5cd   :  { %v1165_v3 = vpop.f32.mrf.mxu0 }
 0x5ce   :  { %v1169_v4 = vadd.f32 %v1165_v3, %v1102_v53  ;;  %v6268_v3 = vld [vmem:[#allocation19 + $0x14] sm:$0xf0] }
 0x5d0   :  { %v1236_v7 = vadd.f32 %v1232_v61, %v1169_v4  ;;  %v6267_v4 = vld [vmem:[#allocation19 + $0x14] sm:$0xf] }
 0x5d2   :  { %v1241_v8 = vadd.f32 %v6521_v5, %v1236_v7  ;;  %v5303_v5 = vor.u32 %v6268_v3, %v5302_v2  ;;  %v5294_v7 = vld [vmem:[#allocation19] sm:$0xf] }
 0x5d4   :  { %v1242_v9 = vmax.f32 %v1241_v8, 0.0  ;;  %v6266_v8 = vld [vmem:[#allocation19 + $0x4] sm:$0xf0] }
 0x5d5   :  { %v1167_v10 = vpop.f32.mrf.mxu0 }
 0x5d6   :  { %v1243_v11 = vpack.c.bf16 %v1242_v9, %v1242_v9  ;;  %v5307_v9 = vor.u32 %v6267_v4, %v5304_v6  ;;  %v6265_v10 = vld [vmem:[#allocation19 + $0x4] sm:$0xf]  ;;  %v6294_v6 = vld [vmem:[#allocation24 + $0x78] sm:$0xff] }
 0x5d8   :  { %v1251_v12 = vsel %vm1249_vm4, %v1243_v11, 0  ;;  %v5296_v11 = vld [vmem:[#allocation19 + $0x8] sm:$0xf0] }
 0x5d9   :  { %1260 = vmatpush.bf16.msrb.mxu3 %v1251_v12  ;;  %1287 = vmatpush.bf16.msrb.mxu0 %v1251_v12 }
 0x5da   :  { %1462 = vmatpush.bf16.msrb.mxu1 %v1251_v12 }
 0x5dc   :  { %5203 = vmatmul.msk.bf16.vlgmr.msrb.gmra.mxu3 %vm1245_vm5, %v1244_v13  ;;  %5204 = vmatmul.msk.bf16.vlgmr.msrb.gmra.mxu0 %vm1245_vm5, %v1276_v14  ;;  %v5299_v13 = vor.u32 %v6265_v10, %v5296_v11  ;;  %v1584_v14 = vld [vmem:[#allocation4] sm:$0x3]  ;;  %v6291_v10 = vld [vmem:[#allocation24 + $0x60] sm:$0xff] }
 0x5dd   :  { %1394 = vmatpush.bf16.msra.mxu3 %v1251_v12  ;;  %1440 = vmatpush.bf16.msra.mxu0 %v6256_v18  ;;  %v5295_v12 = vor.u32 %v6266_v8, %v5294_v7  ;;  %v6293_v8 = vld [vmem:[#allocation24 + $0x70] sm:$0xff] }
 0x5e1   :  { %1441 = vmatpush.bf16.msra.mxu0 %v6255_v19  ;;  %1568 = vmatpush.bf16.msrb.mxu3 %v6264_v36  ;;  %v6271_v36 = vld [vmem:[#allocation21 + $0x10] sm:$0xff] }
 0x5e5   :  { %1442 = vmatpush.bf16.msra.mxu0 %v6254_v20  ;;  %1569 = vmatpush.bf16.msrb.mxu3 %v6263_v37  ;;  %v1603_v20 = vld [vmem:[%s8232_s10] sm:$0x3] }
 0x5e9   :  { %1443 = vmatpush.bf16.msra.mxu0 %v6253_v21  ;;  %1570 = vmatpush.bf16.msrb.mxu3 %v6262_v49  ;;  %v1605_v21 = vperm.slane %v1603_v20, 0  ;;  %v6280_v49 = vld [vmem:[#allocation24 + $0x28] sm:$0xff] }
 0x5ec   :  { %5239 = vmatmul.msk.bf16.vlgmr.msra.gmra.mxu3 %vm1245_vm5, %v1383_v15 }
 0x5ed   :  { %1571 = vmatpush.bf16.msrb.mxu3 %v6261_v50  ;;  %1638 = vmatpush.bf16.msrb.mxu0 %v5303_v5  ;;  %v6273_v50 = vld [vmem:[#allocation24] sm:$0xff] }
 0x5f1   :  { %1639 = vmatpush.bf16.msrb.mxu0 %v5295_v12 }
 0x659   :  { %v1289_v22 = vpop.f32.mrf.mxu0 }
 0x65a   :  { %v1293_v23 = vpack.c.bf16 %v1289_v22, %v1289_v22  ;;  %v1606_v22 = vperm.slane %v1603_v20, 1  ;;  %v6299_v20 = vld [vmem:[#allocation24 + $0x90] sm:$0xff] }
 0x65c   :  { %5221 = vmatmul.msk.bf16.vlgmr.msra.gmra.mxu1 %vm933_vm2, %v1293_v23 }
 0x65d   :  { %1651 = vmatpush.bf16.msra.mxu1 %v5307_v9  ;;  %v6292_v9 = vld [vmem:[#allocation24 + $0x68] sm:$0xff] }
 0x65f   :  { %v1262_v24 = vpop.f32.mrf.mxu3 }
 0x660   :  { %v1266_v25 = vpack.c.bf16 %v1262_v24, %v1262_v24 }
 0x661   :  { %v1291_v26 = vpop.f32.mrf.mxu0  ;;  %1652 = vmatpush.bf16.msra.mxu1 %v5299_v13 }
 0x662   :  { %5238 = vmatmul.msk.bf16.vlgmr.msra.gmra.mxu2 %vm933_vm2, %v1266_v25 }
 0x667   :  { %v1264_v27 = vpop.f32.mrf.mxu3 }
 0x66c   :  { %5257 = vmatmul.msk.bf16.vlgmr.msrb.gmra.mxu1 %vm1245_vm5, %v1451_v28 }
 0x66f   :  { %v1396_v29 = vpop.f32.mrf.mxu3 }
 0x670   :  { %v1400_v30 = vpack.c.bf16 %v1396_v29, %v1396_v29 }
 0x672   :  { %5256 = vmatmul.msk.bf16.vlgmr.msra.gmra.mxu0 %vm933_vm2, %v1400_v30 }
 0x677   :  { %v1398_v31 = vpop.f32.mrf.mxu3 }
 0x6d9   :  { %v1338_v38 = vpop.f32.mrf.mxu1 }
 0x6e1   :  { %v1340_v39 = vpop.f32.mrf.mxu1 }
 0x6e5   :  { %v1378_v40 = vpop.f32.mrf.mxu2 }
 0x6e6   :  { %v1379_v41 = vadd.f32 %v1378_v40, %v1338_v38 }
 0x6e9   :  { %v1464_v42 = vpop.f32.mrf.mxu1 }
 0x6ea   :  { %v1468_v43 = vpack.c.bf16 %v1464_v42, %v1464_v42  ;;  %v6272_v42 = vld [vmem:[#allocation21 + $0x18] sm:$0xff] }
 0x6ec   :  { %5274 = vmatmul.msk.bf16.vlgmr.msrb.gmra.mxu2 %vm933_vm2, %v1468_v43 }
 0x6ed   :  { %v1380_v44 = vpop.f32.mrf.mxu2 }
 0x6ee   :  { %v6276_v44 = vld [vmem:[#allocation24 + $0x18] sm:$0xff] }
 0x6ef   :  { %v1445_v45 = vpop.f32.mrf.mxu0 }
 0x6f0   :  { %v1449_v46 = vadd.f32 %v1445_v45, %v1379_v41  ;;  %v6270_v41 = vld [vmem:[#allocation21 + $0x8] sm:$0xff] }
 0x6f1   :  { %v1466_v47 = vpop.f32.mrf.mxu1  ;;  %v6282_v45 = vld [vmem:[#allocation24 + $0x38] sm:$0xff] }
 0x6f2   :  { %v6281_v47 = vld [vmem:[#allocation24 + $0x30] sm:$0xff] }
 0x6f7   :  { %v1447_v48 = vpop.f32.mrf.mxu0 }
 0x6f8   :  { %v6274_v48 = vld [vmem:[#allocation24 + $0x8] sm:$0xff] }
 0x76f   :  { %v1513_v52 = vpop.f32.mrf.mxu2 }
 0x770   :  { %v1517_v53 = vadd.f32 %v1513_v52, %v1449_v46  ;;  %v6275_v46 = vld [vmem:[#allocation24 + $0x10] sm:$0xff]  ;;  %v6288_v52 = vld [vmem:[#allocation24 + $0x58] sm:$0xff] }
 0x772   :  { %v1522_v54 = vadd.f32 %v6522_v51, %v1517_v53  ;;  %v6279_v51 = vld [vmem:[#allocation24 + $0x20] sm:$0xff]  ;;  %v6287_v53 = vld [vmem:[#allocation24 + $0x50] sm:$0xff] }
 0x774   :  { %v1523_v55 = vmax.f32 %v1522_v54, 0.0  ;;  %v6286_v54 = vld [vmem:[#allocation24 + $0x48] sm:$0xff] }
 0x776   :  { %v1532_v56 = vpack.c.bf16 %v1523_v55, %v1523_v55  ;;  %v6285_v55 = vld [vmem:[#allocation24 + $0x40] sm:$0xff] }
 0x777   :  { %v1515_v57 = vpop.f32.mrf.mxu2 }
 0x778   :  { %5291 = vmatmul.msk.bf16.vlgmr.msrb.gmra.mxu3 %vm933_vm2, %v1532_v56 }
 0x7fb   :  { %v1573_v60 = vpop.f32.mrf.mxu3 }
 0x7fc   :  { %v1574_v61 = vadd.f32 %v6523_v59, %v1573_v60 }
 0x7fe   :  { %v1585_v62 = vmul.f32 0.5, %v1574_v61  ;;  %1578 = vst.msk [vmem:[#allocation40] sm:$0x3] %vm1577_vm6, %v1574_v61 }
 0x800   :  { %v1586_v63 = vmul.f32 1.442695, %v1585_v62 }
 0x802   :  { %6531 = vpow2.f32 %v1586_v63 }
 0x803   :  { %v1575_v0 = vpop.f32.mrf.mxu3 }
 0x808   :  { %v6532_v1 = vpop.eup %6531 }
 0x809   :  { %1589 = vrot.lane.b32.xlu0 %v6532_v1, %s7284_s15 }
 0x87b   :  { %v1590_v15 = vpop.permute.xlu0 %1589 }
 0x87c   :  { %v1592_v16 = vmul.f32 %v1590_v15, %v1584_v14  ;;  %v6300_v15 = vld [vmem:[#allocation24 + $0x98] sm:$0xff] }
 0x87e   :  { %v1593_v17 = vadd.f32 %v1592_v16, %v1574_v61 }
 0x880   :  { %1594 = vst.msk [vmem:[#allocation2] sm:$0x3] %vm1577_vm6, %v1593_v17 }
 0x887   :  { %v1597_v18 = vld [vmem:[#allocation2] sm:$0xf] }
 0x888   :  { %v1602_v19 = vpack.c.bf16 %v1597_v18, %v1597_v18  ;;  %v6283_v18 = vld [vmem:[#allocation22 + $0x10] sm:$0xff] }
 0x88a   :  { %5308 = vmatmul.msk.bf16.vlgmr.msrb.gmra.mxu0 %vm633_vm1, %v1602_v19  ;;  %5309 = vmatmul.msk.bf16.vlgmr.msra.gmra.mxu1 %vm633_vm1, %v1602_v19  ;;  %v6277_v19 = vld [vmem:[#allocation22] sm:$0xff] }
 0x907   :  { %v1641_v23 = vpop.f32.mrf.mxu0  ;;  %v1654_v24 = vpop.f32.mrf.mxu1 }
 0x908   :  { %v1642_v25 = vadd.f32 %v1641_v23, %v1605_v21  ;;  %v1655_v26 = vadd.f32 %v1654_v24, %v1606_v22  ;;  %v6298_v22 = vld [vmem:[#allocation24 + $0x88] sm:$0xff]  ;;  %v6297_v23 = vld [vmem:[#allocation24 + $0x80] sm:$0xff] }
 0x90a   :  { %v1658_v27 = vmax.f32 %v1642_v25, 0.0  ;;  %v1659_v28 = vmax.f32 %v1655_v26, 0.0  ;;  %v6284_v26 = vld [vmem:[#allocation22 + $0x18] sm:$0xff] }
 0x90c   :  { %v1724_v29 = vpack.c.bf16 %v1659_v28, %v1659_v28  ;;  %v1662_v30 = vpack.c.bf16 %v1658_v27, %v1658_v27  ;;  %v6278_v27 = vld [vmem:[#allocation22 + $0x8] sm:$0xff]  ;;  %v6289_v28 = vld [vmem:[#allocation22 + $0x20] sm:$0xff] }
 0x90e   :  { %1761 = vrot.lane.b32.xlu1 %v1724_v29, %s7256_s18  ;;  %1672 = vrot.lane.b32.xlu0 %v1662_v30, %s7256_s18  ;;  %v1705_v31 = vsel %vm1678_vm7, %v1662_v30, 0  ;;  %v1734_v32 = vsel %vm1678_vm7, %v1724_v29, 0 }
 0x90f   :  { %v1643_v34 = vpop.f32.mrf.mxu0  ;;  %v1656_v35 = vpop.f32.mrf.mxu1  ;;  %1714 = vmatpush.bf16.msra.mxu3 %v1705_v31  ;;  %1743 = vmatpush.bf16.msra.mxu0 %v1734_v32  ;;  %v6295_v32 = vld [vmem:[#allocation22 + $0x30] sm:$0xff] }
 0x910   :  { %v6296_v34 = vld [vmem:[#allocation22 + $0x38] sm:$0xff] }
 0x912   :  { %5319 = vmatmul.msk.bf16.vlgmr.msra.gmra.mxu3 %vm1674_vm8, %v6269_v33  ;;  %5324 = vmatmul.msk.bf16.vlgmr.msra.gmra.mxu0 %vm1674_vm8, %v6271_v36  ;;  %v6290_v33 = vld [vmem:[#allocation22 + $0x28] sm:$0xff] }
 0x913   :  { %1877 = vmatpush.bf16.msrb.mxu3 %v6282_v45 }
 0x916   :  { %1580 = vrot.lane.b32.xlu0 %v1574_v61, %s7284_s15 }
 0x917   :  { %1878 = vmatpush.bf16.msrb.mxu3 %v6281_v47  ;;  %v6314_v47 = vld [vmem:[#allocation27 + $0x38] sm:$0xff] }
 0x91b   :  { %1879 = vmatpush.bf16.msrb.mxu3 %v6280_v49  ;;  %v6305_v49 = vld [vmem:[#allocation27 + $0x10] sm:$0xff] }
 0x91f   :  { %1880 = vmatpush.bf16.msrb.mxu3 %v6279_v51  ;;  %v6304_v51 = vld [vmem:[#allocation27 + $0x8] sm:$0xff] }
 0x980   :  { %v1762_v37 = vpop.permute.xlu1 %1761  ;;  %v1673_v38 = vpop.permute.xlu0 %1672 }
 0x981   :  { %v1767_v39 = vsel %vm1678_vm7, %v1762_v37, 0  ;;  %v1680_v40 = vsel %vm1678_vm7, %v1673_v38, 0 }
 0x982   :  { %1689 = vmatpush.bf16.msra.mxu2 %v1680_v40  ;;  %1776 = vmatpush.bf16.msrb.mxu1 %v1767_v39 }
 0x985   :  { %5314 = vmatmul.msk.bf16.vlgmr.msra.gmra.mxu2 %vm1674_vm8, %v6270_v41  ;;  %5329 = vmatmul.msk.bf16.vlgmr.msrb.gmra.mxu1 %vm1674_vm8, %v6272_v42  ;;  %v6301_v42 = vld [vmem:[#allocation22 + $0x40] sm:$0xff] }
 0x986   :  { %1825 = vmatpush.bf16.msrb.mxu2 %v6276_v44 }
 0x988   :  { %v1581_v43 = vpop.permute.xlu0 %1580 }
 0x989   :  { %1583 = vst.msk [vmem:[#allocation42] sm:$0x3] %vm1577_vm6, %v1581_v43  ;;  %v6302_v43 = vld [vmem:[#allocation22 + $0x48] sm:$0xff]  ;;  %vm4872_vm6 = vcmask 76800  }
 0x98a   :  { %1826 = vmatpush.bf16.msrb.mxu2 %v6275_v46  ;;  %v6306_v46 = vld [vmem:[#allocation27 + $0x18] sm:$0xff] }
 0x98e   :  { %1827 = vmatpush.bf16.msrb.mxu2 %v6274_v48 }
 0x98f   :  { %v1745_v57 = vpop.f32.mrf.mxu0 }
 0x992   :  { %1828 = vmatpush.bf16.msrb.mxu2 %v6273_v50  ;;  %v6313_v50 = vld [vmem:[#allocation27 + $0x30] sm:$0xff] }
 0x995   :  { %v1716_v56 = vpop.f32.mrf.mxu3 }
 0x996   :  { %2000 = vmatpush.bf16.msra.mxu2 %v6288_v52  ;;  %v6312_v52 = vld [vmem:[#allocation27 + $0x28] sm:$0xff] }
 0x997   :  { %v1747_v1 = vpop.f32.mrf.mxu0 }
 0x99a   :  { %2001 = vmatpush.bf16.msra.mxu2 %v6287_v53 }
 0x99d   :  { %v1718_v61 = vpop.f32.mrf.mxu3 }
 0x99e   :  { %2002 = vmatpush.bf16.msra.mxu2 %v6286_v54  ;;  %v6303_v54 = vld [vmem:[#allocation27] sm:$0xff] }
 0x9a2   :  { %2003 = vmatpush.bf16.msra.mxu2 %v6285_v55  ;;  %v6311_v55 = vld [vmem:[#allocation27 + $0x20] sm:$0xff] }
 0xa02   :  { %v1778_v59 = vpop.f32.mrf.mxu1 }
 0xa08   :  { %v1691_v58 = vpop.f32.mrf.mxu2 }
 0xa09   :  { %v1717_v60 = vadd.f32 %v1716_v56, %v1691_v58 }
 0xa0a   :  { %v1780_v3 = vpop.f32.mrf.mxu1 }
 0xa0b   :  { %v1750_v63 = vadd.f32 %v1745_v57, %v1717_v60 }
 0xa0d   :  { %v1783_v4 = vadd.f32 %v1778_v59, %v1750_v63  ;;  %v6322_v63 = vld [vmem:[#allocation27 + $0x58] sm:$0xff] }
 0xa10   :  { %v1693_v62 = vpop.f32.mrf.mxu2 }
 0xa11   :  { %v1719_v0 = vadd.f32 %v1718_v61, %v1693_v62 }
 0xa13   :  { %v1751_v2 = vadd.f32 %v1747_v1, %v1719_v0 }
 0xa15   :  { %v1784_v5 = vadd.f32 %v1780_v3, %v1751_v2  ;;  %v6321_v2 = vld [vmem:[#allocation27 + $0x50] sm:$0xff] }
 0xa17   :  { %v1785_v7 = vpack.c.bf16 %v1784_v5, %v1783_v4  ;;  %v6524_v5 = vld [vmem:[%s8233_s17] ss:$0 sm:$0xff] }
 0xa19   :  { %5346 = vmatmul.msk.bf16.vlgmr.msrb.gmra.mxu2 %vm933_vm2, %v1785_v7  ;;  %5363 = vmatmul.msk.bf16.vlgmr.msrb.gmra.mxu3 %vm933_vm2, %v1785_v7 }
 0xa1a   :  { %2092 = vmatpush.bf16.msrb.mxu2 %v6294_v6 }
 0xa1e   :  { %2093 = vmatpush.bf16.msrb.mxu2 %v6293_v8 }
 0xa22   :  { %2094 = vmatpush.bf16.msrb.mxu2 %v6292_v9 }
 0xa26   :  { %2095 = vmatpush.bf16.msrb.mxu2 %v6291_v10 }
 0xa29   :  { %5400 = vmatmul.msk.bf16.vlgmr.msra.gmra.mxu2 %vm933_vm2, %v1785_v7 }
 0xa39   :  { %5427 = vmatmul.msk.bf16.vlgmr.msrb.gmra.mxu2 %vm933_vm2, %v1785_v7 }
 0xa9c   :  { %v1830_v11 = vpop.f32.mrf.mxu2  ;;  %v1882_v12 = vpop.f32.mrf.mxu3 }
 0xaa4   :  { %v1832_v13 = vpop.f32.mrf.mxu2  ;;  %v1884_v14 = vpop.f32.mrf.mxu3 }
 0xaa5   :  { %v1839_v16 = vpack.c.bf16 %v1832_v13, %v1830_v11  ;;  %v1892_v17 = vpack.c.bf16 %v1884_v14, %v1882_v12  ;;  %v6319_v14 = vld [vmem:[#allocation27 + $0x40] sm:$0xff] }
 0xaa7   :  { %1916 = vmatpush.bf16.msrb.mxu0 %v1892_v17  ;;  %1951 = vmatpush.bf16.msra.mxu1 %v1839_v16 }
 0xaaa   :  { %5372 = vmatmul.msk.bf16.vlgmr.msrb.gmra.mxu0 %vm1003_vm3, %v6283_v18  ;;  %5382 = vmatmul.msk.bf16.vlgmr.msra.gmra.mxu1 %vm1003_vm3, %v6277_v19 }
 0xaab   :  { %2184 = vmatpush.bf16.msrb.mxu1 %v6300_v15 }
 0xaac   :  { %v2005_v21 = vpop.f32.mrf.mxu2 }
 0xaaf   :  { %2185 = vmatpush.bf16.msrb.mxu1 %v6299_v20 }
 0xab3   :  { %2186 = vmatpush.bf16.msrb.mxu1 %v6298_v22 }
 0xab4   :  { %v2007_v24 = vpop.f32.mrf.mxu2 }
 0xab5   :  { %v2015_v25 = vpack.c.bf16 %v2007_v24, %v2005_v21 }
 0xab7   :  { %2187 = vmatpush.bf16.msrb.mxu1 %v6297_v23  ;;  %2039 = vmatpush.bf16.msra.mxu3 %v2015_v25 }
 0xaba   :  { %5373 = vmatmul.msk.bf16.gmra.mxu0 %vm1003_vm3, %v6284_v26  ;;  %5383 = vmatmul.msk.bf16.gmra.mxu1 %vm1003_vm3, %v6278_v27 }
 0xabb   :  { %5409 = vmatmul.msk.bf16.vlgmr.msra.gmra.mxu3 %vm1003_vm3, %v6289_v28  ;;  %2357 = vmatpush.bf16.msra.mxu1 %v6314_v47 }
 0xabc   :  { %v2097_v29 = vpop.f32.mrf.mxu2  ;;  %2295 = vmatpush.bf16.msrb.mxu3 %v6306_v46 }
 0xabf   :  { %2358 = vmatpush.bf16.msra.mxu1 %v6313_v50 }
 0xac0   :  { %2296 = vmatpush.bf16.msrb.mxu3 %v6305_v49  ;;  %v6315_v49 = vld [vmem:[#allocation25 + $0x20] sm:$0xff] }
 0xac3   :  { %2359 = vmatpush.bf16.msra.mxu1 %v6312_v52  ;;  %v6307_v52 = vld [vmem:[#allocation25] sm:$0xff] }
 0xac4   :  { %v2099_v30 = vpop.f32.mrf.mxu2  ;;  %2297 = vmatpush.bf16.msrb.mxu3 %v6304_v51 }
 0xac5   :  { %v2107_v31 = vpack.c.bf16 %v2099_v30, %v2097_v29 }
 0xac7   :  { %2131 = vmatpush.bf16.msra.mxu0 %v2107_v31  ;;  %2360 = vmatpush.bf16.msra.mxu1 %v6311_v55  ;;  %v6316_v55 = vld [vmem:[#allocation25 + $0x28] sm:$0xff] }
 0xac8   :  { %2298 = vmatpush.bf16.msrb.mxu3 %v6303_v54 }
 0xaca   :  { %5436 = vmatmul.msk.bf16.vlgmr.msra.gmra.mxu0 %vm1003_vm3, %v6295_v32  ;;  %5454 = vmatmul.msk.bf16.vlgmr.msrb.gmra.mxu1 %vm933_vm2, %v1785_v7  ;;  %v6320_v7 = vld [vmem:[#allocation27 + $0x48] sm:$0xff] }
 0xacb   :  { %5410 = vmatmul.msk.bf16.gmra.mxu3 %vm1003_vm3, %v6290_v33 }
 0xacc   :  { %2542 = vmatpush.bf16.msra.mxu3 %v6322_v63  ;;  %v6336_v63 = vld [vmem:[#allocation27 + $0x88] sm:$0xff] }
 0xad0   :  { %2543 = vmatpush.bf16.msra.mxu3 %v6321_v2  ;;  %v6323_v2 = vld [vmem:[#allocation25 + $0x40] sm:$0xff] }
 0xad4   :  { %2544 = vmatpush.bf16.msra.mxu3 %v6320_v7  ;;  %v6310_v7 = vld [vmem:[#allocation25 + $0x18] sm:$0xff] }
 0xad8   :  { %2545 = vmatpush.bf16.msra.mxu3 %v6319_v14  ;;  %v6331_v14 = vld [vmem:[#allocation25 + $0x60] sm:$0xff] }
 0xada   :  { %5437 = vmatmul.msk.bf16.gmra.mxu0 %vm1003_vm3, %v6296_v34 }
 0xb27   :  { %v1953_v35 = vpop.f32.mrf.mxu1  ;;  %v1918_v44 = vpop.f32.mrf.mxu0 }
 0xb28   :  { %v1954_v59 = vadd.f32 %v1953_v35, %v1918_v44  ;;  %v6330_v35 = vld [vmem:[#allocation27 + $0x78] sm:$0xff] }
 0xb2f   :  { %v1955_v36 = vpop.f32.mrf.mxu1  ;;  %v1920_v45 = vpop.f32.mrf.mxu0 }
 0xb30   :  { %v1956_v0 = vadd.f32 %v1955_v36, %v1920_v45  ;;  %v6329_v36 = vld [vmem:[#allocation27 + $0x70] sm:$0xff] }
 0xb37   :  { %v1958_v37 = vpop.f32.mrf.mxu1  ;;  %v1923_v48 = vpop.f32.mrf.mxu0 }
 0xb38   :  { %v1959_v17 = vadd.f32 %v1958_v37, %v1923_v48  ;;  %v6328_v37 = vld [vmem:[#allocation27 + $0x68] sm:$0xff] }
 0xb3e   :  { %v2041_v56 = vpop.f32.mrf.mxu3 }
 0xb3f   :  { %v7774_v38 = vpop.f32.mrf.mxu1  ;;  %v1925_v53 = vpop.f32.mrf.mxu0  ;;  %v2051_v62 = vadd.f32 %v2041_v56, %v1954_v59  ;;  %v6308_v56 = vld [vmem:[#allocation25 + $0x8] sm:$0xff]  ;;  %v6337_v59 = vld [vmem:[#allocation27 + $0x90] sm:$0xff] }
 0xb40   :  { %v1961_v22 = vadd.f32 %v7774_v38, %v1925_v53  ;;  %v6327_v38 = vld [vmem:[#allocation27 + $0x60] sm:$0xff] }
 0xb46   :  { %v2043_v58 = vpop.f32.mrf.mxu3 }
 0xb47   :  { %v2189_v39 = vpop.f32.mrf.mxu1  ;;  %v2133_v57 = vpop.f32.mrf.mxu0  ;;  %v2052_v3 = vadd.f32 %v2043_v58, %v1956_v0  ;;  %v6338_v58 = vld [vmem:[#allocation27 + $0x98] sm:$0xff] }
 0xb48   :  { %v2143_v1 = vadd.f32 %v2133_v57, %v2051_v62 }
 0xb4e   :  { %v2046_v8 = vpop.f32.mrf.mxu3 }
 0xb4f   :  { %v2191_v40 = vpop.f32.mrf.mxu1  ;;  %v2135_v60 = vpop.f32.mrf.mxu0  ;;  %v2053_v20 = vadd.f32 %v2046_v8, %v1959_v17  ;;  %v6324_v8 = vld [vmem:[#allocation25 + $0x48] sm:$0xff]  ;;  %v6333_v17 = vld [vmem:[#allocation25 + $0x70] sm:$0xff] }
 0xb50   :  { %v2199_v41 = vpack.c.bf16 %v2191_v40, %v2189_v39  ;;  %v2144_v6 = vadd.f32 %v2135_v60, %v2052_v3  ;;  %v6335_v3 = vld [vmem:[#allocation27 + $0x80] sm:$0xff] }
 0xb52   :  { %2223 = vmatpush.bf16.msra.mxu2 %v2199_v41 }
 0xb55   :  { %5463 = vmatmul.msk.bf16.vlgmr.msra.gmra.mxu2 %vm1003_vm3, %v6301_v42 }
 0xb56   :  { %v2048_v21 = vpop.f32.mrf.mxu3 }
 0xb57   :  { %v2138_v12 = vpop.f32.mrf.mxu0  ;;  %v2054_v25 = vadd.f32 %v2048_v21, %v1961_v22 }
 0xb58   :  { %v2145_v23 = vadd.f32 %v2138_v12, %v2053_v20 }
 0xb5f   :  { %v2140_v24 = vpop.f32.mrf.mxu0 }
 0xb60   :  { %v2146_v27 = vadd.f32 %v2140_v24, %v2054_v25 }
 0xb65   :  { %5464 = vmatmul.msk.bf16.gmra.mxu2 %vm1003_vm3, %v6302_v43 }
 0xbd8   :  { %v2225_v61 = vpop.f32.mrf.mxu2 }
 0xbd9   :  { %v2235_v4 = vadd.f32 %v2225_v61, %v2143_v1  ;;  %v6317_v61 = vld [vmem:[#allocation25 + $0x30] sm:$0xff] }
 0xbda   :  { %v6309_v1 = vld [vmem:[#allocation25 + $0x10] sm:$0xff] }
 0xbdb   :  { %v2243_v10 = vadd.f32 %v6524_v5, %v2235_v4 }
 0xbdd   :  { %v2247_v15 = vmax.f32 %v2243_v10, 0.0 }
 0xbe0   :  { %v2227_v9 = vpop.f32.mrf.mxu2 }
 0xbe1   :  { %v2236_v11 = vadd.f32 %v2227_v9, %v2144_v6  ;;  %v6318_v6 = vld [vmem:[#allocation25 + $0x38] sm:$0xff] }
 0xbe3   :  { %v2244_v13 = vadd.f32 %v6524_v5, %v2236_v11 }
 0xbe5   :  { %v2248_v16 = vmax.f32 %v2244_v13, 0.0  ;;  %v6325_v13 = vld [vmem:[#allocation25 + $0x50] sm:$0xff] }
 0xbe7   :  { %v7779_v18 = vpack.c.bf16 %v2248_v16, %v2247_v15  ;;  %v6326_v15 = vld [vmem:[#allocation25 + $0x58] sm:$0xff]  ;;  %v6332_v16 = vld [vmem:[#allocation25 + $0x68] sm:$0xff] }
 0xbe8   :  { %v2230_v19 = vpop.f32.mrf.mxu2 }
 0xbe9   :  { %5481 = vmatmul.msk.bf16.vlgmr.msrb.gmra.mxu3 %vm933_vm2, %v7779_v18  ;;  %5499 = vmatmul.msk.bf16.vlgmr.msra.gmra.mxu1 %vm933_vm2, %v7779_v18  ;;  %v2237_v26 = vadd.f32 %v2230_v19, %v2145_v23  ;;  %v6334_v19 = vld [vmem:[#allocation25 + $0x78] sm:$0xff] }
 0xbea   :  { %2674 = vmatpush.bf16.msrb.mxu3 %v6330_v35  ;;  %v6341_v35 = vld [vmem:[#allocation25 + $0x90] sm:$0xff] }
 0xbeb   :  { %v2245_v29 = vadd.f32 %v6524_v5, %v2237_v26 }
 0xbed   :  { %v2249_v32 = vmax.f32 %v2245_v29, 0.0 }
 0xbee   :  { %2675 = vmatpush.bf16.msrb.mxu3 %v6329_v36 }
 0xbf0   :  { %v2232_v28 = vpop.f32.mrf.mxu2 }
 0xbf1   :  { %v2238_v30 = vadd.f32 %v2232_v28, %v2146_v27 }
 0xbf2   :  { %2676 = vmatpush.bf16.msrb.mxu3 %v6328_v37 }
 0xbf3   :  { %v2246_v31 = vadd.f32 %v6524_v5, %v2238_v30 }
 0xbf5   :  { %v2250_v33 = vmax.f32 %v2246_v31, 0.0 }
 0xbf6   :  { %2677 = vmatpush.bf16.msrb.mxu3 %v6327_v38  ;;  %v6342_v38 = vld [vmem:[#allocation25 + $0x98] sm:$0xff] }
 0xbf7   :  { %v7786_v34 = vpack.c.bf16 %v2250_v33, %v2249_v32  ;;  %v6339_v33 = vld [vmem:[#allocation25 + $0x80] sm:$0xff] }
 0xbf9   :  { %5482 = vmatmul.msk.bf16.gmra.mxu3 %vm933_vm2, %v7786_v34  ;;  %5500 = vmatmul.msk.bf16.gmra.mxu1 %vm933_vm2, %v7786_v34 }
 0xc09   :  { %5557 = vmatmul.msk.bf16.vlgmr.msra.gmra.mxu3 %vm933_vm2, %v7779_v18 }
 0xc19   :  { %5558 = vmatmul.msk.bf16.gmra.mxu3 %vm933_vm2, %v7786_v34 }
 0xc29   :  { %5595 = vmatmul.msk.bf16.vlgmr.msrb.gmra.mxu3 %vm933_vm2, %v7779_v18 }
 0xc39   :  { %5596 = vmatmul.msk.bf16.gmra.mxu3 %vm933_vm2, %v7786_v34 }
 0xc66   :  { %v2362_v39 = vpop.f32.mrf.mxu1 }
 0xc6c   :  { %v2300_v40 = vpop.f32.mrf.mxu3 }
 0xc6e   :  { %v2364_v41 = vpop.f32.mrf.mxu1 }
 0xc6f   :  { %v2381_v47 = vpack.c.bf16 %v2364_v41, %v2362_v39 }
 0xc74   :  { %v2302_v42 = vpop.f32.mrf.mxu3 }
 0xc75   :  { %v2318_v51 = vpack.c.bf16 %v2302_v42, %v2300_v40 }
 0xc76   :  { %v2367_v43 = vpop.f32.mrf.mxu1 }
 0xc7c   :  { %v2305_v44 = vpop.f32.mrf.mxu3 }
 0xc7e   :  { %v2369_v45 = vpop.f32.mrf.mxu1 }
 0xc7f   :  { %v2382_v46 = vpack.c.bf16 %v2369_v45, %v2367_v43 }
 0xc81   :  { %2421 = vmatpush.bf16.msrb.mxu0 %v2382_v46 }
 0xc84   :  { %v2307_v48 = vpop.f32.mrf.mxu3 }
 0xc85   :  { %v2319_v50 = vpack.c.bf16 %v2307_v48, %v2305_v44  ;;  %2422 = vmatpush.bf16.msrb.mxu0 %v2381_v47  ;;  %v6351_v47 = vld [vmem:[#allocation30 + $0x10] sm:$0xff]  ;;  %v6357_v48 = vld [vmem:[#allocation30 + $0x28] sm:$0xff] }
 0xc87   :  { %2482 = vmatpush.bf16.msrb.mxu2 %v2319_v50  ;;  %v6350_v50 = vld [vmem:[#allocation30 + $0x8] sm:$0xff] }
 0xc88   :  { %5517 = vmatmul.msk.bf16.vlgmr.msrb.gmra.mxu0 %vm633_vm1, %v6315_v49 }
 0xc8b   :  { %2483 = vmatpush.bf16.msrb.mxu2 %v2318_v51  ;;  %v6356_v51 = vld [vmem:[#allocation30 + $0x20] sm:$0xff] }
 0xc8c   :  { %v2547_v53 = vpop.f32.mrf.mxu3 }
 0xc8e   :  { %5537 = vmatmul.msk.bf16.vlgmr.msrb.gmra.mxu2 %vm633_vm1, %v6307_v52 }
 0xc8f   :  { %2806 = vmatpush.bf16.msra.mxu2 %v6338_v58  ;;  %v7845_v58 = vld [vmem:[%s8234_s13] ss:$0 sm:$0xff] }
 0xc93   :  { %2807 = vmatpush.bf16.msra.mxu2 %v6337_v59 }
 0xc94   :  { %v2549_v54 = vpop.f32.mrf.mxu3 }
 0xc95   :  { %v2566_v0 = vpack.c.bf16 %v2549_v54, %v2547_v53  ;;  %v6349_v53 = vld [vmem:[#allocation30] sm:$0xff]  ;;  %v6355_v54 = vld [vmem:[#allocation30 + $0x18] sm:$0xff] }
 0xc97   :  { %2808 = vmatpush.bf16.msra.mxu2 %v6336_v63 }
 0xc98   :  { %5518 = vmatmul.msk.bf16.gmra.mxu0 %vm633_vm1, %v6316_v55 }
 0xc9b   :  { %2809 = vmatpush.bf16.msra.mxu2 %v6335_v3 }
 0xc9c   :  { %v2552_v57 = vpop.f32.mrf.mxu3 }
 0xc9e   :  { %5538 = vmatmul.msk.bf16.gmra.mxu2 %vm633_vm1, %v6308_v56 }
 0xc9f   :  { %3111 = vmatpush.bf16.msrb.mxu2 %v6357_v48 }
 0xca3   :  { %3112 = vmatpush.bf16.msrb.mxu2 %v6356_v51 }
 0xca4   :  { %v2554_v60 = vpop.f32.mrf.mxu3 }
 0xca5   :  { %v2567_v62 = vpack.c.bf16 %v2554_v60, %v2552_v57 }
 0xca7   :  { %2606 = vmatpush.bf16.msrb.mxu1 %v2567_v62  ;;  %3113 = vmatpush.bf16.msrb.mxu2 %v6355_v54 }
 0xca8   :  { %5519 = vmatmul.msk.bf16.gmra.mxu0 %vm633_vm1, %v6317_v61 }
 0xcab   :  { %2607 = vmatpush.bf16.msrb.mxu1 %v2566_v0 }
 0xcac   :  { %v2679_v4 = vpop.f32.mrf.mxu3 }
 0xcae   :  { %5539 = vmatmul.msk.bf16.gmra.mxu2 %vm633_vm1, %v6309_v1  ;;  %5575 = vmatmul.msk.bf16.vlgmr.msrb.gmra.mxu1 %vm633_vm1, %v6323_v2 }
 0xcaf   :  { %3035 = vmatpush.bf16.msra.mxu1 %v6351_v47 }
 0xcb3   :  { %3036 = vmatpush.bf16.msra.mxu1 %v6350_v50  ;;  %v514_v50 = vld [vmem:[%s8227_s22 + $0xc] sm:$0xf] }
 0xcb4   :  { %v2681_v5 = vpop.f32.mrf.mxu3  ;;  %2937 = vst.msk [vmem:[#allocation3 + $0x1c] sm:$0xf] %vm2929_vm9, %v514_v50 }
 0xcb5   :  { %v2698_v12 = vpack.c.bf16 %v2681_v5, %v2679_v4 }
 0xcb7   :  { %3037 = vmatpush.bf16.msra.mxu1 %v6349_v53 }
 0xcb8   :  { %5520 = vmatmul.msk.bf16.gmra.mxu0 %vm633_vm1, %v6318_v6 }
 0xcbc   :  { %v2684_v9 = vpop.f32.mrf.mxu3 }
 0xcbe   :  { %5540 = vmatmul.msk.bf16.gmra.mxu2 %vm633_vm1, %v6310_v7  ;;  %5576 = vmatmul.msk.bf16.gmra.mxu1 %vm633_vm1, %v6324_v8 }
 0xcc4   :  { %v2686_v10 = vpop.f32.mrf.mxu3 }
 0xcc5   :  { %v2699_v11 = vpack.c.bf16 %v2686_v10, %v2684_v9 }
 0xcc7   :  { %2738 = vmatpush.bf16.msra.mxu0 %v2699_v11 }
 0xccb   :  { %2739 = vmatpush.bf16.msra.mxu0 %v2698_v12 }
 0xcce   :  { %5577 = vmatmul.msk.bf16.gmra.mxu1 %vm633_vm1, %v6325_v13  ;;  %5613 = vmatmul.msk.bf16.vlgmr.msra.gmra.mxu0 %vm633_vm1, %v6331_v14 }
 0xccf   :  { %5633 = vmatmul.msk.bf16.vlgmr.msra.gmra.mxu2 %vm933_vm2, %v7779_v18 }
 0xcde   :  { %5578 = vmatmul.msk.bf16.gmra.mxu1 %vm633_vm1, %v6326_v15  ;;  %5614 = vmatmul.msk.bf16.gmra.mxu0 %vm633_vm1, %v6332_v16 }
 0xcdf   :  { %5634 = vmatmul.msk.bf16.gmra.mxu2 %vm933_vm2, %v7786_v34  ;;  %v6340_v34 = vld [vmem:[#allocation25 + $0x88] sm:$0xff] }
 0xcee   :  { %5615 = vmatmul.msk.bf16.gmra.mxu0 %vm633_vm1, %v6333_v17 }
 0xcfe   :  { %5616 = vmatmul.msk.bf16.gmra.mxu0 %vm633_vm1, %v6334_v19 }
 0xd05   :  { %v2424_v36 = vpop.f32.mrf.mxu0 }
 0xd0d   :  { %v2426_v37 = vpop.f32.mrf.mxu0 }
 0xd11   :  { %v2485_v20 = vpop.f32.mrf.mxu2 }
 0xd12   :  { %v2486_v55 = vadd.f32 %v2485_v20, %v2424_v36 }
 0xd15   :  { %v2429_v39 = vpop.f32.mrf.mxu0 }
 0xd19   :  { %v2487_v21 = vpop.f32.mrf.mxu2 }
 0xd1a   :  { %v2488_v63 = vadd.f32 %v2487_v21, %v2426_v37 }
 0xd1d   :  { %v2431_v40 = vpop.f32.mrf.mxu0 }
 0xd21   :  { %v7820_v22 = vpop.f32.mrf.mxu2 }
 0xd22   :  { %v2491_v7 = vadd.f32 %v7820_v22, %v2429_v39  ;;  %v511_v22 = vld [vmem:[%s8227_s22] sm:$0xf] }
 0xd23   :  { %2934 = vst.msk [vmem:[#allocation3 + $0x10] sm:$0xf] %vm2929_vm9, %v511_v22 }
 0xd25   :  { %v7836_v41 = vpop.f32.mrf.mxu0 }
 0xd29   :  { %v7822_v18 = vpop.f32.mrf.mxu2 }
 0xd2a   :  { %v2493_v16 = vadd.f32 %v7822_v18, %v2431_v40 }
 0xd2b   :  { %v2609_v45 = vpop.f32.mrf.mxu1 }
 0xd2c   :  { %v2629_v56 = vadd.f32 %v2609_v45, %v2486_v55 }
 0xd2d   :  { %v7838_v42 = vpop.f32.mrf.mxu0 }
 0xd31   :  { %v7824_v23 = vpop.f32.mrf.mxu2 }
 0xd32   :  { %v2496_v18 = vadd.f32 %v7824_v23, %v7836_v41 }
 0xd33   :  { %v2611_v49 = vpop.f32.mrf.mxu1 }
 0xd34   :  { %v2630_v1 = vadd.f32 %v2611_v49, %v2488_v63  ;;  %v513_v49 = vld [vmem:[%s8227_s22 + $0x8] sm:$0xf] }
 0xd35   :  { %v7840_v43 = vpop.f32.mrf.mxu0  ;;  %2936 = vst.msk [vmem:[#allocation3 + $0x18] sm:$0xf] %vm2929_vm9, %v513_v49 }
 0xd39   :  { %v7826_v24 = vpop.f32.mrf.mxu2 }
 0xd3a   :  { %v2498_v45 = vadd.f32 %v7826_v24, %v7838_v42 }
 0xd3b   :  { %v2614_v59 = vpop.f32.mrf.mxu1 }
 0xd3c   :  { %v2631_v11 = vadd.f32 %v2614_v59, %v2491_v7 }
 0xd3d   :  { %v7842_v44 = vpop.f32.mrf.mxu0 }
 0xd41   :  { %v7828_v25 = vpop.f32.mrf.mxu2 }
 0xd42   :  { %v2501_v42 = vadd.f32 %v7828_v25, %v7840_v43 }
 0xd43   :  { %v2616_v5 = vpop.f32.mrf.mxu1 }
 0xd44   :  { %v2632_v21 = vadd.f32 %v2616_v5, %v2493_v16 }
 0xd49   :  { %v7830_v26 = vpop.f32.mrf.mxu2 }
 0xd4b   :  { %v2741_v46 = vpop.f32.mrf.mxu0  ;;  %v2619_v19 = vpop.f32.mrf.mxu1 }
 0xd4c   :  { %v2761_v57 = vadd.f32 %v2741_v46, %v2629_v56 }
 0xd52   :  { %v2811_v27 = vpop.f32.mrf.mxu2 }
 0xd53   :  { %v2743_v52 = vpop.f32.mrf.mxu0  ;;  %v2621_v37 = vpop.f32.mrf.mxu1 }
 0xd54   :  { %v2762_v2 = vadd.f32 %v2743_v52, %v2630_v1  ;;  %v2634_v48 = vadd.f32 %v2621_v37, %v2498_v45 }
 0xd5a   :  { %v2813_v28 = vpop.f32.mrf.mxu2 }
 0xd5b   :  { %v2830_v32 = vpack.c.bf16 %v2813_v28, %v2811_v27  ;;  %v2746_v62 = vpop.f32.mrf.mxu0  ;;  %v512_v27 = vld [vmem:[%s8227_s22 + $0x4] sm:$0xf]  ;;  %v2624_v52 = vpop.f32.mrf.mxu1 }
 0xd5c   :  { %v2763_v12 = vadd.f32 %v2746_v62, %v2631_v11  ;;  %2935 = vst.msk [vmem:[#allocation3 + $0x14] sm:$0xf] %vm2929_vm9, %v512_v27  ;;  %v2635_v59 = vadd.f32 %v2624_v52, %v2501_v42  ;;  %v6369_v42 = vld [vmem:[#allocation30 + $0x58] sm:$0xff] }
 0xd62   :  { %v2816_v29 = vpop.f32.mrf.mxu2 }
 0xd63   :  { %v2748_v9 = vpop.f32.mrf.mxu0  ;;  %v2626_v62 = vpop.f32.mrf.mxu1 }
 0xd6a   :  { %v2818_v30 = vpop.f32.mrf.mxu2 }
 0xd6b   :  { %v2831_v31 = vpack.c.bf16 %v2818_v30, %v2816_v29  ;;  %v2751_v28 = vpop.f32.mrf.mxu0  ;;  %v2764_v29 = vadd.f32 %v2748_v9, %v2632_v21 }
 0xd6d   :  { %2870 = vmatpush.bf16.msra.mxu3 %v2831_v31 }
 0xd71   :  { %2871 = vmatpush.bf16.msra.mxu3 %v2830_v32 }
 0xd73   :  { %v2753_v23 = vpop.f32.mrf.mxu0 }
 0xd74   :  { %5651 = vmatmul.msk.bf16.vlgmr.msra.gmra.mxu3 %vm633_vm1, %v6339_v33  ;;  %v2766_v51 = vadd.f32 %v2753_v23, %v2634_v48 }
 0xd7b   :  { %v2756_v55 = vpop.f32.mrf.mxu0 }
 0xd84   :  { %5652 = vmatmul.msk.bf16.gmra.mxu3 %vm633_vm1, %v6340_v34 }
 0xd94   :  { %5653 = vmatmul.msk.bf16.gmra.mxu3 %vm633_vm1, %v6341_v35  ;;  %v2633_v35 = vadd.f32 %v2619_v19, %v2496_v18 }
 0xda4   :  { %5654 = vmatmul.msk.bf16.gmra.mxu3 %vm633_vm1, %v6342_v38  ;;  %v2765_v38 = vadd.f32 %v2751_v28, %v2633_v35 }
 0xdf7   :  { %v2873_v60 = vpop.f32.mrf.mxu3 }
 0xdf8   :  { %v2893_v61 = vadd.f32 %v2873_v60, %v2761_v57 }
 0xdfa   :  { %v2905_v0 = vadd.f32 %v7845_v58, %v2893_v61  ;;  %v2767_v61 = vadd.f32 %v2756_v55, %v2635_v59  ;;  %v6352_v55 = vld [vmem:[#allocation28] sm:$0xff]  ;;  %v6368_v59 = vld [vmem:[#allocation30 + $0x50] sm:$0xff] }
 0xdfc   :  { %6533 = vtanh.f32 %v2905_v0  ;;  %v2503_v0 = vadd.f32 %v7830_v26, %v7842_v44 }
 0xdff   :  { %v2875_v3 = vpop.f32.mrf.mxu3 }
 0xe00   :  { %v2894_v4 = vadd.f32 %v2875_v3, %v2762_v2  ;;  %v2758_v2 = vpop.f32.mrf.mxu0 }
 0xe02   :  { %v6534_v6 = vpop.eup %6533  ;;  %v2906_v8 = vadd.f32 %v7845_v58, %v2894_v4  ;;  %v2636_v4 = vadd.f32 %v2626_v62, %v2503_v0  ;;  %v6353_v62 = vld [vmem:[#allocation28 + $0x8] sm:$0xff]  ;;  %v6359_v0 = vld [vmem:[#allocation28 + $0x20] sm:$0xff] }
 0xe03   :  { %v2925_v10 = vpack.c.bf16 %v6534_v6, %v6534_v6 }
 0xe04   :  { %6535 = vtanh.f32 %v2906_v8  ;;  %v2768_v5 = vadd.f32 %v2758_v2, %v2636_v4  ;;  %v6360_v2 = vld [vmem:[#allocation28 + $0x28] sm:$0xff] }
 0xe05   :  { %2930 = vst.msk [vmem:[#allocation3] sm:$0xf] %vm2929_vm9, %v2925_v10  ;;  %v7895_v10 = vld [vmem:[#allocation3 + $0x10] sm:$0xff] }
 0xe07   :  { %v2878_v13 = vpop.f32.mrf.mxu3 }
 0xe08   :  { %v2895_v14 = vadd.f32 %v2878_v13, %v2763_v12 }
 0xe0a   :  { %v6536_v15 = vpop.eup %6535  ;;  %v2907_v17 = vadd.f32 %v7845_v58, %v2895_v14 }
 0xe0b   :  { %v2926_v20 = vpack.c.bf16 %v6536_v15, %v6536_v15 }
 0xe0c   :  { %6537 = vtanh.f32 %v2907_v17 }
 0xe0d   :  { %2931 = vst.msk [vmem:[#allocation3 + $0x4] sm:$0xf] %vm2929_vm9, %v2926_v20 }
 0xe0f   :  { %v2880_v30 = vpop.f32.mrf.mxu3 }
 0xe10   :  { %v2896_v31 = vadd.f32 %v2880_v30, %v2764_v29 }
 0xe12   :  { %v6538_v32 = vpop.eup %6537  ;;  %v2908_v33 = vadd.f32 %v7845_v58, %v2896_v31 }
 0xe13   :  { %v2927_v34 = vpack.c.bf16 %v6538_v32, %v6538_v32 }
 0xe14   :  { %6539 = vtanh.f32 %v2908_v33  ;;  %v7861_v36 = vld [vmem:[#allocation3] sm:$0xff] }
 0xe15   :  { %2932 = vst.msk [vmem:[#allocation3 + $0x8] sm:$0xf] %vm2929_vm9, %v2927_v34  ;;  %5691 = vmatmul.msk.bf16.vlgmr.msra.gmra.mxu1 %vm549_vm0, %v7861_v36  ;;  %5709 = vmatmul.msk.bf16.vlgmr.msrb.gmra.mxu2 %vm549_vm0, %v7861_v36 }
 0xe17   :  { %v2883_v39 = vpop.f32.mrf.mxu3 }
 0xe18   :  { %v2897_v40 = vadd.f32 %v2883_v39, %v2765_v38 }
 0xe1a   :  { %v6540_v41 = vpop.eup %6539  ;;  %v2909_v46 = vadd.f32 %v7845_v58, %v2897_v40 }
 0xe1b   :  { %v2928_v47 = vpack.c.bf16 %v6540_v41, %v6540_v41 }
 0xe1c   :  { %6541 = vtanh.f32 %v2909_v46 }
 0xe1d   :  { %2933 = vst.msk [vmem:[#allocation3 + $0xc] sm:$0xf] %vm2929_vm9, %v2928_v47 }
 0xe1f   :  { %v2885_v53 = vpop.f32.mrf.mxu3 }
 0xe20   :  { %v2898_v54 = vadd.f32 %v2885_v53, %v2766_v51 }
 0xe22   :  { %v6542_v24 = vpop.eup %6541  ;;  %v2910_v56 = vadd.f32 %v7845_v58, %v2898_v54 }
 0xe23   :  { %2921 = vst.msk [vmem:[%s8235_s11] sm:$0xff] %vm549_vm0, %v6542_v24  ;;  %v2938_v57 = vpack.c.bf16 %v6542_v24, %v6542_v24 }
 0xe24   :  { %6543 = vtanh.f32 %v2910_v56  ;;  %v7881_v60 = vld [vmem:[#allocation3 + $0x8] sm:$0xff] }
 0xe25   :  { %2942 = vst.msk [vmem:[#allocation3 + $0x20] sm:$0xf] %vm2929_vm9, %v2938_v57  ;;  %5692 = vmatmul.msk.bf16.gmra.mxu1 %vm549_vm0, %v7881_v60  ;;  %5710 = vmatmul.msk.bf16.gmra.mxu2 %vm549_vm0, %v7881_v60  ;;  %v6358_v57 = vld [vmem:[#allocation28 + $0x18] sm:$0xff] }
 0xe27   :  { %v2888_v25 = vpop.f32.mrf.mxu3 }
 0xe28   :  { %v2899_v43 = vadd.f32 %v2888_v25, %v2767_v61  ;;  %v6363_v61 = vld [vmem:[#allocation30 + $0x40] sm:$0xff]  ;;  %v6367_v25 = vld [vmem:[#allocation30 + $0x48] sm:$0xff] }
 0xe2a   :  { %v6544_v63 = vpop.eup %6543  ;;  %v2911_v1 = vadd.f32 %v7845_v58, %v2899_v43  ;;  %v6362_v43 = vld [vmem:[#allocation30 + $0x38] sm:$0xff] }
 0xe2b   :  { %2922 = vst.msk [vmem:[%s8235_s11 + $0x8] sm:$0xff] %vm549_vm0, %v6544_v63  ;;  %v2939_v3 = vpack.c.bf16 %v6544_v63, %v6544_v63  ;;  %v6361_v63 = vld [vmem:[#allocation30 + $0x30] sm:$0xff] }
 0xe2c   :  { %6545 = vtanh.f32 %v2911_v1  ;;  %v6354_v1 = vld [vmem:[#allocation28 + $0x10] sm:$0xff] }
 0xe2d   :  { %2943 = vst.msk [vmem:[#allocation3 + $0x24] sm:$0xf] %vm2929_vm9, %v2939_v3 }
 0xe2f   :  { %v2890_v6 = vpop.f32.mrf.mxu3 }
 0xe30   :  { %v2900_v7 = vadd.f32 %v2890_v6, %v2768_v5 }
 0xe32   :  { %v6546_v8 = vpop.eup %6545  ;;  %v2912_v9 = vadd.f32 %v7845_v58, %v2900_v7  ;;  %v7907_v58 = vld [vmem:[#allocation3 + $0x18] sm:$0xff] }
 0xe33   :  { %2923 = vst.msk [vmem:[%s8235_s11 + $0x10] sm:$0xff] %vm549_vm0, %v6546_v8  ;;  %v2940_v26 = vpack.c.bf16 %v6546_v8, %v6546_v8 }
 0xe34   :  { %6547 = vtanh.f32 %v2912_v9  ;;  %v7913_v12 = vld [vmem:[#allocation3 + $0x20] sm:$0xff] }
 0xe35   :  { %2944 = vst.msk [vmem:[#allocation3 + $0x28] sm:$0xf] %vm2929_vm9, %v2940_v26  ;;  %5693 = vmatmul.msk.bf16.gmra.mxu1 %vm549_vm0, %v7895_v10  ;;  %5711 = vmatmul.msk.bf16.gmra.mxu2 %vm549_vm0, %v7895_v10 }
 0xe3a   :  { %v6548_v44 = vpop.eup %6547 }
 0xe3b   :  { %2924 = vst.msk [vmem:[%s8235_s11 + $0x18] sm:$0xff] %vm549_vm0, %v6548_v44  ;;  %v2941_v11 = vpack.c.bf16 %v6548_v44, %v6548_v44 }
 0xe3d   :  { %2945 = vst.msk [vmem:[#allocation3 + $0x2c] sm:$0xf] %vm2929_vm9, %v2941_v11 }
 0xe44   :  { %v7919_v13 = vld [vmem:[#allocation3 + $0x28] sm:$0xff] }
 0xe45   :  { %5694 = vmatmul.msk.bf16.gmra.mxu1 %vm549_vm0, %v7907_v58  ;;  %5712 = vmatmul.msk.bf16.gmra.mxu2 %vm549_vm0, %v7907_v58 }
 0xe55   :  { %5695 = vmatmul.msk.bf16.gmra.mxu1 %vm549_vm0, %v7913_v12  ;;  %5713 = vmatmul.msk.bf16.gmra.mxu2 %vm549_vm0, %v7913_v12 }
 0xe65   :  { %5696 = vmatmul.msk.bf16.gmra.mxu1 %vm549_vm0, %v7919_v13  ;;  %5714 = vmatmul.msk.bf16.gmra.mxu2 %vm549_vm0, %v7919_v13 }
 0xe92   :  { %v3039_v14 = vpop.f32.mrf.mxu1 }
 0xe98   :  { %v3115_v15 = vpop.f32.mrf.mxu2 }
 0xe9a   :  { %v3041_v16 = vpop.f32.mrf.mxu1 }
 0xe9b   :  { %v3075_v54 = vpack.c.bf16 %v3041_v16, %v3039_v14 }
 0xea0   :  { %v3117_v17 = vpop.f32.mrf.mxu2 }
 0xea1   :  { %v3152_v56 = vpack.c.bf16 %v3117_v17, %v3115_v15 }
 0xea2   :  { %v3044_v19 = vpop.f32.mrf.mxu1 }
 0xea8   :  { %v3120_v20 = vpop.f32.mrf.mxu2 }
 0xeaa   :  { %v3046_v21 = vpop.f32.mrf.mxu1 }
 0xeab   :  { %v3076_v52 = vpack.c.bf16 %v3046_v21, %v3044_v19 }
 0xeb0   :  { %v3122_v22 = vpop.f32.mrf.mxu2 }
 0xeb1   :  { %v3153_v24 = vpack.c.bf16 %v3122_v22, %v3120_v20 }
 0xeb2   :  { %v3049_v27 = vpop.f32.mrf.mxu1 }
 0xeb8   :  { %v3125_v28 = vpop.f32.mrf.mxu2 }
 0xeba   :  { %v3051_v29 = vpop.f32.mrf.mxu1 }
 0xebb   :  { %v3077_v49 = vpack.c.bf16 %v3051_v29, %v3049_v27 }
 0xec0   :  { %v3127_v30 = vpop.f32.mrf.mxu2 }
 0xec1   :  { %v3154_v53 = vpack.c.bf16 %v3127_v30, %v3125_v28 }
 0xec2   :  { %v3054_v31 = vpop.f32.mrf.mxu1 }
 0xec8   :  { %v3130_v32 = vpop.f32.mrf.mxu2 }
 0xeca   :  { %v3056_v18 = vpop.f32.mrf.mxu1 }
 0xecb   :  { %v3078_v47 = vpack.c.bf16 %v3056_v18, %v3054_v31 }
 0xed0   :  { %v3132_v33 = vpop.f32.mrf.mxu2 }
 0xed1   :  { %v3155_v51 = vpack.c.bf16 %v3132_v33, %v3130_v32 }
 0xed2   :  { %v3059_v34 = vpop.f32.mrf.mxu1 }
 0xed8   :  { %v3135_v35 = vpop.f32.mrf.mxu2 }
 0xeda   :  { %v3061_v37 = vpop.f32.mrf.mxu1 }
 0xedb   :  { %v3079_v45 = vpack.c.bf16 %v3061_v37, %v3059_v34 }
 0xee0   :  { %v3137_v38 = vpop.f32.mrf.mxu2 }
 0xee1   :  { %v3156_v50 = vpack.c.bf16 %v3137_v38, %v3135_v35 }
 0xee2   :  { %v3064_v23 = vpop.f32.mrf.mxu1 }
 0xee8   :  { %v3140_v39 = vpop.f32.mrf.mxu2 }
 0xeea   :  { %v3066_v40 = vpop.f32.mrf.mxu1 }
 0xeeb   :  { %v3080_v41 = vpack.c.bf16 %v3066_v40, %v3064_v23 }
 0xeed   :  { %3233 = vmatpush.bf16.msrb.mxu3 %v3080_v41 }
 0xef0   :  { %v3142_v46 = vpop.f32.mrf.mxu2 }
 0xef1   :  { %v3157_v48 = vpack.c.bf16 %v3142_v46, %v3140_v39  ;;  %3234 = vmatpush.bf16.msrb.mxu3 %v3079_v45 }
 0xef3   :  { %3185 = vmatpush.bf16.msrb.mxu0 %v3157_v48 }
 0xef5   :  { %3235 = vmatpush.bf16.msrb.mxu3 %v3078_v47 }
 0xef7   :  { %3186 = vmatpush.bf16.msrb.mxu0 %v3156_v50 }
 0xef9   :  { %3236 = vmatpush.bf16.msrb.mxu3 %v3077_v49 }
 0xefb   :  { %3187 = vmatpush.bf16.msrb.mxu0 %v3155_v51 }
 0xefd   :  { %3237 = vmatpush.bf16.msrb.mxu3 %v3076_v52 }
 0xeff   :  { %3188 = vmatpush.bf16.msrb.mxu0 %v3154_v53 }
 0xf01   :  { %3238 = vmatpush.bf16.msrb.mxu3 %v3075_v54 }
 0xf03   :  { %3189 = vmatpush.bf16.msrb.mxu0 %v3153_v24 }
 0xf04   :  { %5742 = vmatmul.msk.bf16.vlgmr.msrb.gmra.mxu3 %vm3173_vm10, %v6352_v55 }
 0xf05   :  { %3416 = vmatpush.bf16.msra.mxu3 %v6369_v42 }
 0xf07   :  { %3190 = vmatpush.bf16.msrb.mxu0 %v3152_v56 }
 0xf09   :  { %3417 = vmatpush.bf16.msra.mxu3 %v6368_v59 }
 0xf0a   :  { %5727 = vmatmul.msk.bf16.vlgmr.msrb.gmra.mxu0 %vm3173_vm10, %v6358_v57 }
 0xf0b   :  { %3285 = vmatpush.bf16.msra.mxu0 %v6363_v61 }
 0xf0d   :  { %3418 = vmatpush.bf16.msra.mxu3 %v6367_v25  ;;  %v6364_v25 = vld [vmem:[#allocation28 + $0x30] sm:$0xff] }
 0xf0f   :  { %3286 = vmatpush.bf16.msra.mxu0 %v6362_v43  ;;  %v6370_v43 = vld [vmem:[#allocation28 + $0x48] sm:$0xff] }
 0xf13   :  { %3287 = vmatpush.bf16.msra.mxu0 %v6361_v63  ;;  %v6374_v63 = vld [vmem:[#allocation30 + $0x68] sm:$0xff] }
 0xf14   :  { %5743 = vmatmul.msk.bf16.gmra.mxu3 %vm3173_vm10, %v6353_v62  ;;  %v6375_v62 = vld [vmem:[#allocation30 + $0x70] sm:$0xff] }
 0xf1a   :  { %5728 = vmatmul.msk.bf16.gmra.mxu0 %vm3173_vm10, %v6359_v0  ;;  %v6373_v0 = vld [vmem:[#allocation30 + $0x60] sm:$0xff] }
 0xf24   :  { %5744 = vmatmul.msk.bf16.gmra.mxu3 %vm3173_vm10, %v6354_v1  ;;  %v6365_v1 = vld [vmem:[#allocation28 + $0x38] sm:$0xff] }
 0xf2a   :  { %5729 = vmatmul.msk.bf16.gmra.mxu0 %vm3173_vm10, %v6360_v2  ;;  %v6371_v2 = vld [vmem:[#allocation28 + $0x50] sm:$0xff] }
 0xf34   :  { %5790 = vmatmul.msk.bf16.vlgmr.msra.gmra.mxu3 %vm549_vm0, %v7861_v36 }
 0xf3a   :  { %5757 = vmatmul.msk.bf16.vlgmr.msra.gmra.mxu0 %vm549_vm0, %v7861_v36 }
 0xf44   :  { %5791 = vmatmul.msk.bf16.gmra.mxu3 %vm549_vm0, %v7881_v60 }
 0xf4a   :  { %5758 = vmatmul.msk.bf16.gmra.mxu0 %vm549_vm0, %v7881_v60 }
 0xf54   :  { %5792 = vmatmul.msk.bf16.gmra.mxu3 %vm549_vm0, %v7895_v10 }
 0xf5a   :  { %5759 = vmatmul.msk.bf16.gmra.mxu0 %vm549_vm0, %v7895_v10 }
 0xf64   :  { %5793 = vmatmul.msk.bf16.gmra.mxu3 %vm549_vm0, %v7907_v58 }
 0xf6a   :  { %5760 = vmatmul.msk.bf16.gmra.mxu0 %vm549_vm0, %v7907_v58 }
 0xf74   :  { %5794 = vmatmul.msk.bf16.gmra.mxu3 %vm549_vm0, %v7913_v12 }
 0xf7a   :  { %5761 = vmatmul.msk.bf16.gmra.mxu0 %vm549_vm0, %v7913_v12 }
 0xf84   :  { %5795 = vmatmul.msk.bf16.gmra.mxu3 %vm549_vm0, %v7919_v13 }
 0xf87   :  { %v3192_v3 = vpop.f32.mrf.mxu0  ;;  %v3240_v4 = vpop.f32.mrf.mxu3 }
 0xf88   :  { %v7953_v5 = vadd.f32 %v3240_v4, %v3192_v3  ;;  %v6366_v3 = vld [vmem:[#allocation28 + $0x40] sm:$0xff]  ;;  %v6372_v4 = vld [vmem:[#allocation28 + $0x58] sm:$0xff] }
 0xf8a   :  { %5762 = vmatmul.msk.bf16.gmra.mxu0 %vm549_vm0, %v7919_v13 }
 0xf8f   :  { %v7957_v6 = vpop.f32.mrf.mxu0  ;;  %v7959_v7 = vpop.f32.mrf.mxu3 }
 0xf97   :  { %v3197_v8 = vpop.f32.mrf.mxu0  ;;  %v3245_v9 = vpop.f32.mrf.mxu3 }
 0xf98   :  { %v7961_v26 = vadd.f32 %v3245_v9, %v3197_v8 }
 0xf9f   :  { %v7963_v44 = vpop.f32.mrf.mxu0  ;;  %v7965_v11 = vpop.f32.mrf.mxu3 }
 0xfa7   :  { %v3202_v14 = vpop.f32.mrf.mxu0  ;;  %v3250_v15 = vpop.f32.mrf.mxu3 }
 0xfa8   :  { %v7967_v16 = vadd.f32 %v3250_v15, %v3202_v14 }
 0xfaf   :  { %v7969_v17 = vpop.f32.mrf.mxu0  ;;  %v7971_v19 = vpop.f32.mrf.mxu3 }
 0xfb7   :  { %v3289_v20 = vpop.f32.mrf.mxu0  ;;  %v3420_v21 = vpop.f32.mrf.mxu3 }
 0xfbf   :  { %v3291_v22 = vpop.f32.mrf.mxu0  ;;  %v3422_v27 = vpop.f32.mrf.mxu3 }
 0xfc0   :  { %v3326_v59 = vpack.c.bf16 %v3291_v22, %v3289_v20  ;;  %v3457_v61 = vpack.c.bf16 %v3422_v27, %v3420_v21 }
 0xfc7   :  { %v3294_v28 = vpop.f32.mrf.mxu0  ;;  %v3425_v29 = vpop.f32.mrf.mxu3 }
 0xfcf   :  { %v3296_v30 = vpop.f32.mrf.mxu0  ;;  %v3427_v31 = vpop.f32.mrf.mxu3 }
 0xfd0   :  { %v3327_v56 = vpack.c.bf16 %v3296_v30, %v3294_v28  ;;  %v3458_v57 = vpack.c.bf16 %v3427_v31, %v3425_v29 }
 0xfd7   :  { %v3299_v32 = vpop.f32.mrf.mxu0  ;;  %v3430_v18 = vpop.f32.mrf.mxu3 }
 0xfdf   :  { %v3301_v33 = vpop.f32.mrf.mxu0  ;;  %v3432_v34 = vpop.f32.mrf.mxu3 }
 0xfe0   :  { %v3459_v24 = vpack.c.bf16 %v3432_v34, %v3430_v18  ;;  %v3328_v42 = vpack.c.bf16 %v3301_v33, %v3299_v32 }
 0xfe7   :  { %v3304_v35 = vpop.f32.mrf.mxu0  ;;  %v3435_v37 = vpop.f32.mrf.mxu3 }
 0xfef   :  { %v3306_v38 = vpop.f32.mrf.mxu0  ;;  %v3437_v23 = vpop.f32.mrf.mxu3 }
 0xff0   :  { %v3460_v54 = vpack.c.bf16 %v3437_v23, %v3435_v37  ;;  %v3329_v55 = vpack.c.bf16 %v3306_v38, %v3304_v35  ;;  %v6376_v38 = vld [vmem:[#allocation28 + $0x60] sm:$0xff]  ;;  %v6387_v23 = vld [vmem:[%s8236_s25 + $0x38] sm:$0xff] }
 0xff1   :  { %3775 = vmatpush.bf16.msrb.mxu3 %v6387_v23 }
 0xff7   :  { %v3309_v39 = vpop.f32.mrf.mxu0  ;;  %v3440_v40 = vpop.f32.mrf.mxu3 }
 0xfff   :  { %v3311_v41 = vpop.f32.mrf.mxu0  ;;  %v3442_v45 = vpop.f32.mrf.mxu3 }
0x1000   :  { %v3330_v52 = vpack.c.bf16 %v3311_v41, %v3309_v39  ;;  %v3461_v53 = vpack.c.bf16 %v3442_v45, %v3440_v40  ;;  %v6377_v39 = vld [vmem:[#allocation28 + $0x68] sm:$0xff]  ;;  %v6378_v40 = vld [vmem:[#allocation28 + $0x70] sm:$0xff] }
0x1007   :  { %v3314_v46 = vpop.f32.mrf.mxu0  ;;  %v3445_v47 = vpop.f32.mrf.mxu3 }
0x100f   :  { %v3316_v48 = vpop.f32.mrf.mxu0  ;;  %v3447_v49 = vpop.f32.mrf.mxu3 }
0x1010   :  { %v3331_v50 = vpack.c.bf16 %v3316_v48, %v3314_v46  ;;  %v3462_v51 = vpack.c.bf16 %v3447_v49, %v3445_v47  ;;  %v6382_v47 = vld [vmem:[%s8236_s25 + $0x18] sm:$0xff] }
0x1011   :  { %v6392_v48 = vld [vmem:[%s8236_s25 + $0x58] sm:$0xff]  ;;  %3712 = vmatpush.bf16.msrb.mxu0 %v6382_v47 }
0x1012   :  { %3358 = vmatpush.bf16.msrb.mxu1 %v3331_v50  ;;  %3489 = vmatpush.bf16.msra.mxu2 %v3462_v51  ;;  %v6381_v50 = vld [vmem:[%s8236_s25 + $0x10] sm:$0xff] }
0x1013   :  { %v6386_v51 = vld [vmem:[%s8236_s25 + $0x30] sm:$0xff] }
0x1014   :  { %3776 = vmatpush.bf16.msrb.mxu3 %v6386_v51 }
0x1015   :  { %3713 = vmatpush.bf16.msrb.mxu0 %v6381_v50 }
0x1016   :  { %3359 = vmatpush.bf16.msrb.mxu1 %v3330_v52  ;;  %3490 = vmatpush.bf16.msra.mxu2 %v3461_v53  ;;  %v6391_v52 = vld [vmem:[%s8236_s25 + $0x50] sm:$0xff]  ;;  %v6380_v53 = vld [vmem:[%s8236_s25 + $0x8] sm:$0xff] }
0x1019   :  { %3714 = vmatpush.bf16.msrb.mxu0 %v6380_v53 }
0x101a   :  { %3360 = vmatpush.bf16.msrb.mxu1 %v3329_v55  ;;  %3491 = vmatpush.bf16.msra.mxu2 %v3460_v54  ;;  %v6385_v54 = vld [vmem:[%s8236_s25 + $0x28] sm:$0xff] }
0x101b   :  { %v6390_v55 = vld [vmem:[%s8236_s25 + $0x48] sm:$0xff]  ;;  %3777 = vmatpush.bf16.msrb.mxu3 %v6385_v54 }
0x101e   :  { %3361 = vmatpush.bf16.msrb.mxu1 %v3328_v42  ;;  %3492 = vmatpush.bf16.msra.mxu2 %v3459_v24  ;;  %v6379_v24 = vld [vmem:[%s8236_s25] sm:$0xff] }
0x101f   :  { %v6384_v42 = vld [vmem:[%s8236_s25 + $0x20] sm:$0xff]  ;;  %3715 = vmatpush.bf16.msrb.mxu0 %v6379_v24 }
0x1020   :  { %3778 = vmatpush.bf16.msrb.mxu3 %v6384_v42 }
0x1022   :  { %3362 = vmatpush.bf16.msrb.mxu1 %v3327_v56  ;;  %3493 = vmatpush.bf16.msra.mxu2 %v3458_v57  ;;  %v6389_v56 = vld [vmem:[%s8236_s25 + $0x40] sm:$0xff] }
0x1026   :  { %3363 = vmatpush.bf16.msrb.mxu1 %v3326_v59  ;;  %3494 = vmatpush.bf16.msra.mxu2 %v3457_v61 }
0x1029   :  { %5775 = vmatmul.msk.bf16.vlgmr.msrb.gmra.mxu1 %vm3173_vm10, %v6364_v25  ;;  %5808 = vmatmul.msk.bf16.vlgmr.msra.gmra.mxu2 %vm3173_vm10, %v6370_v43  ;;  %v3243_v25 = vadd.f32 %v7959_v7, %v7957_v6  ;;  %v6397_v6 = vld [vmem:[%s8236_s25 + $0x78] sm:$0xff]  ;;  %v3248_v7 = vadd.f32 %v7965_v11, %v7963_v44  ;;  %v3253_v11 = vadd.f32 %v7971_v19, %v7969_v17 }
0x102a   :  { %3547 = vmatpush.bf16.msra.mxu1 %v6375_v62  ;;  %4002 = vmatpush.bf16.msra.mxu3 %v6397_v6 }
0x102e   :  { %3548 = vmatpush.bf16.msra.mxu1 %v6374_v63 }
0x1032   :  { %3549 = vmatpush.bf16.msra.mxu1 %v6373_v0  ;;  %v6526_v0 = vld [vmem:[%s8237_s26] ss:$0 sm:$0xff] }
0x1036   :  { %3903 = vmatpush.bf16.msrb.mxu1 %v6392_v48 }
0x1039   :  { %5776 = vmatmul.msk.bf16.gmra.mxu1 %vm3173_vm10, %v6365_v1  ;;  %5809 = vmatmul.msk.bf16.gmra.mxu2 %vm3173_vm10, %v6371_v2 }
0x103a   :  { %3904 = vmatpush.bf16.msrb.mxu1 %v6391_v52 }
0x103e   :  { %3905 = vmatpush.bf16.msrb.mxu1 %v6390_v55 }
0x1042   :  { %3906 = vmatpush.bf16.msrb.mxu1 %v6389_v56 }
0x1049   :  { %5777 = vmatmul.msk.bf16.gmra.mxu1 %vm3173_vm10, %v6366_v3  ;;  %5810 = vmatmul.msk.bf16.gmra.mxu2 %vm3173_vm10, %v6372_v4 }
0x1059   :  { %5823 = vmatmul.msk.bf16.vlgmr.msra.gmra.mxu1 %vm549_vm0, %v7861_v36 }
0x1069   :  { %5824 = vmatmul.msk.bf16.gmra.mxu1 %vm549_vm0, %v7881_v60 }
0x1079   :  { %5825 = vmatmul.msk.bf16.gmra.mxu1 %vm549_vm0, %v7895_v10 }
0x1089   :  { %5826 = vmatmul.msk.bf16.gmra.mxu1 %vm549_vm0, %v7907_v58 }
0x1099   :  { %5827 = vmatmul.msk.bf16.gmra.mxu1 %vm549_vm0, %v7913_v12 }
0x10a6   :  { %v3365_v8 = vpop.f32.mrf.mxu1 }
0x10a7   :  { %v7990_v9 = vadd.f32 %v3365_v8, %v7953_v5 }
0x10a9   :  { %5828 = vmatmul.msk.bf16.gmra.mxu1 %vm549_vm0, %v7919_v13 }
0x10ac   :  { %v3496_v41 = vpop.f32.mrf.mxu2 }
0x10ad   :  { %v3511_v43 = vadd.f32 %v3496_v41, %v7990_v9 }
0x10ae   :  { %v7994_v36 = vpop.f32.mrf.mxu1 }
0x10af   :  { %v3381_v62 = vadd.f32 %v7994_v36, %v3243_v25  ;;  %v6396_v36 = vld [vmem:[%s8236_s25 + $0x70] sm:$0xff] }
0x10b0   :  { %4003 = vmatpush.bf16.msra.mxu3 %v6396_v36  ;;  %v6383_v25 = vld [vmem:[#allocation31] sm:$0xff] }
0x10b4   :  { %v3498_v45 = vpop.f32.mrf.mxu2 }
0x10b5   :  { %v3512_v1 = vadd.f32 %v3498_v45, %v3381_v62 }
0x10b6   :  { %v3370_v14 = vpop.f32.mrf.mxu1 }
0x10b7   :  { %v7997_v60 = vadd.f32 %v3370_v14, %v7961_v26 }
0x10bc   :  { %v3501_v46 = vpop.f32.mrf.mxu2 }
0x10bd   :  { %v3513_v9 = vadd.f32 %v3501_v46, %v7997_v60 }
0x10be   :  { %v7999_v10 = vpop.f32.mrf.mxu1 }
0x10c4   :  { %v3503_v49 = vpop.f32.mrf.mxu2 }
0x10c6   :  { %v3375_v15 = vpop.f32.mrf.mxu1 }
0x10c7   :  { %v8002_v58 = vadd.f32 %v3375_v15, %v7967_v16 }
0x10cc   :  { %v3506_v57 = vpop.f32.mrf.mxu2 }
0x10cd   :  { %v3515_v60 = vadd.f32 %v3506_v57, %v8002_v58 }
0x10ce   :  { %v8004_v12 = vpop.f32.mrf.mxu1 }
0x10d4   :  { %v3508_v59 = vpop.f32.mrf.mxu2 }
0x10d6   :  { %v3551_v20 = vpop.f32.mrf.mxu1 }
0x10de   :  { %v3553_v5 = vpop.f32.mrf.mxu1 }
0x10df   :  { %v3588_v37 = vpack.c.bf16 %v3553_v5, %v3551_v20 }
0x10e6   :  { %v3556_v21 = vpop.f32.mrf.mxu1 }
0x10ee   :  { %v3558_v22 = vpop.f32.mrf.mxu1 }
0x10ef   :  { %v3589_v35 = vpack.c.bf16 %v3558_v22, %v3556_v21  ;;  %v3383_v21 = vadd.f32 %v7999_v10, %v3248_v7  ;;  %v3385_v10 = vadd.f32 %v8004_v12, %v3253_v11 }
0x10f6   :  { %v3561_v27 = vpop.f32.mrf.mxu1 }
0x10fe   :  { %v3563_v13 = vpop.f32.mrf.mxu1 }
0x10ff   :  { %v3590_v34 = vpack.c.bf16 %v3563_v13, %v3561_v27  ;;  %v3514_v27 = vadd.f32 %v3503_v49, %v3383_v21  ;;  %v6395_v13 = vld [vmem:[%s8236_s25 + $0x68] sm:$0xff]  ;;  %v6402_v21 = vld [vmem:[%s8236_s25 + $0x98] sm:$0xff] }
0x1100   :  { %4004 = vmatpush.bf16.msra.mxu3 %v6395_v13  ;;  %v6400_v13 = vld [vmem:[%s8236_s25 + $0x88] sm:$0xff] }
0x1106   :  { %v3566_v28 = vpop.f32.mrf.mxu1 }
0x110e   :  { %v3568_v29 = vpop.f32.mrf.mxu1 }
0x110f   :  { %v3591_v16 = vpack.c.bf16 %v3568_v29, %v3566_v28 }
0x1116   :  { %v3571_v30 = vpop.f32.mrf.mxu1 }
0x111e   :  { %v3573_v31 = vpop.f32.mrf.mxu1 }
0x111f   :  { %v3592_v33 = vpack.c.bf16 %v3573_v31, %v3571_v30 }
0x1126   :  { %v3576_v26 = vpop.f32.mrf.mxu1 }
0x112e   :  { %v3578_v32 = vpop.f32.mrf.mxu1 }
0x112f   :  { %v3593_v18 = vpack.c.bf16 %v3578_v32, %v3576_v26  ;;  %v6394_v26 = vld [vmem:[%s8236_s25 + $0x60] sm:$0xff] }
0x1130   :  { %4005 = vmatpush.bf16.msra.mxu3 %v6394_v26 }
0x1131   :  { %3620 = vmatpush.bf16.msrb.mxu2 %v3593_v18 }
0x1135   :  { %3621 = vmatpush.bf16.msrb.mxu2 %v3592_v33 }
0x1139   :  { %3622 = vmatpush.bf16.msrb.mxu2 %v3591_v16 }
0x113d   :  { %3623 = vmatpush.bf16.msrb.mxu2 %v3590_v34  ;;  %v3516_v34 = vadd.f32 %v3508_v59, %v3385_v10  ;;  %v6398_v10 = vld [vmem:[#allocation31 + $0x24] sm:$0xff] }
0x1141   :  { %3624 = vmatpush.bf16.msrb.mxu2 %v3589_v35 }
0x1145   :  { %3625 = vmatpush.bf16.msrb.mxu2 %v3588_v37 }
0x1148   :  { %5841 = vmatmul.msk.bf16.vlgmr.msrb.gmra.mxu2 %vm3173_vm10, %v6376_v38 }
0x1158   :  { %5842 = vmatmul.msk.bf16.gmra.mxu2 %vm3173_vm10, %v6377_v39 }
0x1168   :  { %5843 = vmatmul.msk.bf16.gmra.mxu2 %vm3173_vm10, %v6378_v40 }
0x11cb   :  { %v3627_v61 = vpop.f32.mrf.mxu2 }
0x11cc   :  { %v3642_v63 = vadd.f32 %v3627_v61, %v3511_v43 }
0x11ce   :  { %v3652_v3 = vadd.f32 %v6526_v0, %v3642_v63 }
0x11d0   :  { %v3658_v14 = vmax.f32 %v3652_v3, 0.0  ;;  %v3734_v3 = vld [vmem:[#allocation31 + $0x8] sm:$0xf] }
0x11d3   :  { %v3629_v2 = vpop.f32.mrf.mxu2 }
0x11d4   :  { %v3643_v4 = vadd.f32 %v3629_v2, %v3512_v1  ;;  %v6388_v2 = vld [vmem:[#allocation31 + $0xc] sm:$0xff] }
0x11d6   :  { %v3653_v8 = vadd.f32 %v6526_v0, %v3643_v4 }
0x11d8   :  { %v3659_v15 = vmax.f32 %v3653_v8, 0.0 }
0x11da   :  { %v8026_v20 = vpack.c.bf16 %v3659_v15, %v3658_v14  ;;  %v3839_v14 = vunpack.c.l.b16 %v3734_v3 }
0x11db   :  { %v3632_v5 = vpop.f32.mrf.mxu2 }
0x11dc   :  { %5860 = vmatmul.msk.bf16.vlgmr.msrb.gmra.mxu0 %vm933_vm2, %v8026_v20  ;;  %5887 = vmatmul.msk.bf16.vlgmr.msrb.gmra.mxu3 %vm933_vm2, %v8026_v20  ;;  %v3644_v22 = vadd.f32 %v3632_v5, %v3513_v9  ;;  %v3798_v5 = vld [vmem:[#allocation31 + $0x14] sm:$0xf]  ;;  %v3841_v6 = vpack.c.b16 %v3839_v14, %v3839_v14  ;;  %v6412_v14 = vld [vmem:[%s8238_s23 + $0x38] sm:$0xff] }
0x11dd   :  { %5926 = vmatmul.msk.bf16.vlgmr.msrb.gmra.mxu1 %vm933_vm2, %v8026_v20  ;;  %v3807_v7 = vunpack.c.l.b16 %v3798_v5  ;;  %v6411_v5 = vld [vmem:[%s8238_s23 + $0x30] sm:$0xff] }
0x11de   :  { %v3654_v29 = vadd.f32 %v6526_v0, %v3644_v22 }
0x11df   :  { %v3809_v36 = vpack.c.b16 %v3807_v7, %v3807_v7  ;;  %v6410_v7 = vld [vmem:[%s8238_s23 + $0x28] sm:$0xff] }
0x11e0   :  { %v3660_v32 = vmax.f32 %v3654_v29, 0.0  ;;  %v6399_v29 = vld [vmem:[%s8236_s25 + $0x80] sm:$0xff] }
0x11e3   :  { %v3634_v28 = vpop.f32.mrf.mxu2 }
0x11e4   :  { %v3645_v30 = vadd.f32 %v3634_v28, %v3514_v27  ;;  %v6401_v27 = vld [vmem:[%s8236_s25 + $0x90] sm:$0xff] }
0x11e6   :  { %v3655_v31 = vadd.f32 %v6526_v0, %v3645_v30  ;;  %v6393_v30 = vld [vmem:[#allocation31 + $0x18] sm:$0xff] }
0x11e8   :  { %v3661_v18 = vmax.f32 %v3655_v31, 0.0 }
0x11ea   :  { %v8042_v33 = vpack.c.bf16 %v3661_v18, %v3660_v32  ;;  %v3926_v32 = vld [vmem:[#allocation31 + $0x20] sm:$0xf] }
0x11eb   :  { %v3637_v44 = vpop.f32.mrf.mxu2 }
0x11ec   :  { %5861 = vmatmul.msk.bf16.gmra.mxu0 %vm933_vm2, %v8042_v33  ;;  %5888 = vmatmul.msk.bf16.gmra.mxu3 %vm933_vm2, %v8042_v33  ;;  %v3646_v16 = vadd.f32 %v3637_v44, %v3515_v60  ;;  %v3935_v44 = vunpack.c.l.b16 %v3926_v32 }
0x11ed   :  { %5927 = vmatmul.msk.bf16.gmra.mxu1 %vm933_vm2, %v8042_v33 }
0x11ee   :  { %v3656_v37 = vadd.f32 %v6526_v0, %v3646_v16  ;;  %v3937_v60 = vpack.c.b16 %v3935_v44, %v3935_v44  ;;  %v4025_v16 = vld [vmem:[#allocation31 + $0x2c] sm:$0xf] }
0x11f0   :  { %v3662_v39 = vmax.f32 %v3656_v37, 0.0 }
0x11f3   :  { %v3639_v35 = vpop.f32.mrf.mxu2 }
0x11f4   :  { %v3647_v38 = vadd.f32 %v3639_v35, %v3516_v34  ;;  %v4034_v34 = vunpack.c.l.b16 %v4025_v16 }
0x11f6   :  { %v3657_v23 = vadd.f32 %v6526_v0, %v3647_v38  ;;  %v4036_v35 = vpack.c.b16 %v4034_v34, %v4034_v34 }
0x11f8   :  { %v3663_v40 = vmax.f32 %v3657_v23, 0.0 }
0x11fa   :  { %v8054_v41 = vpack.c.bf16 %v3663_v40, %v3662_v39 }
0x11fc   :  { %5862 = vmatmul.msk.bf16.gmra.mxu0 %vm933_vm2, %v8054_v41  ;;  %5889 = vmatmul.msk.bf16.gmra.mxu3 %vm933_vm2, %v8054_v41 }
0x11fd   :  { %5928 = vmatmul.msk.bf16.gmra.mxu1 %vm933_vm2, %v8054_v41 }
0x120c   :  { %5959 = vmatmul.msk.bf16.vlgmr.msra.gmra.mxu3 %vm933_vm2, %v8026_v20 }
0x121c   :  { %5960 = vmatmul.msk.bf16.gmra.mxu3 %vm933_vm2, %v8042_v33 }
0x122c   :  { %5961 = vmatmul.msk.bf16.gmra.mxu3 %vm933_vm2, %v8054_v41 }
0x1259   :  { %v3717_v17 = vpop.f32.mrf.mxu0 }
0x125a   :  { %v3908_v19 = vpop.f32.mrf.mxu1 }
0x125f   :  { %v3780_v58 = vpop.f32.mrf.mxu3 }
0x1261   :  { %v3719_v12 = vpop.f32.mrf.mxu0 }
0x1262   :  { %v3910_v45 = vpop.f32.mrf.mxu1  ;;  %v3735_v61 = vpack.c.bf16 %v3719_v12, %v3717_v17 }
0x1263   :  { %v3927_v15 = vpack.c.bf16 %v3910_v45, %v3908_v19 }
0x1267   :  { %v3782_v46 = vpop.f32.mrf.mxu3 }
0x1268   :  { %v3799_v0 = vpack.c.bf16 %v3782_v46, %v3780_v58 }
0x1269   :  { %v3722_v47 = vpop.f32.mrf.mxu0 }
0x126a   :  { %v3913_v49 = vpop.f32.mrf.mxu1 }
0x126f   :  { %v3785_v48 = vpop.f32.mrf.mxu3 }
0x1271   :  { %v3724_v50 = vpop.f32.mrf.mxu0 }
0x1272   :  { %v3915_v53 = vpop.f32.mrf.mxu1  ;;  %v3736_v56 = vpack.c.bf16 %v3724_v50, %v3722_v47 }
0x1273   :  { %v3928_v4 = vpack.c.bf16 %v3915_v53, %v3913_v49 }
0x1277   :  { %v3787_v51 = vpop.f32.mrf.mxu3 }
0x1278   :  { %v3800_v43 = vpack.c.bf16 %v3787_v51, %v3785_v48 }
0x1279   :  { %v3727_v52 = vpop.f32.mrf.mxu0 }
0x127a   :  { %v3918_v42 = vpop.f32.mrf.mxu1 }
0x127f   :  { %v3790_v54 = vpop.f32.mrf.mxu3 }
0x1281   :  { %v3729_v55 = vpop.f32.mrf.mxu0 }
0x1282   :  { %v3737_v24 = vpack.c.bf16 %v3729_v55, %v3727_v52  ;;  %v3920_v62 = vpop.f32.mrf.mxu1 }
0x1283   :  { %v3929_v1 = vpack.c.bf16 %v3920_v62, %v3918_v42 }
0x1284   :  { %3853 = vmatpush.bf16.msra.mxu0 %v3737_v24 }
0x1287   :  { %v3792_v57 = vpop.f32.mrf.mxu3 }
0x1288   :  { %v3801_v59 = vpack.c.bf16 %v3792_v57, %v3790_v54  ;;  %3854 = vmatpush.bf16.msra.mxu0 %v3736_v56 }
0x128a   :  { %3821 = vmatpush.bf16.msra.mxu2 %v3801_v59 }
0x128c   :  { %3855 = vmatpush.bf16.msra.mxu0 %v3735_v61 }
0x128e   :  { %3822 = vmatpush.bf16.msra.mxu2 %v3800_v43 }
0x128f   :  { %v4007_v63 = vpop.f32.mrf.mxu3  ;;  %5900 = vmatmul.msk.bf16.vlgmr.msra.gmra.mxu0 %vm549_vm0, %v6383_v25 }
0x1292   :  { %3823 = vmatpush.bf16.msra.mxu2 %v3799_v0 }
0x1295   :  { %5894 = vmatmul.msk.bf16.vlgmr.msra.gmra.mxu2 %vm549_vm0, %v6388_v2  ;;  %v4124_v2 = vld [vmem:[#allocation31 + $0x38] sm:$0xf] }
0x1296   :  { %3949 = vmatpush.bf16.msrb.mxu2 %v3929_v1  ;;  %v6403_v1 = vld [vmem:[#allocation31 + $0x30] sm:$0xff]  ;;  %v4133_v3 = vunpack.c.l.b16 %v4124_v2 }
0x1297   :  { %v4009_v8 = vpop.f32.mrf.mxu3 }
0x1298   :  { %v4026_v11 = vpack.c.bf16 %v4009_v8, %v4007_v63  ;;  %v6407_v8 = vld [vmem:[%s8238_s23 + $0x18] sm:$0xff] }
0x1299   :  { %4217 = vmatpush.bf16.msrb.mxu3 %v6407_v8  ;;  %v6425_v8 = vld [vmem:[%s8238_s23 + $0x88] sm:$0xff] }
0x129a   :  { %3950 = vmatpush.bf16.msrb.mxu2 %v3928_v4  ;;  %v4135_v4 = vpack.c.b16 %v4133_v3, %v4133_v3 }
0x129e   :  { %3951 = vmatpush.bf16.msrb.mxu2 %v3927_v15  ;;  %v6406_v15 = vld [vmem:[%s8238_s23 + $0x10] sm:$0xff] }
0x129f   :  { %v4012_v9 = vpop.f32.mrf.mxu3  ;;  %5901 = vmatmul.msk.bf16.gmra.mxu0 %vm549_vm0, %v3841_v6  ;;  %4218 = vmatpush.bf16.msrb.mxu3 %v6406_v15  ;;  %v6405_v6 = vld [vmem:[%s8238_s23 + $0x8] sm:$0xff] }
0x12a2   :  { %4101 = vmatpush.bf16.msra.mxu2 %v6402_v21 }
0x12a3   :  { %4219 = vmatpush.bf16.msrb.mxu3 %v6405_v6 }
0x12a5   :  { %5895 = vmatmul.msk.bf16.gmra.mxu2 %vm549_vm0, %v3809_v36  ;;  %v6409_v36 = vld [vmem:[%s8238_s23 + $0x20] sm:$0xff] }
0x12a6   :  { %4102 = vmatpush.bf16.msra.mxu2 %v6401_v27  ;;  %v6416_v27 = vld [vmem:[%s8238_s23 + $0x50] sm:$0xff] }
0x12a7   :  { %v4014_v22 = vpop.f32.mrf.mxu3 }
0x12a8   :  { %v4027_v18 = vpack.c.bf16 %v4014_v22, %v4012_v9  ;;  %v6404_v9 = vld [vmem:[%s8238_s23] sm:$0xff]  ;;  %v6417_v22 = vld [vmem:[%s8238_s23 + $0x58] sm:$0xff] }
0x12a9   :  { %4220 = vmatpush.bf16.msrb.mxu3 %v6404_v9 }
0x12aa   :  { %4103 = vmatpush.bf16.msra.mxu2 %v6400_v13 }
0x12ad   :  { %4379 = vmatpush.bf16.msra.mxu3 %v6417_v22 }
0x12ae   :  { %4104 = vmatpush.bf16.msra.mxu2 %v6399_v29  ;;  %v6415_v29 = vld [vmem:[%s8238_s23 + $0x48] sm:$0xff] }
0x12af   :  { %v4017_v28 = vpop.f32.mrf.mxu3 }
0x12b1   :  { %4380 = vmatpush.bf16.msra.mxu3 %v6416_v27  ;;  %v6114_v27 = vld [vmem:[#allocation33 + $0x18] sm:$0xf] }
0x12b5   :  { %5933 = vmatmul.msk.bf16.vlgmr.msrb.gmra.mxu2 %vm549_vm0, %v6393_v30  ;;  %4381 = vmatpush.bf16.msra.mxu3 %v6415_v29 }
0x12b7   :  { %v4019_v31 = vpop.f32.mrf.mxu3 }
0x12b8   :  { %v4028_v26 = vpack.c.bf16 %v4019_v31, %v4017_v28  ;;  %v6527_v28 = vld [vmem:[%s8239_s29] ss:$0 sm:$0xff] }
0x12ba   :  { %4048 = vmatpush.bf16.msrb.mxu0 %v4028_v26 }
0x12be   :  { %4049 = vmatpush.bf16.msrb.mxu0 %v4027_v18  ;;  %v6414_v18 = vld [vmem:[%s8238_s23 + $0x40] sm:$0xff] }
0x12bf   :  { %4382 = vmatpush.bf16.msra.mxu3 %v6414_v18 }
0x12c2   :  { %4050 = vmatpush.bf16.msrb.mxu0 %v4026_v11 }
0x12c5   :  { %5934 = vmatmul.msk.bf16.gmra.mxu2 %vm549_vm0, %v3937_v60  ;;  %5966 = vmatmul.msk.bf16.vlgmr.msrb.gmra.mxu0 %vm549_vm0, %v6398_v10 }
0x12c6   :  { %4272 = vmatpush.bf16.msra.mxu0 %v6412_v14  ;;  %v6424_v14 = vld [vmem:[%s8238_s23 + $0x80] sm:$0xff] }
0x12ca   :  { %4273 = vmatpush.bf16.msra.mxu0 %v6411_v5 }
0x12ce   :  { %4274 = vmatpush.bf16.msra.mxu0 %v6410_v7 }
0x12d2   :  { %4275 = vmatpush.bf16.msra.mxu0 %v6409_v36 }
0x12d5   :  { %5967 = vmatmul.msk.bf16.gmra.mxu0 %vm549_vm0, %v4036_v35  ;;  %5992 = vmatmul.msk.bf16.vlgmr.msra.gmra.mxu2 %vm933_vm2, %v8026_v20 }
0x12e5   :  { %5993 = vmatmul.msk.bf16.gmra.mxu2 %vm933_vm2, %v8042_v33 }
0x12f5   :  { %5994 = vmatmul.msk.bf16.gmra.mxu2 %vm933_vm2, %v8054_v41 }
0x130c   :  { %v3857_v37 = vpop.f32.mrf.mxu0 }
0x1314   :  { %v3859_v38 = vpop.f32.mrf.mxu0 }
0x1318   :  { %v3825_v23 = vpop.f32.mrf.mxu2 }
0x1319   :  { %v3858_v39 = vadd.f32 %v3857_v37, %v3825_v23 }
0x131c   :  { %v3862_v40 = vpop.f32.mrf.mxu0 }
0x1320   :  { %v3827_v17 = vpop.f32.mrf.mxu2 }
0x1321   :  { %v3860_v19 = vadd.f32 %v3859_v38, %v3827_v17 }
0x1324   :  { %v3864_v58 = vpop.f32.mrf.mxu0 }
0x1328   :  { %v3830_v12 = vpop.f32.mrf.mxu2 }
0x1329   :  { %v3863_v45 = vadd.f32 %v3862_v40, %v3830_v12 }
0x1330   :  { %v3832_v46 = vpop.f32.mrf.mxu2 }
0x1331   :  { %v6413_v46 = vld [vmem:[#allocation33 + $0x8] sm:$0x30] }
0x1338   :  { %v3953_v47 = vpop.f32.mrf.mxu2 }
0x1339   :  { %v3962_v48 = vadd.f32 %v3953_v47, %v3858_v39  ;;  %v6422_v47 = vld [vmem:[%s8238_s23 + $0x78] sm:$0xff] }
0x1340   :  { %v3955_v20 = vpop.f32.mrf.mxu2 }
0x1341   :  { %v3963_v49 = vadd.f32 %v3955_v20, %v3860_v19 }
0x1342   :  { %v4052_v50 = vpop.f32.mrf.mxu0 }
0x1343   :  { %v4061_v33 = vadd.f32 %v4052_v50, %v3962_v48 }
0x1348   :  { %v3958_v51 = vpop.f32.mrf.mxu2 }
0x1349   :  { %v3964_v52 = vadd.f32 %v3958_v51, %v3863_v45  ;;  %v6047_v45 = vld [vmem:[#allocation33 + $0x8] sm:$0xf] }
0x134a   :  { %v4054_v41 = vpop.f32.mrf.mxu0  ;;  %v6048_v50 = vor.u32 %v6413_v46, %v6047_v45 }
0x134b   :  { %v4062_v53 = vadd.f32 %v4054_v41, %v3963_v49  ;;  %v6052_v41 = vld [vmem:[#allocation33] sm:$0xf] }
0x1350   :  { %v3960_v54 = vpop.f32.mrf.mxu2 }
0x1352   :  { %v4057_v55 = vpop.f32.mrf.mxu0 }
0x1353   :  { %v4063_v24 = vadd.f32 %v4057_v55, %v3964_v52  ;;  %v6421_v52 = vld [vmem:[%s8238_s23 + $0x70] sm:$0xff]  ;;  %v6420_v55 = vld [vmem:[%s8238_s23 + $0x68] sm:$0xff] }
0x1358   :  { %v4106_v42 = vpop.f32.mrf.mxu2 }
0x135a   :  { %v4059_v56 = vpop.f32.mrf.mxu0 }
0x135b   :  { %v6419_v56 = vld [vmem:[%s8238_s23 + $0x60] sm:$0xff] }
0x1360   :  { %v4108_v57 = vpop.f32.mrf.mxu2 }
0x1361   :  { %v4125_v0 = vpack.c.bf16 %v4108_v57, %v4106_v42 }
0x1368   :  { %v4111_v59 = vpop.f32.mrf.mxu2 }
0x1370   :  { %v4113_v61 = vpop.f32.mrf.mxu2 }
0x1371   :  { %v4126_v63 = vpack.c.bf16 %v4113_v61, %v4111_v59 }
0x1378   :  { %v4116_v25 = vpop.f32.mrf.mxu2 }
0x1380   :  { %v4118_v43 = vpop.f32.mrf.mxu2 }
0x1381   :  { %v4127_v62 = vpack.c.bf16 %v4118_v43, %v4116_v25 }
0x1383   :  { %4147 = vmatpush.bf16.msra.mxu1 %v4127_v62  ;;  %v6083_v62 = vld [vmem:[#allocation33 + $0x10] sm:$0xf] }
0x1387   :  { %4148 = vmatpush.bf16.msra.mxu1 %v4126_v63  ;;  %v6418_v63 = vld [vmem:[#allocation33 + $0x10] sm:$0x30] }
0x1388   :  { %v6084_v2 = vor.u32 %v6418_v63, %v6083_v62  ;;  %v6434_v62 = vld [vmem:[%s8241_s5 + $0x28] sm:$0xff]  ;;  %v6433_v63 = vld [vmem:[%s8241_s5 + $0x20] sm:$0xff] }
0x138b   :  { %4149 = vmatpush.bf16.msra.mxu1 %v4125_v0  ;;  %v6427_v0 = vld [vmem:[%s8238_s23 + $0x98] sm:$0xff] }
0x138e   :  { %5999 = vmatmul.msk.bf16.vlgmr.msra.gmra.mxu1 %vm549_vm0, %v6403_v1 }
0x139e   :  { %6000 = vmatmul.msk.bf16.gmra.mxu1 %vm549_vm0, %v4135_v4  ;;  %v6426_v4 = vld [vmem:[%s8238_s23 + $0x90] sm:$0xff]  ;;  %vm4861_vm0 = vcmask 85000  }
0x140b   :  { %v4151_v21 = vpop.f32.mrf.mxu1 }
0x140c   :  { %v4160_v13 = vadd.f32 %v4151_v21, %v4061_v33 }
0x140e   :  { %v4167_v31 = vadd.f32 %v6527_v28, %v4160_v13  ;;  %v6423_v13 = vld [vmem:[#allocation33 + $0x18] sm:$0x30] }
0x1410   :  { %v4170_v44 = vmax.f32 %v4167_v31, 0.0  ;;  %v6115_v31 = vor.u32 %v6423_v13, %v6114_v27  ;;  %v6529_v13 = vld [vmem:[%s8242_s21] ss:$0 sm:$0xff] }
0x1413   :  { %v4153_v30 = vpop.f32.mrf.mxu1 }
0x1414   :  { %v4161_v26 = vadd.f32 %v4153_v30, %v4062_v53  ;;  %v6408_v53 = vld [vmem:[#allocation33] sm:$0x30] }
0x1416   :  { %v4168_v32 = vadd.f32 %v6527_v28, %v4161_v26 }
0x1418   :  { %v4171_v11 = vmax.f32 %v4168_v32, 0.0 }
0x141a   :  { %v8101_v60 = vpack.c.bf16 %v4171_v11, %v4170_v44 }
0x141b   :  { %v4156_v10 = vpop.f32.mrf.mxu1 }
0x141c   :  { %6017 = vmatmul.msk.bf16.vlgmr.msrb.gmra.mxu3 %vm933_vm2, %v8101_v60  ;;  %6043 = vmatmul.msk.bf16.vlgmr.msra.gmra.mxu0 %vm933_vm2, %v8101_v60  ;;  %v4162_v16 = vadd.f32 %v4156_v10, %v4063_v24  ;;  %v6053_v24 = vor.u32 %v6408_v53, %v6052_v41 }
0x141e   :  { %v4169_v34 = vadd.f32 %v6527_v28, %v4162_v16 }
0x1420   :  { %v4172_v37 = vmax.f32 %v4169_v34, 0.0 }
0x1422   :  { %v8107_v38 = vpack.c.bf16 %v4172_v37, %v4172_v37 }
0x1423   :  { %v4158_v35 = vpop.f32.mrf.mxu1 }
0x142c   :  { %6018 = vmatmul.msk.bf16.gmra.mxu3 %vm933_vm2, %v8107_v38  ;;  %6044 = vmatmul.msk.bf16.gmra.mxu0 %vm933_vm2, %v8107_v38 }
0x143c   :  { %6079 = vmatmul.msk.bf16.vlgmr.msra.gmra.mxu3 %vm933_vm2, %v8101_v60 }
0x144c   :  { %6080 = vmatmul.msk.bf16.gmra.mxu3 %vm933_vm2, %v8107_v38 }
0x1499   :  { %v4277_v23 = vpop.f32.mrf.mxu0 }
0x149f   :  { %v4222_v39 = vpop.f32.mrf.mxu3 }
0x14a1   :  { %v4279_v40 = vpop.f32.mrf.mxu0 }
0x14a2   :  { %v4289_v48 = vpack.c.bf16 %v4279_v40, %v4277_v23  ;;  %v6428_v23 = vld [vmem:[#allocation33 + $0x20] sm:$0x30] }
0x14a7   :  { %v4224_v17 = vpop.f32.mrf.mxu3 }
0x14a8   :  { %v4233_v54 = vpack.c.bf16 %v4224_v17, %v4222_v39 }
0x14a9   :  { %v4282_v19 = vpop.f32.mrf.mxu0 }
0x14aa   :  { %v4290_v58 = vpack.c.bf16 %v4282_v19, %v4282_v19 }
0x14ac   :  { %v4301_v12 = vsel %vm1249_vm4, %v4290_v58, 0 }
0x14ad   :  { %4309 = vmatpush.bf16.msrb.mxu1 %v4301_v12 }
0x14af   :  { %v4227_v20 = vpop.f32.mrf.mxu3 }
0x14b0   :  { %v4234_v49 = vpack.c.bf16 %v4227_v20, %v4227_v20 }
0x14b1   :  { %v4284_v33 = vpop.f32.mrf.mxu0  ;;  %4310 = vmatpush.bf16.msrb.mxu1 %v4289_v48 }
0x14b2   :  { %v4326_v51 = vsel %vm1249_vm4, %v4234_v49, 0 }
0x14b3   :  { %4334 = vmatpush.bf16.msrb.mxu2 %v4326_v51 }
0x14b4   :  { %6049 = vmatmul.msk.bf16.vlgmr.msrb.gmra.mxu1 %vm4296_vm11, %v6048_v50 }
0x14b5   :  { %4462 = vmatpush.bf16.msra.mxu1 %v6422_v47  ;;  %v6528_v47 = vld [vmem:[%s8240_s19] ss:$0 sm:$0xff] }
0x14b7   :  { %v4229_v42 = vpop.f32.mrf.mxu3  ;;  %4335 = vmatpush.bf16.msrb.mxu2 %v4233_v54  ;;  %v4599_v54 = vld [vmem:[#allocation34] sm:$0x3] }
0x14b8   :  { %v4625_v42 = vld [vmem:[#allocation34 + $0x2] sm:$0x3] }
0x14b9   :  { %4463 = vmatpush.bf16.msra.mxu1 %v6421_v52 }
0x14ba   :  { %6054 = vmatmul.msk.bf16.vlgmr.msrb.gmra.mxu2 %vm4296_vm11, %v6053_v24  ;;  %v4675_v24 = vld [vmem:[#allocation36 + $0x2] sm:$0x3] }
0x14bd   :  { %4464 = vmatpush.bf16.msra.mxu1 %v6420_v55  ;;  %v4648_v55 = vld [vmem:[#allocation36] sm:$0x3] }
0x14bf   :  { %v4384_v57 = vpop.f32.mrf.mxu3 }
0x14c1   :  { %4465 = vmatpush.bf16.msra.mxu1 %v6419_v56  ;;  %v6432_v56 = vld [vmem:[%s8241_s5 + $0x18] sm:$0xff] }
0x14c4   :  { %6110 = vmatmul.msk.bf16.vlgmr.msra.gmra.mxu1 %vm933_vm2, %v8101_v60 }
0x14c7   :  { %v4386_v59 = vpop.f32.mrf.mxu3 }
0x14c8   :  { %v4396_v1 = vpack.c.bf16 %v4386_v59, %v4384_v57  ;;  %v6431_v57 = vld [vmem:[%s8241_s5 + $0x10] sm:$0xff]  ;;  %v6436_v59 = vld [vmem:[%s8241_s5 + $0x38] sm:$0xff] }
0x14cf   :  { %v4389_v61 = vpop.f32.mrf.mxu3 }
0x14d0   :  { %v4397_v25 = vpack.c.bf16 %v4389_v61, %v4389_v61  ;;  %v6430_v61 = vld [vmem:[%s8241_s5 + $0x8] sm:$0xff] }
0x14d2   :  { %v4407_v43 = vsel %vm1249_vm4, %v4397_v25, 0  ;;  %v6435_v25 = vld [vmem:[%s8241_s5 + $0x30] sm:$0xff] }
0x14d3   :  { %4415 = vmatpush.bf16.msrb.mxu0 %v4407_v43  ;;  %v6429_v43 = vld [vmem:[%s8241_s5] sm:$0xff] }
0x14d4   :  { %6111 = vmatmul.msk.bf16.gmra.mxu1 %vm933_vm2, %v8107_v38 }
0x14d7   :  { %v4391_v3 = vpop.f32.mrf.mxu3  ;;  %4416 = vmatpush.bf16.msrb.mxu0 %v4396_v1 }
0x14da   :  { %6085 = vmatmul.msk.bf16.vlgmr.msrb.gmra.mxu0 %vm4296_vm11, %v6084_v2 }
0x14db   :  { %4545 = vmatpush.bf16.msra.mxu0 %v6427_v0 }
0x14df   :  { %4546 = vmatpush.bf16.msra.mxu0 %v6426_v4 }
0x14e3   :  { %4547 = vmatpush.bf16.msra.mxu0 %v6425_v8 }
0x14e7   :  { %4548 = vmatpush.bf16.msra.mxu0 %v6424_v14 }
0x14ea   :  { %6141 = vmatmul.msk.bf16.vlgmr.msra.gmra.mxu0 %vm933_vm2, %v8101_v60 }
0x14eb   :  { %4732 = vmatpush.bf16.msrb.mxu0 %v6436_v59 }
0x14ef   :  { %4733 = vmatpush.bf16.msrb.mxu0 %v6435_v25 }
0x14f3   :  { %4734 = vmatpush.bf16.msrb.mxu0 %v6434_v62 }
0x14f7   :  { %4735 = vmatpush.bf16.msrb.mxu0 %v6433_v63 }
0x14fa   :  { %6142 = vmatmul.msk.bf16.gmra.mxu0 %vm933_vm2, %v8107_v38  ;;  %v6145_v38 = vld [vmem:[#allocation33 + $0x20] sm:$0xf] }
0x14fb   :  { %v6146_v40 = vor.u32 %v6428_v23, %v6145_v38 }
0x1531   :  { %v4312_v15 = vpop.f32.mrf.mxu1 }
0x1539   :  { %v4314_v5 = vpop.f32.mrf.mxu1 }
0x153d   :  { %v4337_v36 = vpop.f32.mrf.mxu2 }
0x153e   :  { %v4338_v28 = vadd.f32 %v4337_v36, %v4312_v15  ;;  %v6438_v36 = vld [vmem:[#allocation37 + $0x8] sm:$0xff] }
0x1541   :  { %v4467_v6 = vpop.f32.mrf.mxu1 }
0x1545   :  { %v4339_v18 = vpop.f32.mrf.mxu2 }
0x1546   :  { %v4340_v44 = vadd.f32 %v4339_v18, %v4314_v5  ;;  %v6440_v5 = vld [vmem:[#allocation37 + $0x18] sm:$0xff] }
0x1549   :  { %v4469_v7 = vpop.f32.mrf.mxu1 }
0x154a   :  { %v4479_v29 = vpack.c.bf16 %v4469_v7, %v4467_v6  ;;  %v6439_v6 = vld [vmem:[#allocation37 + $0x10] sm:$0xff] }
0x1551   :  { %v4472_v9 = vpop.f32.mrf.mxu1 }
0x1552   :  { %v4480_v21 = vpack.c.bf16 %v4472_v9, %v4472_v9 }
0x1554   :  { %v4490_v22 = vsel %vm1249_vm4, %v4480_v21, 0  ;;  %v6437_v21 = vld [vmem:[#allocation37] sm:$0xff] }
0x1555   :  { %4498 = vmatpush.bf16.msra.mxu2 %v4490_v22 }
0x1557   :  { %v4418_v30 = vpop.f32.mrf.mxu0 }
0x1558   :  { %v4423_v26 = vadd.f32 %v4418_v30, %v4338_v28 }
0x1559   :  { %v4474_v32 = vpop.f32.mrf.mxu1  ;;  %4499 = vmatpush.bf16.msra.mxu2 %v4479_v29 }
0x155c   :  { %6116 = vmatmul.msk.bf16.vlgmr.msra.gmra.mxu2 %vm4296_vm11, %v6115_v31 }
0x155f   :  { %v4420_v11 = vpop.f32.mrf.mxu0 }
0x1560   :  { %v4424_v60 = vadd.f32 %v4420_v11, %v4340_v44  ;;  %v6530_v44 = vld [vmem:[%s8243_s24] ss:$0 sm:$0xff] }
0x1567   :  { %v4550_v10 = vpop.f32.mrf.mxu0 }
0x156f   :  { %v4552_v16 = vpop.f32.mrf.mxu0 }
0x1570   :  { %v4562_v39 = vpack.c.bf16 %v4552_v16, %v4550_v10 }
0x1577   :  { %v4555_v34 = vpop.f32.mrf.mxu0 }
0x1578   :  { %v4563_v35 = vpack.c.bf16 %v4555_v34, %v4555_v34 }
0x157a   :  { %v4573_v37 = vsel %vm1249_vm4, %v4563_v35, 0  ;;  %vm4859_vm4 = vcmask 3072  }
0x157b   :  { %4581 = vmatpush.bf16.msrb.mxu2 %v4573_v37 }
0x157f   :  { %v4557_v17 = vpop.f32.mrf.mxu0  ;;  %4582 = vmatpush.bf16.msrb.mxu2 %v4562_v39 }
0x1582   :  { %6147 = vmatmul.msk.bf16.vlgmr.msrb.gmra.mxu2 %vm4296_vm11, %v6146_v40 }
0x15df   :  { %v4501_v19 = vpop.f32.mrf.mxu2 }
0x15e0   :  { %v4506_v45 = vadd.f32 %v4501_v19, %v4423_v26 }
0x15e7   :  { %v4503_v58 = vpop.f32.mrf.mxu2 }
0x15e8   :  { %v4507_v48 = vadd.f32 %v4503_v58, %v4424_v60 }
0x1605   :  { %v4584_v12 = vpop.f32.mrf.mxu2 }
0x1606   :  { %v4589_v46 = vadd.f32 %v4584_v12, %v4506_v45 }
0x1608   :  { %v4595_v49 = vadd.f32 %v6528_v47, %v4589_v46 }
0x160a   :  { %v4597_v51 = vmax.f32 %v4595_v49, 0.0 }
0x160d   :  { %v4586_v20 = vpop.f32.mrf.mxu2 }
0x160e   :  { %v4590_v50 = vadd.f32 %v4586_v20, %v4507_v48 }
0x1610   :  { %v4596_v33 = vadd.f32 %v6528_v47, %v4590_v50 }
0x1612   :  { %v4598_v52 = vmax.f32 %v4596_v33, 0.0 }
0x1614   :  { %v4600_v41 = vpack.c.bf16 %v4598_v52, %v4597_v51 }
0x1616   :  { %v4607_v53 = vsel %vm4605_vm12, %v4600_v41, 0 }
0x1617   :  { %4616 = vmatpush.bf16.msrb.mxu3 %v4607_v53  ;;  %4636 = vmatpush.bf16.msrb.mxu1 %v4607_v53 }
0x1618   :  { %4659 = vmatpush.bf16.msra.mxu2 %v4607_v53 }
0x161a   :  { %6148 = vmatmul.msk.bf16.vlgmr.msrb.gmra.mxu3 %vm4601_vm13, %v4599_v54  ;;  %6149 = vmatmul.msk.bf16.vlgmr.msrb.gmra.mxu1 %vm4601_vm13, %v4625_v42 }
0x161b   :  { %4686 = vmatpush.bf16.msra.mxu3 %v4607_v53  ;;  %6150 = vmatmul.msk.bf16.vlgmr.msra.gmra.mxu2 %vm4601_vm13, %v4648_v55 }
0x161c   :  { %4772 = vmatpush.bf16.msra.mxu1 %v6432_v56  ;;  %4831 = vmatpush.bf16.msrb.mxu2 %v6440_v5 }
0x1620   :  { %4773 = vmatpush.bf16.msra.mxu1 %v6431_v57  ;;  %4832 = vmatpush.bf16.msrb.mxu2 %v6439_v6 }
0x1624   :  { %4774 = vmatpush.bf16.msra.mxu1 %v6430_v61  ;;  %4833 = vmatpush.bf16.msrb.mxu2 %v6438_v36 }
0x1628   :  { %4775 = vmatpush.bf16.msra.mxu1 %v6429_v43  ;;  %4834 = vmatpush.bf16.msrb.mxu2 %v6437_v21 }
0x162a   :  { %6151 = vmatmul.msk.bf16.vlgmr.msra.gmra.mxu3 %vm4601_vm13, %v4675_v24 }
0x1697   :  { %v4638_v7 = vpop.f32.mrf.mxu1 }
0x1698   :  { %4643 = vrot.lane.b32.xlu0 %v4638_v7, %s7256_s18  ;;  %s8244_s18 = sld [smem:[#allocation85_spill]] }
0x169d   :  { %v4618_v0 = vpop.f32.mrf.mxu3 }
0x169e   :  { %4623 = vst.msk [vmem:[#allocation39] sm:$0xf] %vm4622_vm14, %v4618_v0  ;;  %v4661_v1 = vpop.f32.mrf.mxu2 }
0x169f   :  { %v4665_v2 = vpack.c.bf16 %v4661_v1, %v4661_v1  ;;  %v4640_v9 = vpop.f32.mrf.mxu1 }
0x16a1   :  { %6185 = vmatmul.msk.bf16.vlgmr.msra.gmra.mxu1 %vm933_vm2, %v4665_v2 }
0x16a5   :  { %v4620_v3 = vpop.f32.mrf.mxu3 }
0x16a6   :  { %v4663_v4 = vpop.f32.mrf.mxu2 }
0x16ad   :  { %v4688_v8 = vpop.f32.mrf.mxu3 }
0x16ae   :  { %v4692_v14 = vpack.c.bf16 %v4688_v8, %v4688_v8 }
0x16b0   :  { %6168 = vmatmul.msk.bf16.vlgmr.msrb.gmra.mxu0 %vm933_vm2, %v4692_v14 }
0x16b5   :  { %v4690_v15 = vpop.f32.mrf.mxu3 }
0x170a   :  { %v4644_v18 = vpop.permute.xlu0 %4643 }
0x170b   :  { %4647 = vst.msk [vmem:[#allocation39] sm:$0xf] %vm4646_vm15, %v4644_v18 }
0x171e   :  { %v4777_v22 = vpop.f32.mrf.mxu1 }
0x1726   :  { %v4779_v27 = vpop.f32.mrf.mxu1 }
0x172d   :  { %v4737_v28 = vpop.f32.mrf.mxu0 }
0x172e   :  { %v4778_v29 = vadd.f32 %v4777_v22, %v4737_v28 }
0x1730   :  { %v4785_v30 = vadd.f32 %v6529_v13, %v4778_v29 }
0x1732   :  { %v4786_v31 = vmax.f32 %v4785_v30, 0.0 }
0x1734   :  { %v4795_v26 = vpack.c.bf16 %v4786_v31, %v4786_v31 }
0x1735   :  { %v4739_v32 = vpop.f32.mrf.mxu0 }
0x1736   :  { %6202 = vmatmul.msk.bf16.vlgmr.msrb.gmra.mxu2 %vm933_vm2, %v4795_v26 }
0x17b9   :  { %v4836_v11 = vpop.f32.mrf.mxu2 }
0x17ba   :  { %v4837_v60 = vadd.f32 %v6530_v44, %v4836_v11 }
0x17bc   :  { %v4840_v10 = vsub.f32 0.0, %v4837_v60  ;;  %v4862_v16 = vsel %vm4861_vm0, %v4837_v60, -inf }
0x17bd   :  { %4863 = vmax.xlane.f32.xlu1 %v4862_v16 }
0x17be   :  { %v4841_v34 = vmul.f32 1.442695, %v4840_v10 }
0x17c0   :  { %6549 = vpow2.f32 %v4841_v34 }
0x17c1   :  { %v4838_v35 = vpop.f32.mrf.mxu2 }
0x17c6   :  { %v6550_v37 = vpop.eup %6549 }
0x17c7   :  { %v4843_v38 = vadd.f32 1.0, %v6550_v37 }
0x17c9   :  { %6551 = vrcp.f32 %v4843_v38  ;;  %v4855_v17 = vand.u32 2147483648, %v4843_v38  ;;  %v4853_v58 = vand.u32 2147483647, %v4843_v38  ;;  %vm4849_vm2 = vweird.f32 %v4843_v38 }
0x17cb   :  { %v4856_v45 = vor.u32 1.1754944e-38, %v4855_v17  ;;  %vm4854_vm5 = vcmp.eq.f32.partialorder %v4853_v58, 8.507059e+37 }
0x17cf   :  { %v6552_v23 = vpop.eup %6551 }
0x17d0   :  { %v4845_v39 = vmul.f32 %v6552_v23, %v4843_v38  ;;  %vm4850_vm1 = vweird.f32 %v6552_v23 }
0x17d1   :  { %vm4851_vm3 = vmor %vm4849_vm2, %vm4850_vm1 }
0x17d2   :  { %v4846_v40 = vsub.f32 1.0, %v4845_v39 }
0x17d4   :  { %v4847_v19 = vmul.f32 %v6552_v23, %v4846_v40 }
0x17d6   :  { %v4848_v12 = vadd.f32 %v6552_v23, %v4847_v19 }
0x17d8   :  { %v4852_v46 = vsel %vm4851_vm3, %v6552_v23, %v4848_v12 }
0x17d9   :  { %v4857_v47 = vsel %vm4854_vm5, %v4856_v45, %v4852_v46 }
0x17da   :  { %4860 = vst.msk [vmem:[%s8244_s18] sm:$0xf] %vm4859_vm4, %v4857_v47 }
0x1830   :  { %v4864_v48 = vpop.xlane.xlu1 %4863 }
0x1831   :  { %v8159_v20 = vsub.f32 %v4837_v60, %v4864_v48 }
0x1833   :  { %v4866_v49 = vmul.f32 1.442695, %v8159_v20 }
0x1835   :  { %6553 = vpow2.f32 %v4866_v49 }
0x183b   :  { %v6554_v50 = vpop.eup %6553 }
0x183c   :  { %4869 = vrot.lane.b32.xlu2 %v6554_v50, %s7285_s28 }
0x1896   :  { %v4870_v33 = vpop.permute.xlu2 %4869 }
0x1897   :  { %v4873_v51 = vsel %vm4872_vm6, %v4870_v33, 0.0 }
0x1898   :  { %4874 = vadd.xlane.f32.xlu2 %v4873_v51 }
0x190b   :  { %v4875_v52 = vpop.xlane.xlu2 %4874 }
0x190c   :  { %7108 = shalt.err (!%p7105_p2)
}
0x190d   :  { %4909 = dma.vmem_to_hbm [thread:$0]  %s4905_s1, 32, %s4907_s2, [#allocation41]   ;;  %6555 = vlog2.f32 %v4875_v52 }
0x190e   :  { %s4895_s9 = sshll.u32 %s7498_s30, 4  ;;  %s7287_s22 = smov [#allocation39]   ;;  %s4896_s9 = int_to_ptr.hbm [resolvable:$true] %s4895_s9 }
0x190f   :  { %s4893_s16 = sshll.u32 %s7287_s22, 4  ;;  %s7121_s4 = sshra.s32 %s4896_s9, 4  ;;  %s4894_s16 = int_to_ptr.vmem [resolvable:$true] %s4893_s16  ;;  %s7122_s4 = int_to_ptr.hbm [resolvable:$true] %s7121_s4 }
0x1910   :  { %s7123_s3 = scalar_lea.hbm %s7122_s4, 4  ;;  %s7125_s12 = scalar_lea.hbm %s7498_s30, 4 }
0x1911   :  { %p7124_p3 = scmp.ne.s32.totalorder %s7122_s4, %s7123_s3  ;;  %p7126_p4 = scmp.lt.s32.totalorder %s7122_s4, %s7498_s30 }
0x1912   :  { %p7127_p5 = scmp.lt.s32.totalorder %s7125_s12, %s7123_s3 }
0x1914   :  { %p7128_p6 = por %p7127_p5, %p7126_p4 }
0x1916   :  { %p7129_p7 = pnand %p7128_p6, %p7124_p3 }
0x1918   :  { %7132 = shalt.err (!%p7129_p7)
}
0x1919   :  { %4898 = dma.vmem_to_hbm [thread:$0]  %s4894_s16, 64, %s4896_s9, [#allocation6]   ;;  %v6556_v41 = vpop.eup %6555 }
0x191a   :  { %s7288_s8 = smov [#allocation42]   ;;  %s4917_s10 = sshll.u32 %s7508_s27, 4  ;;  %s4918_s10 = int_to_ptr.hbm [resolvable:$true] %s4917_s10 }
0x191b   :  { %s4915_s15 = sshll.u32 %s7288_s8, 4  ;;  %s7145_s17 = sshra.s32 %s4918_s10, 4  ;;  %s4916_s15 = int_to_ptr.vmem [resolvable:$true] %s4915_s15  ;;  %s7146_s17 = int_to_ptr.hbm [resolvable:$true] %s7145_s17 }
0x191c   :  { %s7147_s13 = scalar_lea.hbm %s7146_s17, 2  ;;  %s7149_s11 = scalar_lea.hbm %s7508_s27, 2 }
0x191d   :  { %p7148_p8 = scmp.ne.s32.totalorder %s7146_s17, %s7147_s13  ;;  %p7150_p9 = scmp.lt.s32.totalorder %s7146_s17, %s7508_s27 }
0x191e   :  { %p7151_p10 = scmp.lt.s32.totalorder %s7149_s11, %s7147_s13 }
0x1920   :  { %p7152_p11 = por %p7151_p10, %p7150_p9 }
0x1922   :  { %p7153_p12 = pnand %p7152_p11, %p7148_p8 }
0x1924   :  { %7156 = shalt.err (!%p7153_p12)
}
0x1925   :  { %4920 = dma.vmem_to_hbm [thread:$0]  %s4916_s15, 32, %s4918_s10, [#allocation41]   ;;  %v4877_v53 = vmul.f32 0.6931472, %v6556_v41 }
0x1926   :  { %s7289_s30 = smov [#allocation43]   ;;  %s4928_s26 = sshll.u32 %s7513_s6, 4  ;;  %s4929_s26 = int_to_ptr.hbm [resolvable:$true] %s4928_s26 }
0x1927   :  { %v4878_v54 = vsub.f32 %v8159_v20, %v4877_v53  ;;  %s4926_s25 = sshll.u32 %s7289_s30, 4  ;;  %s7169_s27 = sshra.s32 %s4929_s26, 4  ;;  %s4927_s25 = int_to_ptr.vmem [resolvable:$true] %s4926_s25  ;;  %s7170_s27 = int_to_ptr.hbm [resolvable:$true] %s7169_s27 }
0x1928   :  { %s7171_s23 = scalar_lea.hbm %s7170_s27, 4  ;;  %s7173_s29 = scalar_lea.hbm %s7513_s6, 4 }
0x1929   :  { %4880 = vrot.lane.b32.xlu0 %v4878_v54, %s7285_s28  ;;  %p7172_p13 = scmp.ne.s32.totalorder %s7170_s27, %s7171_s23  ;;  %p7174_p0 = scmp.lt.s32.totalorder %s7170_s27, %s7513_s6 }
0x192a   :  { %p7175_p1 = scmp.lt.s32.totalorder %s7173_s29, %s7171_s23 }
0x192c   :  { %p7176_p2 = por %p7175_p1, %p7174_p0 }
0x192e   :  { %p7177_p3 = pnand %p7176_p2, %p7172_p13 }
0x199b   :  { %v4881_v55 = vpop.permute.xlu0 %4880 }
0x199c   :  { %4883 = vst.msk [vmem:[#allocation43] sm:$0xf] %vm4872_vm6, %v4881_v55 }
0x199d   :  { %7180 = shalt.err (!%p7177_p3)
}
0x199e   :  { %4931 = dma.vmem_to_hbm [thread:$0]  %s4927_s25, 64, %s4929_s26, [#allocation44]  }
0x199f   :  { %7205 = dma.done.wait [#allocation6], 64  }
0x19a0   :  { %7206 = vsyncadd [#allocation6], 4294967232 }
0x19a1   :  { %7207 = dma.done.wait [#allocation41], 64  }
0x19a2   :  { %7208 = vsyncadd [#allocation41], 4294967232 }
0x19a3   :  { %7209 = dma.done.wait [#allocation44], 64  }
0x19a4   :  { %7210 = vsyncadd [#allocation44], 4294967232 }
0x19a5   :  { %4952 = vsyncpa [#allocation5], 1 }
0x19a6   :  { %4953 = vsyncpa [#allocation8], 1 }
0x19a7   :  { %4954 = vsyncpa [#allocation11], 1 }
0x19a8   :  { %4955 = vsyncpa [#allocation14], 1 }
0x19a9   :  { %4956 = vsyncpa [#allocation17], 1 }
0x19aa   :  { %4957 = vsyncpa [#allocation20], 1 }
0x19ab   :  { %4958 = vsyncpa [#allocation23], 1 }
0x19ac   :  { %4959 = vsyncpa [#allocation26], 1 }
0x19ad   :  { %4960 = vsyncpa [#allocation29], 1 }
0x19ae   :  { %4961 = vsyncpa [#allocation32], 1 }
0x19af   :  { %4962 = vsyncpa [#allocation35], 1 }
0x19b0   :  { %4963 = vsyncpa [#allocation38], 1 }
0x19b1   :  { %4964 = vsyncpa [#allocation6], 1 }
0x19b2   :  { %4965 = vsyncpa [#allocation41], 1 }
0x19b3   :  { %4966 = vsyncpa [#allocation44], 1 }

</bundles_post_ra>
